<compile_context>
chip_gen: v5e
topology: v5e:2x2
jax: 0.10.0
libtpu: 0.0.40
codegen_flags: <defaults>
</compile_context>

<pallas_src>
import math

import numpy as np
import jax
import jax.numpy as jnp
from jax import lax
from jax.experimental import pallas as pl
from jax.experimental.pallas import tpu as pltpu

NUM_ATTR = 6          # num_attributes
OBJ_TYPES = 3         # object_types = 2 + 1
N_EMBD = 32           # hidden_size of the (synthetic) HF backbone
N_HEAD = 4
HEAD_DIM = N_EMBD // N_HEAD
FFN_DIM = 4 * N_EMBD
LN_EPS = 1e-5
NEG_INF = -1e30


def _round_up(x, m):
    return (x + m - 1) // m * m


# ----------------------------------------------------------------------------
# Pallas kernel: one grid step = one block of NT tokens (whole sequences).
# Activations are (features, tokens): tokens on lanes, features on sublanes.
# ----------------------------------------------------------------------------
def _make_kernel(seq_len, chunk, n_chunks):
    O = seq_len                                   # objects (tokens) per sequence
    CH = chunk                                    # attention chunk width (tokens)
    NC = n_chunks                                 # chunks per grid block

    def kernel(typ_ref, data_ref, bias_ref, comb_ref,
               wtok_ref, btok_ref, objemb_ref,
               wqkv_ref, bqkv_ref,
               wo_ref, bo_ref, ln1g_ref, ln1b_ref,
               w1_ref, b1_ref, w2_ref, b2_ref, ln2g_ref, ln2b_ref,
               hid_ref, attn_ref, ctx_ref):
        f32 = jnp.float32
        bf16 = jnp.bfloat16

        # ---- token embedding + per-object-type embedding (f32, tiny K=6) ----
        embT = (jnp.dot(wtok_ref[...], data_ref[...],
                        preferred_element_type=f32) + btok_ref[...])   # (E, T)
        typ = typ_ref[...]                                             # (1, T)
        car = (typ == 1.0).astype(f32)
        route = (typ == 2.0).astype(f32)
        other = (1.0 - car) * (1.0 - route)
        # masks sum to 1, so sum_i (emb + obj_e[i])*m_i == emb + sum_i obj_e[i]*m_i
        obj_sel = (car * objemb_ref[:, 0:1] + route * objemb_ref[:, 1:2]
                   + other * objemb_ref[:, 2:3])                       # (E, T)
        xT = embT + obj_sel                                            # (E, T)
        # nn.Dropout(embd_pdrop): identity in eval mode.
        # TODO(synk): padded object rows participate in attention / LN, exactly
        # as in the provided reference (no HF-style attention_mask).

        def layer_norm_t(yT, g, b):               # LN over the feature (sublane) axis
            mu = jnp.mean(yT, axis=0, keepdims=True)
            var = jnp.mean((yT - mu) ** 2, axis=0, keepdims=True)
            return (yT - mu) * lax.rsqrt(var + LN_EPS) * g + b

        # ---- fused QKV projection (q already scaled by 1/sqrt(D) in wrapper) -
        x_bf = xT.astype(bf16)
        qkvT = (jnp.dot(wqkv_ref[...], x_bf,
                        preferred_element_type=f32) + bqkv_ref[...])   # (3E, T)

        bias = bias_ref[...]                                           # (CH, CH)
        comb_bf = comb_ref[...]                                        # (O, CH) bf16

        # ---- chunked block-diagonal self-attention ---------------------------
        for c in range(NC):
            c0 = c * CH
            for h in range(N_HEAD):
                lo = h * HEAD_DIM
                qh = qkvT[lo:lo + HEAD_DIM, c0:c0 + CH].astype(bf16)          # (D, CH)
                kh = qkvT[N_EMBD + lo:N_EMBD + lo + HEAD_DIM,
                          c0:c0 + CH].astype(bf16)                            # (D, CH)
                vh = qkvT[2 * N_EMBD + lo:2 * N_EMBD + lo + HEAD_DIM,
                          c0:c0 + CH].astype(bf16)                            # (D, CH)
                # contract HEAD_DIM directly (no materialized (CH, D) transpose)
                s = lax.dot_general(qh, kh, (((0,), (0,)), ((), ())),
                                    preferred_element_type=f32)               # (CHq, CHk)
                s = s + bias                               # block-diagonal mask
                s = s - jnp.max(s, axis=-1, keepdims=True)
                p = jnp.exp(s)
                p = p * pl.reciprocal(jnp.sum(p, axis=-1, keepdims=True),
                                      approx=True)
                p_bf = p.astype(bf16)
                # per-sequence (O, O) attention maps, query-token-major on lanes
                attn_ref[h, :, c0:c0 + CH] = lax.dot_general(
                    comb_bf, p_bf, (((1,), (1,)), ((), ())),
                    preferred_element_type=f32)                               # (O, CHq)
                # head context written straight into the (E, T) scratch
                ctx_ref[lo:lo + HEAD_DIM, c0:c0 + CH] = lax.dot_general(
                    vh, p_bf, (((1,), (1,)), ((), ())),
                    preferred_element_type=f32)                               # (D, CHq)

        attn_outT = (jnp.dot(wo_ref[...], ctx_ref[...].astype(bf16),
                             preferred_element_type=f32) + bo_ref[...])
        x1T = layer_norm_t(xT + attn_outT, ln1g_ref[...], ln1b_ref[...])

        hT = jax.nn.gelu(jnp.dot(w1_ref[...], x1T.astype(bf16),
                                 preferred_element_type=f32) + b1_ref[...])
        ffnT = (jnp.dot(w2_ref[...], hT.astype(bf16),
                        preferred_element_type=f32) + b2_ref[...])
        hid_ref[...] = layer_norm_t(x1T + ffnT, ln2g_ref[...], ln2b_ref[...])

    return kernel


# ----------------------------------------------------------------------------
# Wrapper: batch tiling, weight prep (hoisted), pallas_call, output un-packing.
# ----------------------------------------------------------------------------
def encoder_forward(input_type, input_data, params, *, tokens_per_block=512):
    """Returns (last_hidden_state (B,O,E), attention maps (B,H,O,O))."""
    B, O, A = input_data.shape
    assert A == NUM_ATTR

    # -- token-block / chunk geometry ------------------------------------------
    unit = O * 128 // math.gcd(O, 128)           # lcm(O, 128): legal granularity
    # TODO(synk): pathological O (large prime) makes `unit` huge; cap if needed.
    CH = 128 if 128 % O == 0 else unit           # attention chunk width (tokens)
    NT = max(unit, (tokens_per_block // unit) * unit)
    NT = min(NT, _round_up(B * O, unit))         # never over-pad tiny batches
    # prefer >= 2 grid steps when the batch allows it (v7x has 2 TensorCores)
    if _round_up(B * O, NT) // NT < 2 and NT > unit:
        half = max(unit, ((NT // 2) // unit) * unit)
        if _round_up(B * O, half) // half >= 2:
            NT = half
    NC = NT // CH                                # chunks per grid block
    Np = _round_up(B * O, NT)                    # total padded tokens
    B_pad = Np // O                              # NT % O == 0  =>  whole sequences
    n_blk = Np // NT

    f32, bf16 = jnp.float32, jnp.bfloat16
    pad = B_pad - B
    typ_t = jnp.pad(input_type, ((0, pad), (0, 0), (0, 0))).reshape(Np, 1).T
    dat_t = jnp.pad(input_data, ((0, pad), (0, 0), (0, 0))).reshape(Np, A).T

    # -- grid-invariant constants (hoisted out of the kernel) -------------------
    seq_id = np.arange(CH) // O
    mask_bias = np.where(seq_id[:, None] == seq_id[None, :],
                         0.0, NEG_INF).astype(np.float32)              # (CH, CH)
    comb = (np.arange(CH)[None, :] % O
            == np.arange(O)[:, None]).astype(np.float32)               # (O, CH)
    mask_bias = jnp.asarray(mask_bias)
    comb = jnp.asarray(comb, dtype=bf16)

    hp = jax.lax.Precision.HIGHEST
    obj_emb = (jnp.einsum("ia,iah->ih", params["obj_tok"], params["obj_w"],
                          precision=hp) + params["obj_b"])             # (3, E)

    def col(b):                          # (1, F) bias -> (F, 1) column, f32
        return b.reshape(-1, 1).astype(f32)

    # fused QKV weight (3E, E); fold the 1/sqrt(HEAD_DIM) scale into q.
    scale = 1.0 / math.sqrt(HEAD_DIM)
    wqkv = jnp.concatenate([(params["wq"] * scale).T, params["wk"].T,
                            params["wv"].T], axis=0).astype(bf16)      # (3E, E)
    bqkv = jnp.concatenate([params["bq"][0] * scale, params["bk"][0],
                            params["bv"][0]]).reshape(-1, 1).astype(f32)

    weights = [
        params["w_tok"].T.astype(f32), col(params["b_tok"]), obj_emb.T.astype(f32),
        wqkv, bqkv,
        params["wo"].T.astype(bf16),   col(params["bo"]),
        col(params["ln1_g"]),          col(params["ln1_b"]),
        params["w1"].T.astype(bf16),   col(params["b1"]),
        params["w2"].T.astype(bf16),   col(params["b2"]),
        col(params["ln2_g"]),          col(params["ln2_b"]),
    ]

    vmem_spec = pl.BlockSpec(memory_space=pltpu.MemorySpace.VMEM)
    in_specs = ([pl.BlockSpec((1, NT), lambda b: (0, b)),
                 pl.BlockSpec((A, NT), lambda b: (0, b))]
                + [vmem_spec] * (2 + len(weights)))

    out_shape = (jax.ShapeDtypeStruct((N_EMBD, Np), f32),
                 jax.ShapeDtypeStruct((N_HEAD, O, Np), f32))
    out_specs = (pl.BlockSpec((N_EMBD, NT), lambda b: (0, b)),
                 pl.BlockSpec((N_HEAD, O, NT), lambda b: (0, 0, b)))

    hid_t, attn_t = pl.pallas_call(
        _make_kernel(O, CH, NC),
        grid=(n_blk,),
        in_specs=in_specs,
        out_specs=out_specs,
        out_shape=out_shape,
        scratch_shapes=[pltpu.VMEM((N_EMBD, NT), f32)],   # head-context accumulator
        compiler_params=pltpu.CompilerParams(
            dimension_semantics=("parallel",)),
    )(typ_t, dat_t, mask_bias, comb, *weights)

    # layout plumbing back to the PyTorch conventions (plain XLA, outside kernel)
    hidden = hid_t.T.reshape(B_pad, O, N_EMBD)[:B]
    attn = attn_t.reshape(N_HEAD, O, B_pad, O).transpose(2, 0, 3, 1)[:B]
    return hidden, attn


# ----------------------------------------------------------------------------
# Deterministic parameter init (shapes from EncoderModel.__init__)
# ----------------------------------------------------------------------------
def init_params(key):
    keys = jax.random.split(key, 20)

    def lin(k, fin, fout):
        k1, k2 = jax.random.split(k)
        w = jax.random.normal(k1, (fin, fout), jnp.float32) * 0.02
        b = jax.random.normal(k2, (1, fout), jnp.float32) * 0.02
        return w, b

    p = {}
    p["cls_emb"] = jax.random.normal(keys[0], (1, NUM_ATTR + 1), jnp.float32)
    p["eos_emb"] = jax.random.normal(keys[1], (1, NUM_ATTR + 1), jnp.float32)
    p["w_tok"], p["b_tok"] = lin(keys[2], NUM_ATTR, N_EMBD)
    p["obj_tok"] = jax.random.normal(keys[3], (OBJ_TYPES, NUM_ATTR), jnp.float32)
    obj_w, obj_b = [], []
    for i in range(OBJ_TYPES):
        w, b = lin(keys[4 + i], NUM_ATTR, N_EMBD)
        obj_w.append(w)
        obj_b.append(b[0])
    p["obj_w"] = jnp.stack(obj_w)        # (3, A, H)
    p["obj_b"] = jnp.stack(obj_b)        # (3, H)
    p["wq"], p["bq"] = lin(keys[7], N_EMBD, N_EMBD)
    p["wk"], p["bk"] = lin(keys[8], N_EMBD, N_EMBD)
    p["wv"], p["bv"] = lin(keys[9], N_EMBD, N_EMBD)
    p["wo"], p["bo"] = lin(keys[10], N_EMBD, N_EMBD)
    p["w1"], p["b1"] = lin(keys[11], N_EMBD, FFN_DIM)
    p["w2"], p["b2"] = lin(keys[12], FFN_DIM, N_EMBD)
    p["ln1_g"] = jnp.ones((1, N_EMBD), jnp.float32)
    p["ln1_b"] = jnp.zeros((1, N_EMBD), jnp.float32)
    p["ln2_g"] = jnp.ones((1, N_EMBD), jnp.float32)
    p["ln2_b"] = jnp.zeros((1, N_EMBD), jnp.float32)
    return p


# ----------------------------------------------------------------------------
# Host-side glue: pad_sequence_batch (ragged list handling, no Pallas analog)
# ----------------------------------------------------------------------------
def pad_sequence_batch(x_batched, cls_emb, eos_emb):
    ids = x_batched[:, 0].astype(np.int32)
    toks = x_batched[:, 1:]
    B = int(ids[-1]) + 1
    seqs = []
    for b in range(B):
        tb = toks[ids == b]
        seqs.append(np.concatenate([cls_emb, tb, eos_emb], axis=0))
    O = max(s.shape[0] for s in seqs)
    out = np.zeros((B, O, toks.shape[1]), dtype=np.float32)
    for b, s in enumerate(seqs):
        out[b, :s.shape[0]] = s
    return out


# ----------------------------------------------------------------------------
# Pure-JAX reference (same math) for validation
# ----------------------------------------------------------------------------
def reference_forward(input_type, input_data, p):
    hp = jax.lax.Precision.HIGHEST
    emb = jnp.einsum("boa,ah->boh", input_data, p["w_tok"], precision=hp) + p["b_tok"]
    obj_emb = jnp.einsum("ia,iah->ih", p["obj_tok"], p["obj_w"], precision=hp) + p["obj_b"]
    car = (input_type == 1.0).astype(jnp.float32)
    route = (input_type == 2.0).astype(jnp.float32)
    other = (1.0 - car) * (1.0 - route)
    masks = [car, route, other]
    x = sum((emb + obj_emb[i]) * masks[i] for i in range(OBJ_TYPES))

    B, O, _ = x.shape

    def split(t):
        return t.reshape(B, O, N_HEAD, HEAD_DIM).transpose(0, 2, 1, 3)

    q = split(jnp.einsum("boh,hk->bok", x, p["wq"], precision=hp) + p["bq"])
    k = split(jnp.einsum("boh,hk->bok", x, p["wk"], precision=hp) + p["bk"])
    v = split(jnp.einsum("boh,hk->bok", x, p["wv"], precision=hp) + p["bv"])
    s = jnp.einsum("bhqd,bhkd->bhqk", q, k, precision=hp) / math.sqrt(HEAD_DIM)
    s = s - s.max(-1, keepdims=True)
    attn = jnp.exp(s)
    attn = attn / attn.sum(-1, keepdims=True)
    ctx = jnp.einsum("bhqk,bhkd->bhqd", attn, v, precision=hp)
    ctx = ctx.transpose(0, 2, 1, 3).reshape(B, O, N_EMBD)
    attn_out = jnp.einsum("boh,hk->bok", ctx, p["wo"], precision=hp) + p["bo"]

    def ln(y, g, b):
        mu = y.mean(-1, keepdims=True)
        var = ((y - mu) ** 2).mean(-1, keepdims=True)
        return (y - mu) * jax.lax.rsqrt(var + LN_EPS) * g + b

    x1 = ln(x + attn_out, p["ln1_g"], p["ln1_b"])
    h = jax.nn.gelu(jnp.einsum("boh,hf->bof", x1, p["w1"], precision=hp) + p["b1"])
    ffn = jnp.einsum("bof,fh->boh", h, p["w2"], precision=hp) + p["b2"]
    out = ln(x1 + ffn, p["ln2_g"], p["ln2_b"])
    return out, attn


if __name__ == "__main__":
    key = jax.random.PRNGKey(0)
    pkey, dkey = jax.random.split(key)
    params = init_params(pkey)

    # Synthetic `idx`: list of per-sample tensors, rows = [batch_id, type, 6 attrs]
    n0, n1 = 5, 6
    types0 = np.array([1, 1, 2, 2, 3], dtype=np.float32)
    types1 = np.array([1, 2, 2, 3, 1, 2], dtype=np.float32)
    attrs = np.asarray(jax.random.normal(dkey, (n0 + n1, NUM_ATTR), jnp.float32))
    idx = [
        np.concatenate([np.zeros((n0, 1), np.float32), types0[:, None], attrs[:n0]], axis=1),
        np.concatenate([np.ones((n1, 1), np.float32), types1[:, None], attrs[n0:]], axis=1),
    ]

    x_batched = np.concatenate(idx, axis=0)                         # (N, 1 + 7)
    input_batch = pad_sequence_batch(
        x_batched, np.asarray(params["cls_emb"]), np.asarray(params["eos_emb"]))
    # input_batch: (B, O, 7) = (2, 8, 7)
    input_type = jnp.asarray(input_batch[:, :, 0:1])                # (B, O, 1)
    input_data = jnp.asarray(input_batch[:, :, 1:])                 # (B, O, 6)

    hidden, attn_map = encoder_forward(input_type, input_data, params)
    jax.block_until_ready(hidden)
    jax.block_until_ready(attn_map)

    ref_hidden, ref_attn = reference_forward(input_type, input_data, params)
    np.testing.assert_allclose(np.asarray(hidden), np.asarray(ref_hidden),
                               rtol=1e-2, atol=1e-2)
    np.testing.assert_allclose(np.asarray(attn_map), np.asarray(ref_attn),
                               rtol=1e-2, atol=1e-2)
    print("KERNEL_OK")
</pallas_src>

<mosaic_0001>
module attributes {stable_mosaic.version = 11 : i64} {
  func.func @kernel(%arg0: i32, %arg1: memref<1x128xf32, #tpu.memory_space<vmem>>, %arg2: memref<6x128xf32, #tpu.memory_space<vmem>>, %arg3: memref<128x128xf32, #tpu.memory_space<vmem>>, %arg4: memref<8x128xbf16, #tpu.memory_space<vmem>>, %arg5: memref<32x6xf32, #tpu.memory_space<vmem>>, %arg6: memref<32x1xf32, #tpu.memory_space<vmem>>, %arg7: memref<32x3xf32, #tpu.memory_space<vmem>>, %arg8: memref<96x32xbf16, #tpu.memory_space<vmem>>, %arg9: memref<96x1xf32, #tpu.memory_space<vmem>>, %arg10: memref<32x32xbf16, #tpu.memory_space<vmem>>, %arg11: memref<32x1xf32, #tpu.memory_space<vmem>>, %arg12: memref<32x1xf32, #tpu.memory_space<vmem>>, %arg13: memref<32x1xf32, #tpu.memory_space<vmem>>, %arg14: memref<128x32xbf16, #tpu.memory_space<vmem>>, %arg15: memref<128x1xf32, #tpu.memory_space<vmem>>, %arg16: memref<32x128xbf16, #tpu.memory_space<vmem>>, %arg17: memref<32x1xf32, #tpu.memory_space<vmem>>, %arg18: memref<32x1xf32, #tpu.memory_space<vmem>>, %arg19: memref<32x1xf32, #tpu.memory_space<vmem>>, %arg20: memref<32x128xf32, #tpu.memory_space<vmem>>, %arg21: memref<4x8x128xf32, #tpu.memory_space<vmem>>, %arg22: memref<32x128xf32, #tpu.memory_space<vmem>>) attributes {dimension_semantics = [#tpu.dimension_semantics<parallel>], iteration_bounds = array<i64: 1>, scalar_prefetch = 0 : i64, scratch_operands = 1 : i64, tpu.core_type = #tpu.core_type<tc>, window_params = [{transform_indices = @transform_0, window_bounds = array<i64: 1, 128>}, {transform_indices = @transform_1, window_bounds = array<i64: 6, 128>}, {pipeline_mode = #tpu.pipeline_mode<synchronous>, transform_indices = @transform_2, window_bounds = array<i64: 128, 128>}, {pipeline_mode = #tpu.pipeline_mode<synchronous>, transform_indices = @transform_3, window_bounds = array<i64: 8, 128>}, {pipeline_mode = #tpu.pipeline_mode<synchronous>, transform_indices = @transform_4, window_bounds = array<i64: 32, 6>}, {pipeline_mode = #tpu.pipeline_mode<synchronous>, transform_indices = @transform_5, window_bounds = array<i64: 32, 1>}, {pipeline_mode = #tpu.pipeline_mode<synchronous>, transform_indices = @transform_6, window_bounds = array<i64: 32, 3>}, {pipeline_mode = #tpu.pipeline_mode<synchronous>, transform_indices = @transform_7, window_bounds = array<i64: 96, 32>}, {pipeline_mode = #tpu.pipeline_mode<synchronous>, transform_indices = @transform_8, window_bounds = array<i64: 96, 1>}, {pipeline_mode = #tpu.pipeline_mode<synchronous>, transform_indices = @transform_9, window_bounds = array<i64: 32, 32>}, {pipeline_mode = #tpu.pipeline_mode<synchronous>, transform_indices = @transform_10, window_bounds = array<i64: 32, 1>}, {pipeline_mode = #tpu.pipeline_mode<synchronous>, transform_indices = @transform_11, window_bounds = array<i64: 32, 1>}, {pipeline_mode = #tpu.pipeline_mode<synchronous>, transform_indices = @transform_12, window_bounds = array<i64: 32, 1>}, {pipeline_mode = #tpu.pipeline_mode<synchronous>, transform_indices = @transform_13, window_bounds = array<i64: 128, 32>}, {pipeline_mode = #tpu.pipeline_mode<synchronous>, transform_indices = @transform_14, window_bounds = array<i64: 128, 1>}, {pipeline_mode = #tpu.pipeline_mode<synchronous>, transform_indices = @transform_15, window_bounds = array<i64: 32, 128>}, {pipeline_mode = #tpu.pipeline_mode<synchronous>, transform_indices = @transform_16, window_bounds = array<i64: 32, 1>}, {pipeline_mode = #tpu.pipeline_mode<synchronous>, transform_indices = @transform_17, window_bounds = array<i64: 32, 1>}, {pipeline_mode = #tpu.pipeline_mode<synchronous>, transform_indices = @transform_18, window_bounds = array<i64: 32, 1>}, {transform_indices = @transform_19, window_bounds = array<i64: 32, 128>}, {transform_indices = @transform_20, window_bounds = array<i64: 4, 8, 128>}]} {
    %c0 = arith.constant 0 : index
    %c0_0 = arith.constant 0 : index
    %0 = vector.load %arg5[%c0, %c0_0] : memref<32x6xf32, #tpu.memory_space<vmem>>, vector<32x6xf32>
    %c0_1 = arith.constant 0 : index
    %c0_2 = arith.constant 0 : index
    %1 = vector.load %arg2[%c0_1, %c0_2] : memref<6x128xf32, #tpu.memory_space<vmem>>, vector<6x128xf32>
    %cst = arith.constant dense<0.000000e+00> : vector<32x128xf32>
    %2 = tpu.matmul %0, %1, %cst {dimension_numbers = #tpu.dot_dimension_numbers<[1], [0], [0], [1], [0, 0, 1, 1], [], []>} : vector<32x6xf32>, vector<6x128xf32>, vector<32x128xf32> -> vector<32x128xf32>
    %c0_3 = arith.constant 0 : index
    %c0_4 = arith.constant 0 : index
    %3 = vector.load %arg6[%c0_3, %c0_4] : memref<32x1xf32, #tpu.memory_space<vmem>>, vector<32x1xf32>
    %4 = vector.broadcast %3 : vector<32x1xf32> to vector<32x128xf32>
    %5 = arith.addf %2, %4 : vector<32x128xf32>
    %c0_5 = arith.constant 0 : index
    %c0_6 = arith.constant 0 : index
    %6 = vector.load %arg1[%c0_5, %c0_6] : memref<1x128xf32, #tpu.memory_space<vmem>>, vector<1x128xf32>
    %cst_7 = arith.constant 1.000000e+00 : f32
    %7 = vector.broadcast %cst_7 : f32 to vector<1x128xf32>
    %8 = arith.cmpf oeq, %6, %7 : vector<1x128xf32>
    %9 = arith.extui %8 : vector<1x128xi1> to vector<1x128xi32>
    %10 = arith.sitofp %9 : vector<1x128xi32> to vector<1x128xf32>
    %cst_8 = arith.constant 2.000000e+00 : f32
    %11 = vector.broadcast %cst_8 : f32 to vector<1x128xf32>
    %12 = arith.cmpf oeq, %6, %11 : vector<1x128xf32>
    %13 = arith.extui %12 : vector<1x128xi1> to vector<1x128xi32>
    %14 = arith.sitofp %13 : vector<1x128xi32> to vector<1x128xf32>
    %cst_9 = arith.constant 1.000000e+00 : f32
    %15 = vector.broadcast %cst_9 : f32 to vector<1x128xf32>
    %16 = arith.subf %15, %10 : vector<1x128xf32>
    %cst_10 = arith.constant 1.000000e+00 : f32
    %17 = vector.broadcast %cst_10 : f32 to vector<1x128xf32>
    %18 = arith.subf %17, %14 : vector<1x128xf32>
    %19 = arith.mulf %16, %18 : vector<1x128xf32>
    %c0_11 = arith.constant 0 : index
    %c0_12 = arith.constant 0 : index
    %20 = vector.load %arg7[%c0_11, %c0_12] : memref<32x3xf32, #tpu.memory_space<vmem>>, vector<32x1xf32>
    %21 = vector.broadcast %10 : vector<1x128xf32> to vector<32x128xf32>
    %22 = vector.broadcast %20 : vector<32x1xf32> to vector<32x128xf32>
    %23 = arith.mulf %21, %22 : vector<32x128xf32>
    %c0_13 = arith.constant 0 : index
    %c1 = arith.constant 1 : index
    %24 = vector.load %arg7[%c0_13, %c1] : memref<32x3xf32, #tpu.memory_space<vmem>>, vector<32x1xf32>
    %25 = vector.broadcast %14 : vector<1x128xf32> to vector<32x128xf32>
    %26 = vector.broadcast %24 : vector<32x1xf32> to vector<32x128xf32>
    %27 = arith.mulf %25, %26 : vector<32x128xf32>
    %28 = arith.addf %23, %27 : vector<32x128xf32>
    %c0_14 = arith.constant 0 : index
    %c2 = arith.constant 2 : index
    %29 = vector.load %arg7[%c0_14, %c2] : memref<32x3xf32, #tpu.memory_space<vmem>>, vector<32x1xf32>
    %30 = vector.broadcast %19 : vector<1x128xf32> to vector<32x128xf32>
    %31 = vector.broadcast %29 : vector<32x1xf32> to vector<32x128xf32>
    %32 = arith.mulf %30, %31 : vector<32x128xf32>
    %33 = arith.addf %28, %32 : vector<32x128xf32>
    %34 = arith.addf %5, %33 : vector<32x128xf32>
    %35 = arith.truncf %34 : vector<32x128xf32> to vector<32x128xbf16>
    %c0_15 = arith.constant 0 : index
    %c0_16 = arith.constant 0 : index
    %36 = vector.load %arg8[%c0_15, %c0_16] : memref<96x32xbf16, #tpu.memory_space<vmem>>, vector<96x32xbf16>
    %cst_17 = arith.constant dense<0.000000e+00> : vector<96x128xf32>
    %37 = tpu.matmul %36, %35, %cst_17 {dimension_numbers = #tpu.dot_dimension_numbers<[1], [0], [0], [1], [0, 0, 1, 1], [], []>} : vector<96x32xbf16>, vector<32x128xbf16>, vector<96x128xf32> -> vector<96x128xf32>
    %c0_18 = arith.constant 0 : index
    %c0_19 = arith.constant 0 : index
    %38 = vector.load %arg9[%c0_18, %c0_19] : memref<96x1xf32, #tpu.memory_space<vmem>>, vector<96x1xf32>
    %39 = vector.broadcast %38 : vector<96x1xf32> to vector<96x128xf32>
    %40 = arith.addf %37, %39 : vector<96x128xf32>
    %c0_20 = arith.constant 0 : index
    %c0_21 = arith.constant 0 : index
    %41 = vector.load %arg3[%c0_20, %c0_21] : memref<128x128xf32, #tpu.memory_space<vmem>>, vector<128x128xf32>
    %c0_22 = arith.constant 0 : index
    %c0_23 = arith.constant 0 : index
    %42 = vector.load %arg4[%c0_22, %c0_23] : memref<8x128xbf16, #tpu.memory_space<vmem>>, vector<8x128xbf16>
    %43 = vector.extract_strided_slice %40 {offsets = [0, 0], sizes = [8, 128], strides = [1, 1]} : vector<96x128xf32> to vector<8x128xf32>
    %44 = arith.truncf %43 : vector<8x128xf32> to vector<8x128xbf16>
    %45 = vector.extract_strided_slice %40 {offsets = [32, 0], sizes = [8, 128], strides = [1, 1]} : vector<96x128xf32> to vector<8x128xf32>
    %46 = arith.truncf %45 : vector<8x128xf32> to vector<8x128xbf16>
    %47 = vector.extract_strided_slice %40 {offsets = [64, 0], sizes = [8, 128], strides = [1, 1]} : vector<96x128xf32> to vector<8x128xf32>
    %48 = arith.truncf %47 : vector<8x128xf32> to vector<8x128xbf16>
    %cst_24 = arith.constant dense<0.000000e+00> : vector<128x128xf32>
    %49 = tpu.matmul %44, %46, %cst_24 {dimension_numbers = #tpu.dot_dimension_numbers<[0], [0], [1], [1], [0, 1, 1, 1], [], []>} : vector<8x128xbf16>, vector<8x128xbf16>, vector<128x128xf32> -> vector<128x128xf32>
    %50 = arith.addf %49, %41 : vector<128x128xf32>
    %cst_25 = arith.constant dense<0xFF800000> : vector<128xf32>
    %51 = vector.multi_reduction <maximumf>, %50, %cst_25 [1] : vector<128x128xf32> to vector<128xf32>
    %52 = vector.shape_cast %51 : vector<128xf32> to vector<128x1xf32>
    %53 = vector.broadcast %52 : vector<128x1xf32> to vector<128x128xf32>
    %54 = arith.subf %50, %53 : vector<128x128xf32>
    %55 = math.exp %54 : vector<128x128xf32>
    %cst_26 = arith.constant dense<0.000000e+00> : vector<128xf32>
    %56 = vector.multi_reduction <add>, %55, %cst_26 [1] : vector<128x128xf32> to vector<128xf32>
    %57 = vector.shape_cast %56 : vector<128xf32> to vector<128x1xf32>
    %58 = tpu.reciprocal %57 {approx = true} : vector<128x1xf32> -> vector<128x1xf32>
    %59 = vector.broadcast %58 : vector<128x1xf32> to vector<128x128xf32>
    %60 = arith.mulf %55, %59 : vector<128x128xf32>
    %61 = arith.truncf %60 : vector<128x128xf32> to vector<128x128xbf16>
    %cst_27 = arith.constant dense<0.000000e+00> : vector<8x128xf32>
    %62 = tpu.matmul %42, %61, %cst_27 {dimension_numbers = #tpu.dot_dimension_numbers<[1], [1], [0], [0], [0, 0, 1, 0], [], []>} : vector<8x128xbf16>, vector<128x128xbf16>, vector<8x128xf32> -> vector<8x128xf32>
    %c0_28 = arith.constant 0 : index
    %c0_29 = arith.constant 0 : index
    %c0_30 = arith.constant 0 : index
    %63 = vector.load %arg21[%c0_28, %c0_29, %c0_30] : memref<4x8x128xf32, #tpu.memory_space<vmem>>, vector<1x8x128xf32>
    %64 = vector.shape_cast %63 : vector<1x8x128xf32> to vector<8x128xf32>
    %65 = vector.shape_cast %62 : vector<8x128xf32> to vector<1x8x128xf32>
    tpu.vector_store %arg21[%c0_28, %c0_29, %c0_30], %65 {strides = array<i32>} : memref<4x8x128xf32, #tpu.memory_space<vmem>>, vector<1x8x128xf32>,
    %cst_31 = arith.constant dense<0.000000e+00> : vector<8x128xf32>
    %66 = tpu.matmul %48, %61, %cst_31 {dimension_numbers = #tpu.dot_dimension_numbers<[1], [1], [0], [0], [0, 0, 1, 0], [], []>} : vector<8x128xbf16>, vector<128x128xbf16>, vector<8x128xf32> -> vector<8x128xf32>
    %c0_32 = arith.constant 0 : index
    %c0_33 = arith.constant 0 : index
    %67 = vector.load %arg22[%c0_32, %c0_33] : memref<32x128xf32, #tpu.memory_space<vmem>>, vector<8x128xf32>
    tpu.vector_store %arg22[%c0_32, %c0_33], %66 {strides = array<i32>} : memref<32x128xf32, #tpu.memory_space<vmem>>, vector<8x128xf32>,
    %68 = vector.extract_strided_slice %40 {offsets = [8, 0], sizes = [8, 128], strides = [1, 1]} : vector<96x128xf32> to vector<8x128xf32>
    %69 = arith.truncf %68 : vector<8x128xf32> to vector<8x128xbf16>
    %70 = vector.extract_strided_slice %40 {offsets = [40, 0], sizes = [8, 128], strides = [1, 1]} : vector<96x128xf32> to vector<8x128xf32>
    %71 = arith.truncf %70 : vector<8x128xf32> to vector<8x128xbf16>
    %72 = vector.extract_strided_slice %40 {offsets = [72, 0], sizes = [8, 128], strides = [1, 1]} : vector<96x128xf32> to vector<8x128xf32>
    %73 = arith.truncf %72 : vector<8x128xf32> to vector<8x128xbf16>
    %cst_34 = arith.constant dense<0.000000e+00> : vector<128x128xf32>
    %74 = tpu.matmul %69, %71, %cst_34 {dimension_numbers = #tpu.dot_dimension_numbers<[0], [0], [1], [1], [0, 1, 1, 1], [], []>} : vector<8x128xbf16>, vector<8x128xbf16>, vector<128x128xf32> -> vector<128x128xf32>
    %75 = arith.addf %74, %41 : vector<128x128xf32>
    %cst_35 = arith.constant dense<0xFF800000> : vector<128xf32>
    %76 = vector.multi_reduction <maximumf>, %75, %cst_35 [1] : vector<128x128xf32> to vector<128xf32>
    %77 = vector.shape_cast %76 : vector<128xf32> to vector<128x1xf32>
    %78 = vector.broadcast %77 : vector<128x1xf32> to vector<128x128xf32>
    %79 = arith.subf %75, %78 : vector<128x128xf32>
    %80 = math.exp %79 : vector<128x128xf32>
    %cst_36 = arith.constant dense<0.000000e+00> : vector<128xf32>
    %81 = vector.multi_reduction <add>, %80, %cst_36 [1] : vector<128x128xf32> to vector<128xf32>
    %82 = vector.shape_cast %81 : vector<128xf32> to vector<128x1xf32>
    %83 = tpu.reciprocal %82 {approx = true} : vector<128x1xf32> -> vector<128x1xf32>
    %84 = vector.broadcast %83 : vector<128x1xf32> to vector<128x128xf32>
    %85 = arith.mulf %80, %84 : vector<128x128xf32>
    %86 = arith.truncf %85 : vector<128x128xf32> to vector<128x128xbf16>
    %cst_37 = arith.constant dense<0.000000e+00> : vector<8x128xf32>
    %87 = tpu.matmul %42, %86, %cst_37 {dimension_numbers = #tpu.dot_dimension_numbers<[1], [1], [0], [0], [0, 0, 1, 0], [], []>} : vector<8x128xbf16>, vector<128x128xbf16>, vector<8x128xf32> -> vector<8x128xf32>
    %c1_38 = arith.constant 1 : index
    %c0_39 = arith.constant 0 : index
    %c0_40 = arith.constant 0 : index
    %88 = vector.load %arg21[%c1_38, %c0_39, %c0_40] : memref<4x8x128xf32, #tpu.memory_space<vmem>>, vector<1x8x128xf32>
    %89 = vector.shape_cast %88 : vector<1x8x128xf32> to vector<8x128xf32>
    %90 = vector.shape_cast %87 : vector<8x128xf32> to vector<1x8x128xf32>
    tpu.vector_store %arg21[%c1_38, %c0_39, %c0_40], %90 {strides = array<i32>} : memref<4x8x128xf32, #tpu.memory_space<vmem>>, vector<1x8x128xf32>,
    %cst_41 = arith.constant dense<0.000000e+00> : vector<8x128xf32>
    %91 = tpu.matmul %73, %86, %cst_41 {dimension_numbers = #tpu.dot_dimension_numbers<[1], [1], [0], [0], [0, 0, 1, 0], [], []>} : vector<8x128xbf16>, vector<128x128xbf16>, vector<8x128xf32> -> vector<8x128xf32>
    %c8 = arith.constant 8 : index
    %c0_42 = arith.constant 0 : index
    %92 = vector.load %arg22[%c8, %c0_42] : memref<32x128xf32, #tpu.memory_space<vmem>>, vector<8x128xf32>
    tpu.vector_store %arg22[%c8, %c0_42], %91 {strides = array<i32>} : memref<32x128xf32, #tpu.memory_space<vmem>>, vector<8x128xf32>,
    %93 = vector.extract_strided_slice %40 {offsets = [16, 0], sizes = [8, 128], strides = [1, 1]} : vector<96x128xf32> to vector<8x128xf32>
    %94 = arith.truncf %93 : vector<8x128xf32> to vector<8x128xbf16>
    %95 = vector.extract_strided_slice %40 {offsets = [48, 0], sizes = [8, 128], strides = [1, 1]} : vector<96x128xf32> to vector<8x128xf32>
    %96 = arith.truncf %95 : vector<8x128xf32> to vector<8x128xbf16>
    %97 = vector.extract_strided_slice %40 {offsets = [80, 0], sizes = [8, 128], strides = [1, 1]} : vector<96x128xf32> to vector<8x128xf32>
    %98 = arith.truncf %97 : vector<8x128xf32> to vector<8x128xbf16>
    %cst_43 = arith.constant dense<0.000000e+00> : vector<128x128xf32>
    %99 = tpu.matmul %94, %96, %cst_43 {dimension_numbers = #tpu.dot_dimension_numbers<[0], [0], [1], [1], [0, 1, 1, 1], [], []>} : vector<8x128xbf16>, vector<8x128xbf16>, vector<128x128xf32> -> vector<128x128xf32>
    %100 = arith.addf %99, %41 : vector<128x128xf32>
    %cst_44 = arith.constant dense<0xFF800000> : vector<128xf32>
    %101 = vector.multi_reduction <maximumf>, %100, %cst_44 [1] : vector<128x128xf32> to vector<128xf32>
    %102 = vector.shape_cast %101 : vector<128xf32> to vector<128x1xf32>
    %103 = vector.broadcast %102 : vector<128x1xf32> to vector<128x128xf32>
    %104 = arith.subf %100, %103 : vector<128x128xf32>
    %105 = math.exp %104 : vector<128x128xf32>
    %cst_45 = arith.constant dense<0.000000e+00> : vector<128xf32>
    %106 = vector.multi_reduction <add>, %105, %cst_45 [1] : vector<128x128xf32> to vector<128xf32>
    %107 = vector.shape_cast %106 : vector<128xf32> to vector<128x1xf32>
    %108 = tpu.reciprocal %107 {approx = true} : vector<128x1xf32> -> vector<128x1xf32>
    %109 = vector.broadcast %108 : vector<128x1xf32> to vector<128x128xf32>
    %110 = arith.mulf %105, %109 : vector<128x128xf32>
    %111 = arith.truncf %110 : vector<128x128xf32> to vector<128x128xbf16>
    %cst_46 = arith.constant dense<0.000000e+00> : vector<8x128xf32>
    %112 = tpu.matmul %42, %111, %cst_46 {dimension_numbers = #tpu.dot_dimension_numbers<[1], [1], [0], [0], [0, 0, 1, 0], [], []>} : vector<8x128xbf16>, vector<128x128xbf16>, vector<8x128xf32> -> vector<8x128xf32>
    %c2_47 = arith.constant 2 : index
    %c0_48 = arith.constant 0 : index
    %c0_49 = arith.constant 0 : index
    %113 = vector.load %arg21[%c2_47, %c0_48, %c0_49] : memref<4x8x128xf32, #tpu.memory_space<vmem>>, vector<1x8x128xf32>
    %114 = vector.shape_cast %113 : vector<1x8x128xf32> to vector<8x128xf32>
    %115 = vector.shape_cast %112 : vector<8x128xf32> to vector<1x8x128xf32>
    tpu.vector_store %arg21[%c2_47, %c0_48, %c0_49], %115 {strides = array<i32>} : memref<4x8x128xf32, #tpu.memory_space<vmem>>, vector<1x8x128xf32>,
    %cst_50 = arith.constant dense<0.000000e+00> : vector<8x128xf32>
    %116 = tpu.matmul %98, %111, %cst_50 {dimension_numbers = #tpu.dot_dimension_numbers<[1], [1], [0], [0], [0, 0, 1, 0], [], []>} : vector<8x128xbf16>, vector<128x128xbf16>, vector<8x128xf32> -> vector<8x128xf32>
    %c16 = arith.constant 16 : index
    %c0_51 = arith.constant 0 : index
    %117 = vector.load %arg22[%c16, %c0_51] : memref<32x128xf32, #tpu.memory_space<vmem>>, vector<8x128xf32>
    tpu.vector_store %arg22[%c16, %c0_51], %116 {strides = array<i32>} : memref<32x128xf32, #tpu.memory_space<vmem>>, vector<8x128xf32>,
    %118 = vector.extract_strided_slice %40 {offsets = [24, 0], sizes = [8, 128], strides = [1, 1]} : vector<96x128xf32> to vector<8x128xf32>
    %119 = arith.truncf %118 : vector<8x128xf32> to vector<8x128xbf16>
    %120 = vector.extract_strided_slice %40 {offsets = [56, 0], sizes = [8, 128], strides = [1, 1]} : vector<96x128xf32> to vector<8x128xf32>
    %121 = arith.truncf %120 : vector<8x128xf32> to vector<8x128xbf16>
    %122 = vector.extract_strided_slice %40 {offsets = [88, 0], sizes = [8, 128], strides = [1, 1]} : vector<96x128xf32> to vector<8x128xf32>
    %123 = arith.truncf %122 : vector<8x128xf32> to vector<8x128xbf16>
    %cst_52 = arith.constant dense<0.000000e+00> : vector<128x128xf32>
    %124 = tpu.matmul %119, %121, %cst_52 {dimension_numbers = #tpu.dot_dimension_numbers<[0], [0], [1], [1], [0, 1, 1, 1], [], []>} : vector<8x128xbf16>, vector<8x128xbf16>, vector<128x128xf32> -> vector<128x128xf32>
    %125 = arith.addf %124, %41 : vector<128x128xf32>
    %cst_53 = arith.constant dense<0xFF800000> : vector<128xf32>
    %126 = vector.multi_reduction <maximumf>, %125, %cst_53 [1] : vector<128x128xf32> to vector<128xf32>
    %127 = vector.shape_cast %126 : vector<128xf32> to vector<128x1xf32>
    %128 = vector.broadcast %127 : vector<128x1xf32> to vector<128x128xf32>
    %129 = arith.subf %125, %128 : vector<128x128xf32>
    %130 = math.exp %129 : vector<128x128xf32>
    %cst_54 = arith.constant dense<0.000000e+00> : vector<128xf32>
    %131 = vector.multi_reduction <add>, %130, %cst_54 [1] : vector<128x128xf32> to vector<128xf32>
    %132 = vector.shape_cast %131 : vector<128xf32> to vector<128x1xf32>
    %133 = tpu.reciprocal %132 {approx = true} : vector<128x1xf32> -> vector<128x1xf32>
    %134 = vector.broadcast %133 : vector<128x1xf32> to vector<128x128xf32>
    %135 = arith.mulf %130, %134 : vector<128x128xf32>
    %136 = arith.truncf %135 : vector<128x128xf32> to vector<128x128xbf16>
    %cst_55 = arith.constant dense<0.000000e+00> : vector<8x128xf32>
    %137 = tpu.matmul %42, %136, %cst_55 {dimension_numbers = #tpu.dot_dimension_numbers<[1], [1], [0], [0], [0, 0, 1, 0], [], []>} : vector<8x128xbf16>, vector<128x128xbf16>, vector<8x128xf32> -> vector<8x128xf32>
    %c3 = arith.constant 3 : index
    %c0_56 = arith.constant 0 : index
    %c0_57 = arith.constant 0 : index
    %138 = vector.load %arg21[%c3, %c0_56, %c0_57] : memref<4x8x128xf32, #tpu.memory_space<vmem>>, vector<1x8x128xf32>
    %139 = vector.shape_cast %138 : vector<1x8x128xf32> to vector<8x128xf32>
    %140 = vector.shape_cast %137 : vector<8x128xf32> to vector<1x8x128xf32>
    tpu.vector_store %arg21[%c3, %c0_56, %c0_57], %140 {strides = array<i32>} : memref<4x8x128xf32, #tpu.memory_space<vmem>>, vector<1x8x128xf32>,
    %cst_58 = arith.constant dense<0.000000e+00> : vector<8x128xf32>
    %141 = tpu.matmul %123, %136, %cst_58 {dimension_numbers = #tpu.dot_dimension_numbers<[1], [1], [0], [0], [0, 0, 1, 0], [], []>} : vector<8x128xbf16>, vector<128x128xbf16>, vector<8x128xf32> -> vector<8x128xf32>
    %c24 = arith.constant 24 : index
    %c0_59 = arith.constant 0 : index
    %142 = vector.load %arg22[%c24, %c0_59] : memref<32x128xf32, #tpu.memory_space<vmem>>, vector<8x128xf32>
    tpu.vector_store %arg22[%c24, %c0_59], %141 {strides = array<i32>} : memref<32x128xf32, #tpu.memory_space<vmem>>, vector<8x128xf32>,
    %c0_60 = arith.constant 0 : index
    %c0_61 = arith.constant 0 : index
    %143 = vector.load %arg10[%c0_60, %c0_61] : memref<32x32xbf16, #tpu.memory_space<vmem>>, vector<32x32xbf16>
    %c0_62 = arith.constant 0 : index
    %c0_63 = arith.constant 0 : index
    %144 = vector.load %arg22[%c0_62, %c0_63] : memref<32x128xf32, #tpu.memory_space<vmem>>, vector<32x128xf32>
    %145 = arith.truncf %144 : vector<32x128xf32> to vector<32x128xbf16>
    %cst_64 = arith.constant dense<0.000000e+00> : vector<32x128xf32>
    %146 = tpu.matmul %143, %145, %cst_64 {dimension_numbers = #tpu.dot_dimension_numbers<[1], [0], [0], [1], [0, 0, 1, 1], [], []>} : vector<32x32xbf16>, vector<32x128xbf16>, vector<32x128xf32> -> vector<32x128xf32>
    %c0_65 = arith.constant 0 : index
    %c0_66 = arith.constant 0 : index
    %147 = vector.load %arg11[%c0_65, %c0_66] : memref<32x1xf32, #tpu.memory_space<vmem>>, vector<32x1xf32>
    %148 = vector.broadcast %147 : vector<32x1xf32> to vector<32x128xf32>
    %149 = arith.addf %146, %148 : vector<32x128xf32>
    %150 = arith.addf %34, %149 : vector<32x128xf32>
    %c0_67 = arith.constant 0 : index
    %c0_68 = arith.constant 0 : index
    %151 = vector.load %arg12[%c0_67, %c0_68] : memref<32x1xf32, #tpu.memory_space<vmem>>, vector<32x1xf32>
    %c0_69 = arith.constant 0 : index
    %c0_70 = arith.constant 0 : index
    %152 = vector.load %arg13[%c0_69, %c0_70] : memref<32x1xf32, #tpu.memory_space<vmem>>, vector<32x1xf32>
    %cst_71 = arith.constant dense<0.000000e+00> : vector<128xf32>
    %153 = vector.multi_reduction <add>, %150, %cst_71 [0] : vector<32x128xf32> to vector<128xf32>
    %154 = vector.shape_cast %153 : vector<128xf32> to vector<1x128xf32>
    %cst_72 = arith.constant 3.200000e+01 : f32
    %155 = vector.broadcast %cst_72 : f32 to vector<1x128xf32>
    %156 = arith.divf %154, %155 : vector<1x128xf32>
    %157 = vector.broadcast %156 : vector<1x128xf32> to vector<32x128xf32>
    %158 = arith.subf %150, %157 : vector<32x128xf32>
    %159 = arith.mulf %158, %158 : vector<32x128xf32>
    %cst_73 = arith.constant dense<0.000000e+00> : vector<128xf32>
    %160 = vector.multi_reduction <add>, %159, %cst_73 [0] : vector<32x128xf32> to vector<128xf32>
    %161 = vector.shape_cast %160 : vector<128xf32> to vector<1x128xf32>
    %cst_74 = arith.constant 3.200000e+01 : f32
    %162 = vector.broadcast %cst_74 : f32 to vector<1x128xf32>
    %163 = arith.divf %161, %162 : vector<1x128xf32>
    %164 = vector.broadcast %156 : vector<1x128xf32> to vector<32x128xf32>
    %165 = arith.subf %150, %164 : vector<32x128xf32>
    %cst_75 = arith.constant 9.99999974E-6 : f32
    %166 = vector.broadcast %cst_75 : f32 to vector<1x128xf32>
    %167 = arith.addf %163, %166 : vector<1x128xf32>
    %168 = math.rsqrt %167 : vector<1x128xf32>
    %169 = vector.broadcast %168 : vector<1x128xf32> to vector<32x128xf32>
    %170 = arith.mulf %165, %169 : vector<32x128xf32>
    %171 = vector.broadcast %151 : vector<32x1xf32> to vector<32x128xf32>
    %172 = arith.mulf %170, %171 : vector<32x128xf32>
    %173 = vector.broadcast %152 : vector<32x1xf32> to vector<32x128xf32>
    %174 = arith.addf %172, %173 : vector<32x128xf32>
    %c0_76 = arith.constant 0 : index
    %c0_77 = arith.constant 0 : index
    %175 = vector.load %arg14[%c0_76, %c0_77] : memref<128x32xbf16, #tpu.memory_space<vmem>>, vector<128x32xbf16>
    %176 = arith.truncf %174 : vector<32x128xf32> to vector<32x128xbf16>
    %cst_78 = arith.constant dense<0.000000e+00> : vector<128x128xf32>
    %177 = tpu.matmul %175, %176, %cst_78 {dimension_numbers = #tpu.dot_dimension_numbers<[1], [0], [0], [1], [0, 0, 1, 1], [], []>} : vector<128x32xbf16>, vector<32x128xbf16>, vector<128x128xf32> -> vector<128x128xf32>
    %c0_79 = arith.constant 0 : index
    %c0_80 = arith.constant 0 : index
    %178 = vector.load %arg15[%c0_79, %c0_80] : memref<128x1xf32, #tpu.memory_space<vmem>>, vector<128x1xf32>
    %179 = vector.broadcast %178 : vector<128x1xf32> to vector<128x128xf32>
    %180 = arith.addf %177, %179 : vector<128x128xf32>
    %181 = arith.mulf %180, %180 : vector<128x128xf32>
    %182 = arith.mulf %180, %181 : vector<128x128xf32>
    %cst_81 = arith.constant 4.471500e-02 : f32
    %183 = vector.broadcast %cst_81 : f32 to vector<128x128xf32>
    %184 = arith.mulf %183, %182 : vector<128x128xf32>
    %185 = arith.addf %180, %184 : vector<128x128xf32>
    %cst_82 = arith.constant 0.797884583 : f32
    %186 = vector.broadcast %cst_82 : f32 to vector<128x128xf32>
    %187 = arith.mulf %186, %185 : vector<128x128xf32>
    %188 = math.tanh %187 : vector<128x128xf32>
    %cst_83 = arith.constant 1.000000e+00 : f32
    %189 = vector.broadcast %cst_83 : f32 to vector<128x128xf32>
    %190 = arith.addf %189, %188 : vector<128x128xf32>
    %cst_84 = arith.constant 5.000000e-01 : f32
    %191 = vector.broadcast %cst_84 : f32 to vector<128x128xf32>
    %192 = arith.mulf %191, %190 : vector<128x128xf32>
    %193 = arith.mulf %180, %192 : vector<128x128xf32>
    %c0_85 = arith.constant 0 : index
    %c0_86 = arith.constant 0 : index
    %194 = vector.load %arg16[%c0_85, %c0_86] : memref<32x128xbf16, #tpu.memory_space<vmem>>, vector<32x128xbf16>
    %195 = arith.truncf %193 : vector<128x128xf32> to vector<128x128xbf16>
    %cst_87 = arith.constant dense<0.000000e+00> : vector<32x128xf32>
    %196 = tpu.matmul %194, %195, %cst_87 {dimension_numbers = #tpu.dot_dimension_numbers<[1], [0], [0], [1], [0, 0, 1, 1], [], []>} : vector<32x128xbf16>, vector<128x128xbf16>, vector<32x128xf32> -> vector<32x128xf32>
    %c0_88 = arith.constant 0 : index
    %c0_89 = arith.constant 0 : index
    %197 = vector.load %arg17[%c0_88, %c0_89] : memref<32x1xf32, #tpu.memory_space<vmem>>, vector<32x1xf32>
    %198 = vector.broadcast %197 : vector<32x1xf32> to vector<32x128xf32>
    %199 = arith.addf %196, %198 : vector<32x128xf32>
    %200 = arith.addf %174, %199 : vector<32x128xf32>
    %c0_90 = arith.constant 0 : index
    %c0_91 = arith.constant 0 : index
    %201 = vector.load %arg18[%c0_90, %c0_91] : memref<32x1xf32, #tpu.memory_space<vmem>>, vector<32x1xf32>
    %c0_92 = arith.constant 0 : index
    %c0_93 = arith.constant 0 : index
    %202 = vector.load %arg19[%c0_92, %c0_93] : memref<32x1xf32, #tpu.memory_space<vmem>>, vector<32x1xf32>
    %cst_94 = arith.constant dense<0.000000e+00> : vector<128xf32>
    %203 = vector.multi_reduction <add>, %200, %cst_94 [0] : vector<32x128xf32> to vector<128xf32>
    %204 = vector.shape_cast %203 : vector<128xf32> to vector<1x128xf32>
    %cst_95 = arith.constant 3.200000e+01 : f32
    %205 = vector.broadcast %cst_95 : f32 to vector<1x128xf32>
    %206 = arith.divf %204, %205 : vector<1x128xf32>
    %207 = vector.broadcast %206 : vector<1x128xf32> to vector<32x128xf32>
    %208 = arith.subf %200, %207 : vector<32x128xf32>
    %209 = arith.mulf %208, %208 : vector<32x128xf32>
    %cst_96 = arith.constant dense<0.000000e+00> : vector<128xf32>
    %210 = vector.multi_reduction <add>, %209, %cst_96 [0] : vector<32x128xf32> to vector<128xf32>
    %211 = vector.shape_cast %210 : vector<128xf32> to vector<1x128xf32>
    %cst_97 = arith.constant 3.200000e+01 : f32
    %212 = vector.broadcast %cst_97 : f32 to vector<1x128xf32>
    %213 = arith.divf %211, %212 : vector<1x128xf32>
    %214 = vector.broadcast %206 : vector<1x128xf32> to vector<32x128xf32>
    %215 = arith.subf %200, %214 : vector<32x128xf32>
    %cst_98 = arith.constant 9.99999974E-6 : f32
    %216 = vector.broadcast %cst_98 : f32 to vector<1x128xf32>
    %217 = arith.addf %213, %216 : vector<1x128xf32>
    %218 = math.rsqrt %217 : vector<1x128xf32>
    %219 = vector.broadcast %218 : vector<1x128xf32> to vector<32x128xf32>
    %220 = arith.mulf %215, %219 : vector<32x128xf32>
    %221 = vector.broadcast %201 : vector<32x1xf32> to vector<32x128xf32>
    %222 = arith.mulf %220, %221 : vector<32x128xf32>
    %223 = vector.broadcast %202 : vector<32x1xf32> to vector<32x128xf32>
    %224 = arith.addf %222, %223 : vector<32x128xf32>
    %c0_99 = arith.constant 0 : index
    %c0_100 = arith.constant 0 : index
    %225 = vector.load %arg20[%c0_99, %c0_100] : memref<32x128xf32, #tpu.memory_space<vmem>>, vector<32x128xf32>
    tpu.vector_store %arg20[%c0_99, %c0_100], %224 {strides = array<i32>} : memref<32x128xf32, #tpu.memory_space<vmem>>, vector<32x128xf32>,
    return
  }
  func.func @transform_0(%arg0: i32) -> (i32, i32) {
    %c0_i32 = arith.constant 0 : i32
    %c0_i32_0 = arith.constant 0 : i32
    return %c0_i32, %arg0 : i32, i32
  }
  func.func @transform_1(%arg0: i32) -> (i32, i32) {
    %c0_i32 = arith.constant 0 : i32
    %c0_i32_0 = arith.constant 0 : i32
    return %c0_i32, %arg0 : i32, i32
  }
  func.func @transform_2(%arg0: i32) -> (i32, i32) {
    %c0_i32 = arith.constant 0 : i32
    %c0_i32_0 = arith.constant 0 : i32
    %c0_i32_1 = arith.constant 0 : i32
    return %c0_i32, %c0_i32_0 : i32, i32
  }
  func.func @transform_3(%arg0: i32) -> (i32, i32) {
    %c0_i32 = arith.constant 0 : i32
    %c0_i32_0 = arith.constant 0 : i32
    %c0_i32_1 = arith.constant 0 : i32
    return %c0_i32, %c0_i32_0 : i32, i32
  }
  func.func @transform_4(%arg0: i32) -> (i32, i32) {
    %c0_i32 = arith.constant 0 : i32
    %c0_i32_0 = arith.constant 0 : i32
    %c0_i32_1 = arith.constant 0 : i32
    return %c0_i32, %c0_i32_0 : i32, i32
  }
  func.func @transform_5(%arg0: i32) -> (i32, i32) {
    %c0_i32 = arith.constant 0 : i32
    %c0_i32_0 = arith.constant 0 : i32
    %c0_i32_1 = arith.constant 0 : i32
    return %c0_i32, %c0_i32_0 : i32, i32
  }
  func.func @transform_6(%arg0: i32) -> (i32, i32) {
    %c0_i32 = arith.constant 0 : i32
    %c0_i32_0 = arith.constant 0 : i32
    %c0_i32_1 = arith.constant 0 : i32
    return %c0_i32, %c0_i32_0 : i32, i32
  }
  func.func @transform_7(%arg0: i32) -> (i32, i32) {
    %c0_i32 = arith.constant 0 : i32
    %c0_i32_0 = arith.constant 0 : i32
    %c0_i32_1 = arith.constant 0 : i32
    return %c0_i32, %c0_i32_0 : i32, i32
  }
  func.func @transform_8(%arg0: i32) -> (i32, i32) {
    %c0_i32 = arith.constant 0 : i32
    %c0_i32_0 = arith.constant 0 : i32
    %c0_i32_1 = arith.constant 0 : i32
    return %c0_i32, %c0_i32_0 : i32, i32
  }
  func.func @transform_9(%arg0: i32) -> (i32, i32) {
    %c0_i32 = arith.constant 0 : i32
    %c0_i32_0 = arith.constant 0 : i32
    %c0_i32_1 = arith.constant 0 : i32
    return %c0_i32, %c0_i32_0 : i32, i32
  }
  func.func @transform_10(%arg0: i32) -> (i32, i32) {
    %c0_i32 = arith.constant 0 : i32
    %c0_i32_0 = arith.constant 0 : i32
    %c0_i32_1 = arith.constant 0 : i32
    return %c0_i32, %c0_i32_0 : i32, i32
  }
  func.func @transform_11(%arg0: i32) -> (i32, i32) {
    %c0_i32 = arith.constant 0 : i32
    %c0_i32_0 = arith.constant 0 : i32
    %c0_i32_1 = arith.constant 0 : i32
    return %c0_i32, %c0_i32_0 : i32, i32
  }
  func.func @transform_12(%arg0: i32) -> (i32, i32) {
    %c0_i32 = arith.constant 0 : i32
    %c0_i32_0 = arith.constant 0 : i32
    %c0_i32_1 = arith.constant 0 : i32
    return %c0_i32, %c0_i32_0 : i32, i32
  }
  func.func @transform_13(%arg0: i32) -> (i32, i32) {
    %c0_i32 = arith.constant 0 : i32
    %c0_i32_0 = arith.constant 0 : i32
    %c0_i32_1 = arith.constant 0 : i32
    return %c0_i32, %c0_i32_0 : i32, i32
  }
  func.func @transform_14(%arg0: i32) -> (i32, i32) {
    %c0_i32 = arith.constant 0 : i32
    %c0_i32_0 = arith.constant 0 : i32
    %c0_i32_1 = arith.constant 0 : i32
    return %c0_i32, %c0_i32_0 : i32, i32
  }
  func.func @transform_15(%arg0: i32) -> (i32, i32) {
    %c0_i32 = arith.constant 0 : i32
    %c0_i32_0 = arith.constant 0 : i32
    %c0_i32_1 = arith.constant 0 : i32
    return %c0_i32, %c0_i32_0 : i32, i32
  }
  func.func @transform_16(%arg0: i32) -> (i32, i32) {
    %c0_i32 = arith.constant 0 : i32
    %c0_i32_0 = arith.constant 0 : i32
    %c0_i32_1 = arith.constant 0 : i32
    return %c0_i32, %c0_i32_0 : i32, i32
  }
  func.func @transform_17(%arg0: i32) -> (i32, i32) {
    %c0_i32 = arith.constant 0 : i32
    %c0_i32_0 = arith.constant 0 : i32
    %c0_i32_1 = arith.constant 0 : i32
    return %c0_i32, %c0_i32_0 : i32, i32
  }
  func.func @transform_18(%arg0: i32) -> (i32, i32) {
    %c0_i32 = arith.constant 0 : i32
    %c0_i32_0 = arith.constant 0 : i32
    %c0_i32_1 = arith.constant 0 : i32
    return %c0_i32, %c0_i32_0 : i32, i32
  }
  func.func @transform_19(%arg0: i32) -> (i32, i32) {
    %c0_i32 = arith.constant 0 : i32
    %c0_i32_0 = arith.constant 0 : i32
    return %c0_i32, %arg0 : i32, i32
  }
  func.func @transform_20(%arg0: i32) -> (i32, i32, i32) {
    %c0_i32 = arith.constant 0 : i32
    %c0_i32_0 = arith.constant 0 : i32
    %c0_i32_1 = arith.constant 0 : i32
    return %c0_i32, %c0_i32_0, %arg0 : i32, i32, i32
  }
}

</mosaic_0001>

<bundles_post_ra>
// kernel: tpu_custom_call.1
= control target key start
LH: loop header
LB: loop body
LE: loop exit
PB: predicated region body
PF: predicated region fallthrough
CT: control target
= control target key end

     0   :  { %s4107_s0 = inlined_call_operand.vmem [shape: f32[1,128], index: 0, kind: input, shape index: {}]   ;;  %s4108_s1 = inlined_call_operand.vmem [shape: f32[6,128], index: 1, kind: input, shape index: {}]   ;;  %s4109_s2 = inlined_call_operand.vmem [shape: f32[128,128], index: 2, kind: input, shape index: {}]   ;;  %s4110_s3 = inlined_call_operand.vmem [shape: bf16[8,128], index: 3, kind: input, shape index: {}]   ;;  %s4111_s4 = inlined_call_operand.vmem [shape: f32[32,6], index: 4, kind: input, shape index: {}]   ;;  %s4112_s5 = inlined_call_operand.vmem [shape: f32[32,1], index: 5, kind: input, shape index: {}]   ;;  %s4113_s6 = inlined_call_operand.vmem [shape: f32[32,3], index: 6, kind: input, shape index: {}]   ;;  %s4114_s7 = inlined_call_operand.vmem [shape: bf16[96,32], index: 7, kind: input, shape index: {}]   ;;  %s4115_s8 = inlined_call_operand.vmem [shape: f32[96,1], index: 8, kind: input, shape index: {}]   ;;  %s4116_s9 = inlined_call_operand.vmem [shape: bf16[32,32], index: 9, kind: input, shape index: {}]   ;;  %s4117_s10 = inlined_call_operand.vmem [shape: f32[32,1], index: 10, kind: input, shape index: {}]   ;;  %s4118_s11 = inlined_call_operand.vmem [shape: f32[32,1], index: 11, kind: input, shape index: {}]   ;;  %s4119_s12 = inlined_call_operand.vmem [shape: f32[32,1], index: 12, kind: input, shape index: {}]   ;;  %s4120_s13 = inlined_call_operand.vmem [shape: bf16[128,32], index: 13, kind: input, shape index: {}]   ;;  %s4121_s14 = inlined_call_operand.vmem [shape: f32[128,1], index: 14, kind: input, shape index: {}]   ;;  %s4122_s15 = inlined_call_operand.vmem [shape: bf16[32,128], index: 15, kind: input, shape index: {}]   ;;  %s4123_s16 = inlined_call_operand.vmem [shape: f32[32,1], index: 16, kind: input, shape index: {}]   ;;  %s4124_s17 = inlined_call_operand.vmem [shape: f32[32,1], index: 17, kind: input, shape index: {}]   ;;  %s4125_s18 = inlined_call_operand.vmem [shape: f32[32,1], index: 18, kind: input, shape index: {}]   ;;  %s4126_s19 = inlined_call_operand.hbm [shape: f32[32,128], index: 19, kind: output, shape index: {0}]   ;;  %s4127_s20 = inlined_call_operand.hbm [shape: f32[4,8,128], index: 20, kind: output, shape index: {1}]  }
   0x1   :  { %4131 = sst [smem:[#allocation9_spill]] %s4107_s0 }
   0x2   :  { %4132 = sst [smem:[#allocation10_spill]] %s4108_s1 }
   0x3   :  { %4133 = sst [smem:[#allocation11_spill]] %s4109_s2 }
   0x4   :  { %4134 = sst [smem:[#allocation12_spill]] %s4110_s3 }
   0x5   :  { %4135 = sst [smem:[#allocation13_spill]] %s4111_s4 }
   0x6   :  { %26 = vsyncpa [#allocation4], 0  ;;  %s4136_s23 = sld [smem:[#allocation10_spill]]  ;;  %vm109_vm0 = vcmask 1045504   ;;  %v154_v1 = vld [vmem:[%s4113_s6 + $0x10] sm:$0xff]  ;;  %v2837_v2 = vmov 1  }
   0x7   :  { %2463 = vset.pattern.permute.xlu1 %v2837_v2  ;;  %v2838_v3 = vmov 0   ;;  %s4137_s26 = sld [smem:[#allocation13_spill]]  ;;  %vm96_vm1 = vcmask 48128   ;;  %v2839_v5 = vmov 2  }
   0x8   :  { %2462 = vset.pattern.permute.xlu0 %v2838_v3  ;;  %195 = vperm.xlu1 %2463, %v154_v1  }
   0x9   :  { %171 = vperm.xlu0 %2462, %v154_v1   ;;  %2464 = vset.pattern.permute.xlu2 %v2839_v5 }
   0xc   :  { %v71_v0 = vld [vmem:[%s4136_s23] sm:$0x3f] }
   0xd   :  { %v67_v4 = vld [vmem:[%s4137_s26] sm:$0xff]  ;;  %2297 = vmatpush.msk.msra.mxu0 %vm109_vm0, %v71_v0 }
   0xe   :  { %2298 = vmatmul.msk.f32.vlgmr.msra.gmra.mxu0 %vm96_vm1, %v67_v4 }
   0xf   :  { %27 = vsyncpa [#allocation6], 0  ;;  %222 = vperm.xlu2 %2464, %v154_v1   ;;  %v155_v6 = vld [vmem:[%s4113_s6 + $0x18] sm:$0xff]  ;;  %v68_v7 = vld [vmem:[%s4137_s26 + $0x8] sm:$0xff]  ;;  %s4138_s22 = sld [smem:[#allocation9_spill]]  ;;  %v2840_v25 = vmov 0.0  }
  0x10   :  { %199 = vperm.xlu1 %2463, %v155_v6   ;;  %v74_v8 = vld [vmem:[%s4112_s5 + $0x10] sm:$0xff]  ;;  %v75_v10 = vld [vmem:[%s4112_s5 + $0x18] sm:$0xff]  ;;  %v152_v11 = vld [vmem:[%s4113_s6] sm:$0xff]  ;;  %vm357_vm4 = vcmask 261120   ;;  %vm476_vm5 = vcmask 1043456   ;;  %vm451_vm6 = vcmask 64512  }
  0x11   :  { %176 = vperm.xlu0 %2462, %v155_v6   ;;  %v69_v9 = vld [vmem:[%s4137_s26 + $0x10] sm:$0xff]  ;;  %v153_v12 = vld [vmem:[%s4113_s6 + $0x8] sm:$0xff]  ;;  %v70_v13 = vld [vmem:[%s4137_s26 + $0x18] sm:$0xff]  ;;  %s4139_s6 = sld [smem:[#allocation11_spill]]  ;;  %s2842_s21 = smov [#allocation5]  }
  0x12   :  { %v72_v14 = vld [vmem:[%s4112_s5] sm:$0xff]  ;;  %v73_v15 = vld [vmem:[%s4112_s5 + $0x8] sm:$0xff]  ;;  %s4140_s1 = sld [smem:[#allocation12_spill]]  ;;  %s2267_s2 = sshll.u32 %s4126_s19, 4  ;;  %s2268_s2 = int_to_ptr.hbm [resolvable:$true] %s2267_s2 }
  0x13   :  { %v255_v16 = vld [vmem:[%s4115_s8] sm:$0xff] }
  0x15   :  { %v142_v22 = vld [vmem:[%s4138_s22] sm:$0x1]  ;;  %s2278_s22 = sshll.u32 %s2842_s21, 4  ;;  %s2279_s22 = int_to_ptr.vmem [resolvable:$true] %s2278_s22 }
  0x16   :  { %2299 = vmatmul.msk.f32.gmra.mxu0 %vm96_vm1, %v68_v7  ;;  %vm143_vm2 = vcmp.eq.f32.partialorder %v142_v22, 1.0  ;;  %vm146_vm3 = vcmp.eq.f32.partialorder %v142_v22, 2.0 }
  0x17   :  { %226 = vperm.xlu2 %2464, %v155_v6   ;;  %v2302_v26 = vsel %vm143_vm2, 1.0, %v2840_v25  ;;  %v2303_v27 = vsel %vm146_vm3, 1.0, %v2840_v25 }
  0x18   :  { %2465 = vset.pattern.permute.xlu1 %v2838_v3  ;;  %v149_v30 = vsub.f32 1.0, %v2302_v26  ;;  %v150_v31 = vsub.f32 1.0, %v2303_v27  ;;  %v184_v35 = vperm.slane %v2303_v27, 0  ;;  %v157_v36 = vperm.slane %v2302_v26, 0 }
  0x19   :  { %88 = vperm.xlu0 %2462, %v74_v8   ;;  %93 = vperm.xlu1 %2465, %v75_v10  }
  0x1a   :  { %v151_v34 = vmul.f32 %v150_v31, %v149_v30 }
  0x1c   :  { %v211_v39 = vperm.slane %v151_v34, 0 }
  0x1e   :  { %2300 = vmatmul.msk.f32.gmra.mxu0 %vm96_vm1, %v69_v9 }
  0x1f   :  { %2466 = vset.pattern.permute.xlu2 %v2838_v3 }
  0x20   :  { %161 = vperm.xlu2 %2466, %v152_v11  }
  0x21   :  { %166 = vperm.xlu0 %2462, %v153_v12   ;;  %2467 = vset.pattern.permute.xlu1 %v2837_v2 }
  0x22   :  { %187 = vperm.xlu1 %2467, %v152_v11  }
  0x26   :  { %2301 = vmatmul.msk.f32.gmra.mxu0 %vm96_vm1, %v70_v13  ;;  %v2424_v13 = vld [vmem:[%s4114_s7] sm:$0xff] }
  0x28   :  { %2468 = vset.pattern.permute.xlu2 %v2837_v2 }
  0x29   :  { %191 = vperm.xlu2 %2468, %v153_v12   ;;  %2469 = vset.pattern.permute.xlu0 %v2839_v5 }
  0x2a   :  { %214 = vperm.xlu0 %2469, %v152_v11   ;;  %2470 = vset.pattern.permute.xlu1 %v2839_v5 }
  0x2b   :  { %218 = vperm.xlu1 %2470, %v153_v12  }
  0x31   :  { %2471 = vset.pattern.permute.xlu2 %v2838_v3 }
  0x32   :  { %78 = vperm.xlu2 %2471, %v72_v14   ;;  %2473 = vset.pattern.permute.xlu0 %v2838_v3  ;;  %v2425_v14 = vld [vmem:[%s4114_s7 + $0x8] sm:$0xff] }
  0x33   :  { %2472 = vset.pattern.permute.xlu1 %v2838_v3 }
  0x34   :  { %83 = vperm.xlu1 %2472, %v73_v15   ;;  %v259_v15 = vld [vmem:[%s4115_s8 + $0x20] sm:$0xff] }
  0x35   :  { %289 = vperm.xlu0 %2473, %v259_v15   ;;  %v3129_v15 = vld [vmem:[%s4139_s6 + $0x10] sm:$0xff] }
  0x3a   :  { %269 = vperm.xlu2 %2471, %v255_v16   ;;  %v2426_v16 = vld [vmem:[%s4114_s7 + $0x10] sm:$0xff] }
  0x69   :  { %v223_v19 = vpop.permute.xlu2 %222 }
  0x6a   :  { %v231_v45 = vmul.f32 %v223_v19, %v211_v39 }
  0x71   :  { %v227_v24 = vpop.permute.xlu2 %226 }
  0x72   :  { %v232_v46 = vmul.f32 %v227_v24, %v211_v39 }
  0x7a   :  { %v196_v17 = vpop.permute.xlu1 %195  ;;  %v162_v33 = vpop.permute.xlu2 %161 }
  0x7b   :  { %v172_v18 = vpop.permute.xlu0 %171  ;;  %v204_v41 = vmul.f32 %v196_v17, %v184_v35  ;;  %v179_v57 = vmul.f32 %v162_v33, %v157_v36 }
  0x7c   :  { %v181_v42 = vmul.f32 %v172_v18, %v157_v36 }
  0x7e   :  { %v208_v47 = vadd.f32 %v204_v41, %v181_v42 }
  0x80   :  { %v235_v55 = vadd.f32 %v231_v45, %v208_v47  ;;  %v3045_v45 = vld [vmem:[%s4139_s6 + $0x40] sm:$0xff] }
  0x82   :  { %v200_v20 = vpop.permute.xlu1 %199 }
  0x83   :  { %v177_v21 = vpop.permute.xlu0 %176  ;;  %v205_v43 = vmul.f32 %v200_v20, %v184_v35  ;;  %v192_v48 = vpop.permute.xlu2 %191 }
  0x84   :  { %v182_v44 = vmul.f32 %v177_v21, %v157_v36  ;;  %v203_v61 = vmul.f32 %v192_v48, %v184_v35  ;;  %v3054_v48 = vld [vmem:[%s4139_s6 + $0x30] sm:$0xff] }
  0x86   :  { %v209_v49 = vadd.f32 %v205_v43, %v182_v44 }
  0x88   :  { %v236_v56 = vadd.f32 %v232_v46, %v209_v49  ;;  %v3059_v49 = vld [vmem:[%s4139_s6 + $0x48] sm:$0xff] }
  0x8b   :  { %v130_v23 = vpop.f32.mrf.mxu0  ;;  %v89_v28 = vpop.permute.xlu0 %88 }
  0x8c   :  { %v94_v29 = vpop.permute.xlu1 %93  ;;  %v79_v3 = vpop.permute.xlu2 %78 }
  0x8d   :  { %v131_v7 = vadd.f32 %v130_v23, %v79_v3 }
  0x93   :  { %v133_v32 = vpop.f32.mrf.mxu0  ;;  %v167_v37 = vpop.permute.xlu0 %166 }
  0x94   :  { %v188_v38 = vpop.permute.xlu1 %187  ;;  %v180_v62 = vmul.f32 %v167_v37, %v157_v36  ;;  %v270_v17 = vpop.permute.xlu2 %269 }
  0x95   :  { %v202_v58 = vmul.f32 %v188_v38, %v184_v35 }
  0x96   :  { %v207_v4 = vadd.f32 %v203_v61, %v180_v62 }
  0x97   :  { %v206_v1 = vadd.f32 %v202_v58, %v179_v57  ;;  %v3087_v58 = vld [vmem:[%s4139_s6 + $0x58] sm:$0xff] }
  0x9b   :  { %v136_v40 = vpop.f32.mrf.mxu0 }
  0x9c   :  { %v137_v50 = vadd.f32 %v136_v40, %v89_v28  ;;  %v215_v53 = vpop.permute.xlu0 %214 }
  0x9d   :  { %v219_v51 = vpop.permute.xlu1 %218  ;;  %v229_v63 = vmul.f32 %v215_v53, %v211_v39  ;;  %v3072_v53 = vld [vmem:[%s4139_s6 + $0x20] sm:$0xff] }
  0x9e   :  { %v3000_v59 = vadd.f32 %v235_v55, %v137_v50  ;;  %v230_v2 = vmul.f32 %v219_v51, %v211_v39 }
  0x9f   :  { %v233_v5 = vadd.f32 %v229_v63, %v206_v1  ;;  %v3096_v63 = vld [vmem:[%s4139_s6 + $0x60] sm:$0xff] }
  0xa0   :  { %v234_v8 = vadd.f32 %v230_v2, %v207_v4  ;;  %v3102_v2 = vld [vmem:[%s4139_s6 + $0x68] sm:$0xff] }
  0xa1   :  { %v3006_v10 = vadd.f32 %v233_v5, %v131_v7  ;;  %v3108_v5 = vld [vmem:[%s4139_s6 + $0x70] sm:$0xff] }
  0xa3   :  { %v139_v52 = vpop.f32.mrf.mxu0 }
  0xa4   :  { %v140_v54 = vadd.f32 %v139_v52, %v94_v29 }
  0xa6   :  { %v3002_v60 = vadd.f32 %v236_v56, %v140_v54  ;;  %v84_v6 = vpop.permute.xlu1 %83  ;;  %v3077_v54 = vld [vmem:[%s4139_s6 + $0x50] sm:$0xff] }
  0xa7   :  { %v134_v9 = vadd.f32 %v133_v32, %v84_v6  ;;  %v290_v24 = vpop.permute.xlu0 %289 }
  0xa8   :  { %v242_v0 = vpack.c.bf16 %v3002_v60, %v3000_v59 }
  0xa9   :  { %v3008_v11 = vadd.f32 %v234_v8, %v134_v9  ;;  %v3114_v8 = vld [vmem:[%s4139_s6 + $0x78] sm:$0xff] }
  0xaa   :  { %382 = vmatpush.bf16.msra.mxu1 %v242_v0  ;;  %v3119_v9 = vld [vmem:[%s4139_s6 + $0x38] sm:$0xff] }
  0xab   :  { %v241_v12 = vpack.c.bf16 %v3008_v11, %v3006_v10 }
  0xae   :  { %383 = vmatpush.bf16.msra.mxu1 %v241_v12 }
  0xb1   :  { %2328 = vmatmul.msk.bf16.vlgmr.msra.gmra.mxu1 %vm357_vm4, %v2424_v13 }
  0xc1   :  { %2329 = vmatmul.msk.bf16.gmra.mxu1 %vm357_vm4, %v2425_v14 }
  0xd1   :  { %2330 = vmatmul.msk.bf16.gmra.mxu1 %vm357_vm4, %v2426_v16  ;;  %v3134_v16 = vld [vmem:[%s4139_s6 + $0x28] sm:$0xff] }
 0x12e   :  { %v385_v18 = vpop.f32.mrf.mxu1 }
 0x12f   :  { %v386_v19 = vadd.f32 %v385_v18, %v270_v17 }
 0x131   :  { %v432_v20 = vpack.c.bf16 %v386_v19, %v386_v19  ;;  %v3147_v19 = vld [vmem:[%s4139_s6] sm:$0xff] }
 0x133   :  { %435 = vxpose.xlu1.c.b16.start.end [1/1] (short) %v432_v20, 128  ;;  %v3152_v20 = vld [vmem:[%s4139_s6 + $0x18] sm:$0xff] }
 0x136   :  { %v3027_v21 = vpop.f32.mrf.mxu1 }
 0x13e   :  { %v3029_v22 = vpop.f32.mrf.mxu1 }
 0x146   :  { %v3031_v23 = vpop.f32.mrf.mxu1 }
 0x14e   :  { %v395_v25 = vpop.f32.mrf.mxu1 }
 0x14f   :  { %v396_v26 = vadd.f32 %v395_v25, %v290_v24 }
 0x151   :  { %v433_v27 = vpack.c.bf16 %v396_v26, %v396_v26  ;;  %v3165_v26 = vld [vmem:[%s4139_s6 + $0x8] sm:$0xff] }
 0x153   :  { %v478_v28 = vsel %vm476_vm5, %v433_v27, 0 }
 0x154   :  { %487 = vmatpush.bf16.msra.mxu2 %v478_v28 }
 0x1df   :  { %v443_v29 = vpop.trf.xlu1 }
 0x1e0   :  { %2334 = vmatmul.msk.bf16.vlgmr.msra.gmra.mxu2 %vm451_vm6, %v443_v29 }
 0x1ef   :  { %v444_v30 = vpop.trf.xlu1 }
 0x1f0   :  { %2335 = vmatmul.msk.bf16.gmra.mxu2 %vm451_vm6, %v444_v30 }
 0x1ff   :  { %v445_v31 = vpop.trf.xlu1 }
 0x200   :  { %2336 = vmatmul.msk.bf16.gmra.mxu2 %vm451_vm6, %v445_v31 }
 0x20f   :  { %v446_v32 = vpop.trf.xlu1 }
 0x210   :  { %2337 = vmatmul.msk.bf16.gmra.mxu2 %vm451_vm6, %v446_v32 }
 0x21f   :  { %v447_v33 = vpop.trf.xlu1 }
 0x220   :  { %2338 = vmatmul.msk.bf16.gmra.mxu2 %vm451_vm6, %v447_v33 }
 0x22f   :  { %v448_v34 = vpop.trf.xlu1 }
 0x230   :  { %2339 = vmatmul.msk.bf16.gmra.mxu2 %vm451_vm6, %v448_v34 }
 0x23f   :  { %v449_v35 = vpop.trf.xlu1 }
 0x240   :  { %2340 = vmatmul.msk.bf16.gmra.mxu2 %vm451_vm6, %v449_v35 }
 0x24f   :  { %v450_v36 = vpop.trf.xlu1 }
 0x250   :  { %2341 = vmatmul.msk.bf16.gmra.mxu2 %vm451_vm6, %v450_v36 }
 0x263   :  { %v489_v37 = vpop.f32.mrf.mxu2 }
 0x264   :  { %v3155_v24 = vadd.f32 %v489_v37, %v3147_v19 }
 0x26b   :  { %v491_v38 = vpop.f32.mrf.mxu2 }
 0x26c   :  { %v3168_v27 = vadd.f32 %v491_v38, %v3165_v26 }
 0x273   :  { %v494_v39 = vpop.f32.mrf.mxu2 }
 0x274   :  { %v3137_v17 = vadd.f32 %v494_v39, %v3129_v15 }
 0x27b   :  { %v496_v40 = vpop.f32.mrf.mxu2 }
 0x27c   :  { %v3158_v25 = vadd.f32 %v496_v40, %v3152_v20 }
 0x283   :  { %v499_v41 = vpop.f32.mrf.mxu2 }
 0x284   :  { %v3080_v56 = vadd.f32 %v499_v41, %v3072_v53 }
 0x28b   :  { %v501_v42 = vpop.f32.mrf.mxu2 }
 0x28c   :  { %v3140_v18 = vadd.f32 %v501_v42, %v3134_v16 }
 0x293   :  { %v504_v43 = vpop.f32.mrf.mxu2 }
 0x294   :  { %v3062_v51 = vadd.f32 %v504_v43, %v3054_v48 }
 0x29b   :  { %v506_v44 = vpop.f32.mrf.mxu2 }
 0x29c   :  { %v3123_v14 = vadd.f32 %v506_v44, %v3119_v9 }
 0x2a3   :  { %v509_v46 = vpop.f32.mrf.mxu2 }
 0x2a4   :  { %v3048_v47 = vadd.f32 %v509_v46, %v3045_v45 }
 0x2a6   :  { %545 = vmax.xlane.f32.xlu0 %v3048_v47 }
 0x2ab   :  { %v511_v50 = vpop.f32.mrf.mxu2 }
 0x2ac   :  { %v3065_v52 = vadd.f32 %v511_v50, %v3059_v49 }
 0x2ae   :  { %547 = vmax.xlane.f32.xlu2 %v3065_v52  ;;  %541 = vmax.xlane.f32.xlu0 %v3062_v51 }
 0x2b3   :  { %v514_v55 = vpop.f32.mrf.mxu2 }
 0x2b4   :  { %v515_v57 = vadd.f32 %v514_v55, %v3077_v54 }
 0x2b6   :  { %537 = vmax.xlane.f32.xlu0 %v3080_v56  ;;  %549 = vmax.xlane.f32.xlu1 %v515_v57 }
 0x2bb   :  { %v516_v61 = vpop.f32.mrf.mxu2 }
 0x2bc   :  { %v3090_v62 = vadd.f32 %v516_v61, %v3087_v58 }
 0x2be   :  { %551 = vmax.xlane.f32.xlu2 %v3090_v62 }
 0x2c3   :  { %v519_v0 = vpop.f32.mrf.mxu2 }
 0x2c4   :  { %v520_v1 = vadd.f32 %v519_v0, %v3096_v63 }
 0x2c6   :  { %553 = vmax.xlane.f32.xlu2 %v520_v1 }
 0x2cb   :  { %v521_v3 = vpop.f32.mrf.mxu2 }
 0x2cc   :  { %v522_v4 = vadd.f32 %v521_v3, %v3102_v2 }
 0x2ce   :  { %555 = vmax.xlane.f32.xlu2 %v522_v4 }
 0x2d3   :  { %v524_v6 = vpop.f32.mrf.mxu2 }
 0x2d4   :  { %v525_v7 = vadd.f32 %v524_v6, %v3108_v5 }
 0x2d6   :  { %557 = vmax.xlane.f32.xlu2 %v525_v7 }
 0x2db   :  { %v526_v12 = vpop.f32.mrf.mxu2 }
 0x2dc   :  { %v527_v13 = vadd.f32 %v526_v12, %v3114_v8 }
 0x2de   :  { %559 = vmax.xlane.f32.xlu0 %v527_v13  ;;  %543 = vmax.xlane.f32.xlu2 %v3123_v14 }
 0x2e6   :  { %533 = vmax.xlane.f32.xlu0 %v3137_v17  ;;  %539 = vmax.xlane.f32.xlu2 %v3140_v18 }
 0x2ee   :  { %529 = vmax.xlane.f32.xlu0 %v3155_v24  ;;  %535 = vmax.xlane.f32.xlu2 %v3158_v25 }
 0x2f6   :  { %531 = vmax.xlane.f32.xlu2 %v3168_v27 }
 0x319   :  { %v546_v34 = vpop.xlane.xlu0 %545 }
 0x321   :  { %v548_v28 = vpop.xlane.xlu2 %547  ;;  %v542_v39 = vpop.xlane.xlu0 %541 }
 0x322   :  { %v567_v6 = vsub.f32 %v3062_v51, %v542_v39 }
 0x324   :  { %v589_v12 = vmul.f32 1.442695, %v567_v6 }
 0x329   :  { %v550_v29 = vpop.xlane.xlu1 %549  ;;  %v538_v43 = vpop.xlane.xlu0 %537 }
 0x32a   :  { %v571_v30 = vsub.f32 %v515_v57, %v550_v29  ;;  %v569_v57 = vsub.f32 %v3048_v47, %v546_v34  ;;  %v565_v51 = vsub.f32 %v3080_v56, %v538_v43 }
 0x32c   :  { %v597_v31 = vmul.f32 1.442695, %v571_v30  ;;  %v593_v61 = vmul.f32 1.442695, %v569_v57 }
 0x32e   :  { %2474 = vpow2.f32 %v597_v31  ;;  %v570_v31 = vsub.f32 %v3065_v52, %v548_v28 }
 0x330   :  { %v595_v34 = vmul.f32 1.442695, %v570_v31 }
 0x331   :  { %v552_v32 = vpop.xlane.xlu2 %551 }
 0x334   :  { %v3171_v33 = vpop.eup %2474 }
 0x335   :  { %629 = vadd.xlane.f32.xlu0 %v3171_v33 }
 0x339   :  { %v554_v35 = vpop.xlane.xlu2 %553 }
 0x33a   :  { %v573_v36 = vsub.f32 %v520_v1, %v554_v35 }
 0x33c   :  { %v601_v37 = vmul.f32 1.442695, %v573_v36 }
 0x33e   :  { %2476 = vpow2.f32 %v601_v37 }
 0x341   :  { %v556_v38 = vpop.xlane.xlu2 %555 }
 0x342   :  { %v574_v40 = vsub.f32 %v522_v4, %v556_v38 }
 0x344   :  { %v3174_v41 = vpop.eup %2476  ;;  %v603_v42 = vmul.f32 1.442695, %v574_v40 }
 0x345   :  { %633 = vadd.xlane.f32.xlu0 %v3174_v41 }
 0x346   :  { %2478 = vpow2.f32 %v603_v42 }
 0x349   :  { %v558_v44 = vpop.xlane.xlu2 %557 }
 0x34a   :  { %v575_v46 = vsub.f32 %v525_v7, %v558_v44  ;;  %v572_v7 = vsub.f32 %v3090_v62, %v552_v32  ;;  %v585_v32 = vmul.f32 1.442695, %v565_v51 }
 0x34c   :  { %v3177_v50 = vpop.eup %2478  ;;  %v605_v55 = vmul.f32 1.442695, %v575_v46  ;;  %v599_v29 = vmul.f32 1.442695, %v572_v7 }
 0x34d   :  { %635 = vadd.xlane.f32.xlu2 %v3177_v50 }
 0x34e   :  { %2480 = vpow2.f32 %v605_v55 }
 0x34f   :  { %2482 = vpow2.f32 %v593_v61 }
 0x351   :  { %v560_v0 = vpop.xlane.xlu0 %559 }
 0x352   :  { %v576_v1 = vsub.f32 %v527_v13, %v560_v0  ;;  %v544_v13 = vpop.xlane.xlu2 %543 }
 0x353   :  { %v568_v37 = vsub.f32 %v3123_v14, %v544_v13 }
 0x354   :  { %v3181_v3 = vpop.eup %2480  ;;  %v607_v4 = vmul.f32 1.442695, %v576_v1 }
 0x355   :  { %637 = vadd.xlane.f32.xlu0 %v3181_v3  ;;  %v3186_v47 = vpop.eup %2482  ;;  %v591_v56 = vmul.f32 1.442695, %v568_v37 }
 0x356   :  { %2484 = vpow2.f32 %v607_v4 }
 0x357   :  { %2486 = vpow2.f32 %v589_v12  ;;  %v256_v12 = vld [vmem:[%s4115_s8 + $0x8] sm:$0xff] }
 0x358   :  { %2488 = vpow2.f32 %v599_v29  ;;  %v260_v29 = vld [vmem:[%s4115_s8 + $0x28] sm:$0xff] }
 0x359   :  { %v534_v62 = vpop.xlane.xlu0 %533  ;;  %2490 = vpow2.f32 %v595_v34 }
 0x35a   :  { %2492 = vpow2.f32 %v585_v32  ;;  %v563_v52 = vsub.f32 %v3137_v17, %v534_v62  ;;  %v540_v28 = vpop.xlane.xlu2 %539 }
 0x35b   :  { %2494 = vpow2.f32 %v591_v56  ;;  %v566_v43 = vsub.f32 %v3140_v18, %v540_v28 }
 0x35c   :  { %v3188_v30 = vpop.eup %2484  ;;  %v581_v39 = vmul.f32 1.442695, %v563_v52 }
 0x35d   :  { %639 = vadd.xlane.f32.xlu2 %v3188_v30  ;;  %625 = vadd.xlane.f32.xlu0 %v3186_v47  ;;  %v3194_v35 = vpop.eup %2486  ;;  %v587_v44 = vmul.f32 1.442695, %v566_v43 }
 0x35e   :  { %v3196_v36 = vpop.eup %2488  ;;  %2496 = vpow2.f32 %v581_v39 }
 0x35f   :  { %v3202_v38 = vpop.eup %2490  ;;  %2498 = vpow2.f32 %v587_v44 }
 0x360   :  { %v3204_v42 = vpop.eup %2492 }
 0x361   :  { %v530_v40 = vpop.xlane.xlu0 %529  ;;  %v3210_v55 = vpop.eup %2494 }
 0x362   :  { %v561_v14 = vsub.f32 %v3155_v24, %v530_v40  ;;  %v536_v17 = vpop.xlane.xlu2 %535 }
 0x363   :  { %v564_v18 = vsub.f32 %v3158_v25, %v536_v17 }
 0x364   :  { %v577_v46 = vmul.f32 1.442695, %v561_v14  ;;  %v3212_v57 = vpop.eup %2496 }
 0x365   :  { %631 = vadd.xlane.f32.xlu2 %v3196_v36  ;;  %621 = vadd.xlane.f32.xlu0 %v3194_v35  ;;  %v583_v61 = vmul.f32 1.442695, %v564_v18  ;;  %v3217_v0 = vpop.eup %2498 }
 0x366   :  { %2500 = vpow2.f32 %v577_v46 }
 0x367   :  { %2502 = vpow2.f32 %v583_v61 }
 0x36a   :  { %v532_v1 = vpop.xlane.xlu2 %531 }
 0x36b   :  { %v562_v4 = vsub.f32 %v3168_v27, %v532_v1 }
 0x36c   :  { %v3219_v24 = vpop.eup %2500 }
 0x36d   :  { %627 = vadd.xlane.f32.xlu2 %v3202_v38  ;;  %617 = vadd.xlane.f32.xlu0 %v3204_v42  ;;  %v579_v6 = vmul.f32 1.442695, %v562_v4  ;;  %v3224_v7 = vpop.eup %2502 }
 0x36f   :  { %2504 = vpow2.f32 %v579_v6 }
 0x375   :  { %623 = vadd.xlane.f32.xlu2 %v3210_v55  ;;  %613 = vadd.xlane.f32.xlu0 %v3212_v57  ;;  %v3227_v25 = vpop.eup %2504 }
 0x37d   :  { %619 = vadd.xlane.f32.xlu2 %v3217_v0  ;;  %609 = vadd.xlane.f32.xlu0 %v3219_v24 }
 0x385   :  { %615 = vadd.xlane.f32.xlu2 %v3224_v7 }
 0x38d   :  { %611 = vadd.xlane.f32.xlu2 %v3227_v25 }
 0x391   :  { %274 = vperm.xlu0 %2473, %v256_v12  }
 0x3a5   :  { %294 = vperm.xlu2 %2471, %v260_v29  }
 0x3a8   :  { %v630_v27 = vpop.xlane.xlu0 %629 }
 0x3b8   :  { %v634_v31 = vpop.xlane.xlu0 %633 }
 0x3c0   :  { %v636_v13 = vpop.xlane.xlu2 %635 }
 0x3c8   :  { %v638_v51 = vpop.xlane.xlu0 %637 }
 0x3c9   :  { %2506 = vrcp.f32 %v638_v51 }
 0x3cf   :  { %v2507_v32 = vpop.eup %2506 }
 0x3d0   :  { %v640_v34 = vpop.xlane.xlu2 %639  ;;  %v626_v62 = vpop.xlane.xlu0 %625  ;;  %v671_v28 = vmul.f32 %v2507_v32, %v3181_v3 }
 0x3d1   :  { %2508 = vrcp.f32 %v640_v34 }
 0x3d2   :  { %2510 = vrcp.f32 %v636_v13 }
 0x3d3   :  { %2512 = vrcp.f32 %v634_v31 }
 0x3d7   :  { %v2509_v37 = vpop.eup %2508 }
 0x3d8   :  { %v632_v52 = vpop.xlane.xlu2 %631  ;;  %v672_v56 = vmul.f32 %v2509_v37, %v3188_v30  ;;  %v2511_v40 = vpop.eup %2510 }
 0x3d9   :  { %v2513_v43 = vpop.eup %2512  ;;  %2514 = vrcp.f32 %v632_v52  ;;  %v622_v14 = vpop.xlane.xlu0 %621  ;;  %v670_v44 = vmul.f32 %v2511_v40, %v3177_v50 }
 0x3da   :  { %v680_v39 = vpack.c.bf16 %v672_v56, %v671_v28  ;;  %2516 = vrcp.f32 %v630_v27  ;;  %v669_v46 = vmul.f32 %v2513_v43, %v3174_v41 }
 0x3dc   :  { %681 = vmatpush.bf16.xpose.msra.mxu3 %v680_v39  ;;  %695 = vmatpush.bf16.xpose.msrb.mxu0 %v680_v39  ;;  %v679_v18 = vpack.c.bf16 %v670_v44, %v669_v46 }
 0x3df   :  { %v2515_v61 = vpop.eup %2514 }
 0x3e0   :  { %v628_v17 = vpop.xlane.xlu2 %627  ;;  %v2517_v3 = vpop.eup %2516  ;;  %v668_v30 = vmul.f32 %v2515_v61, %v3196_v36 }
 0x3e1   :  { %2518 = vrcp.f32 %v628_v17  ;;  %v618_v1 = vpop.xlane.xlu0 %617  ;;  %v667_v6 = vmul.f32 %v2517_v3, %v3171_v33 }
 0x3e2   :  { %2520 = vrcp.f32 %v626_v62 }
 0x3e3   :  { %v678_v12 = vpack.c.bf16 %v668_v30, %v667_v6 }
 0x3e4   :  { %682 = vmatpush.bf16.xpose.msra.mxu3 %v679_v18  ;;  %696 = vmatpush.bf16.xpose.msrb.mxu0 %v679_v18 }
 0x3e7   :  { %v2519_v29 = vpop.eup %2518 }
 0x3e8   :  { %v624_v4 = vpop.xlane.xlu2 %623  ;;  %v2521_v50 = vpop.eup %2520  ;;  %v666_v41 = vmul.f32 %v2519_v29, %v3202_v38 }
 0x3e9   :  { %2522 = vrcp.f32 %v624_v4  ;;  %v665_v31 = vmul.f32 %v2521_v50, %v3186_v47  ;;  %v614_v13 = vpop.xlane.xlu0 %613 }
 0x3ea   :  { %2524 = vrcp.f32 %v622_v14 }
 0x3eb   :  { %v677_v51 = vpack.c.bf16 %v666_v41, %v665_v31 }
 0x3ec   :  { %683 = vmatpush.bf16.xpose.msra.mxu3 %v678_v12  ;;  %697 = vmatpush.bf16.xpose.msrb.mxu0 %v678_v12 }
 0x3ef   :  { %v2523_v36 = vpop.eup %2522 }
 0x3f0   :  { %v620_v27 = vpop.xlane.xlu2 %619  ;;  %v2525_v34 = vpop.eup %2524  ;;  %v664_v33 = vmul.f32 %v2523_v36, %v3210_v55 }
 0x3f1   :  { %2526 = vrcp.f32 %v620_v27  ;;  %v663_v32 = vmul.f32 %v2525_v34, %v3194_v35  ;;  %v610_v38 = vpop.xlane.xlu0 %609 }
 0x3f2   :  { %2528 = vrcp.f32 %v618_v1 }
 0x3f3   :  { %v676_v37 = vpack.c.bf16 %v664_v33, %v663_v32 }
 0x3f4   :  { %684 = vmatpush.bf16.xpose.msra.mxu3 %v677_v51  ;;  %698 = vmatpush.bf16.xpose.msrb.mxu0 %v677_v51 }
 0x3f7   :  { %v2527_v52 = vpop.eup %2526 }
 0x3f8   :  { %v616_v62 = vpop.xlane.xlu2 %615  ;;  %v2529_v28 = vpop.eup %2528  ;;  %v662_v47 = vmul.f32 %v2527_v52, %v3217_v0 }
 0x3f9   :  { %2530 = vrcp.f32 %v616_v62  ;;  %v661_v39 = vmul.f32 %v2529_v28, %v3204_v42  ;;  %v397_v42 = vpop.f32.mrf.mxu1 }
 0x3fa   :  { %2532 = vrcp.f32 %v614_v13 }
 0x3fb   :  { %v675_v40 = vpack.c.bf16 %v662_v47, %v661_v39 }
 0x3fc   :  { %685 = vmatpush.bf16.xpose.msra.mxu3 %v676_v37  ;;  %699 = vmatpush.bf16.xpose.msrb.mxu0 %v676_v37 }
 0x3ff   :  { %v2531_v43 = vpop.eup %2530 }
 0x400   :  { %v612_v56 = vpop.xlane.xlu2 %611  ;;  %v2533_v35 = vpop.eup %2532  ;;  %v660_v17 = vmul.f32 %v2531_v43, %v3224_v7 }
 0x401   :  { %2534 = vrcp.f32 %v612_v56  ;;  %v659_v0 = vmul.f32 %v2533_v35, %v3212_v57  ;;  %v3257_v57 = vld [vmem:[%s4140_s1] sm:$0xf] }
 0x402   :  { %2536 = vrcp.f32 %v610_v38 }
 0x403   :  { %v275_v55 = vpop.permute.xlu0 %274  ;;  %v674_v18 = vpack.c.bf16 %v660_v17, %v659_v0 }
 0x404   :  { %v388_v14 = vadd.f32 %v3027_v21, %v275_v55  ;;  %686 = vmatpush.bf16.xpose.msra.mxu3 %v675_v40  ;;  %700 = vmatpush.bf16.xpose.msrb.mxu0 %v675_v40 }
 0x406   :  { %v709_v44 = vpack.c.bf16 %v388_v14, %v388_v14 }
 0x407   :  { %v2535_v61 = vpop.eup %2534 }
 0x408   :  { %712 = vxpose.xlu0.c.b16.start.end [1/1] (short) %v709_v44, 128  ;;  %v295_v46 = vpop.permute.xlu2 %294  ;;  %v2537_v30 = vpop.eup %2536  ;;  %v658_v21 = vmul.f32 %v2535_v61, %v3227_v25 }
 0x409   :  { %v398_v3 = vadd.f32 %v397_v42, %v295_v46  ;;  %v657_v4 = vmul.f32 %v2537_v30, %v3219_v24 }
 0x40b   :  { %v710_v1 = vpack.c.bf16 %v398_v3, %v398_v3  ;;  %v673_v6 = vpack.c.bf16 %v658_v21, %v657_v4 }
 0x40c   :  { %687 = vmatpush.bf16.xpose.msra.mxu3 %v674_v18  ;;  %701 = vmatpush.bf16.xpose.msrb.mxu0 %v674_v18 }
 0x40d   :  { %v753_v7 = vsel %vm476_vm5, %v710_v1, 0 }
 0x414   :  { %688 = vmatpush.bf16.xpose.msra.mxu3 %v673_v6  ;;  %702 = vmatpush.bf16.xpose.msrb.mxu0 %v673_v6 }
 0x41b   :  { %689 = vmatmul.bf16.vlgmr.msra.gmra.mxu3 %v3257_v57 }
 0x41c   :  { %762 = vmatpush.bf16.msrb.mxu3 %v753_v7 }
 0x49e   :  { %v690_v41 = vpop.f32.mrf.mxu3 }
 0x49f   :  { %694 = vst [vmem:[#allocation5] sm:$0xff] %v690_v41 }
 0x4a6   :  { %v692_v27 = vpop.f32.mrf.mxu3 }
 0x4b4   :  { %v720_v12 = vpop.trf.xlu0 }
 0x4b5   :  { %2342 = vmatmul.msk.bf16.vlgmr.msrb.gmra.mxu3 %vm451_vm6, %v720_v12 }
 0x4c4   :  { %v721_v25 = vpop.trf.xlu0 }
 0x4c5   :  { %2343 = vmatmul.msk.bf16.gmra.mxu3 %vm451_vm6, %v721_v25 }
 0x4d4   :  { %v722_v24 = vpop.trf.xlu0 }
 0x4d5   :  { %2344 = vmatmul.msk.bf16.gmra.mxu3 %vm451_vm6, %v722_v24 }
 0x4e4   :  { %v723_v29 = vpop.trf.xlu0 }
 0x4e5   :  { %2345 = vmatmul.msk.bf16.gmra.mxu3 %vm451_vm6, %v723_v29 }
 0x4f4   :  { %v724_v50 = vpop.trf.xlu0 }
 0x4f5   :  { %2346 = vmatmul.msk.bf16.gmra.mxu3 %vm451_vm6, %v724_v50 }
 0x504   :  { %v725_v31 = vpop.trf.xlu0 }
 0x505   :  { %2347 = vmatmul.msk.bf16.gmra.mxu3 %vm451_vm6, %v725_v31 }
 0x514   :  { %v726_v13 = vpop.trf.xlu0 }
 0x515   :  { %2348 = vmatmul.msk.bf16.gmra.mxu3 %vm451_vm6, %v726_v13 }
 0x524   :  { %v727_v51 = vpop.trf.xlu0 }
 0x525   :  { %2349 = vmatmul.msk.bf16.gmra.mxu3 %vm451_vm6, %v727_v51 }
 0x538   :  { %v764_v36 = vpop.f32.mrf.mxu3 }
 0x539   :  { %v3276_v44 = vadd.f32 %v764_v36, %v3147_v19 }
 0x540   :  { %v766_v34 = vpop.f32.mrf.mxu3 }
 0x548   :  { %v769_v33 = vpop.f32.mrf.mxu3 }
 0x549   :  { %v3272_v14 = vadd.f32 %v769_v33, %v3129_v15 }
 0x550   :  { %v771_v62 = vpop.f32.mrf.mxu3 }
 0x558   :  { %v774_v32 = vpop.f32.mrf.mxu3 }
 0x559   :  { %v775_v43 = vadd.f32 %v774_v32, %v3072_v53 }
 0x560   :  { %v776_v37 = vpop.f32.mrf.mxu3 }
 0x561   :  { %v777_v18 = vadd.f32 %v776_v37, %v3134_v16 }
 0x568   :  { %v779_v52 = vpop.f32.mrf.mxu3 }
 0x569   :  { %v780_v39 = vadd.f32 %v779_v52, %v3054_v48 }
 0x570   :  { %v781_v38 = vpop.f32.mrf.mxu3 }
 0x578   :  { %v784_v28 = vpop.f32.mrf.mxu3 }
 0x579   :  { %v785_v47 = vadd.f32 %v784_v28, %v3045_v45 }
 0x57b   :  { %820 = vmax.xlane.f32.xlu1 %v785_v47 }
 0x580   :  { %v786_v56 = vpop.f32.mrf.mxu3 }
 0x583   :  { %816 = vmax.xlane.f32.xlu1 %v780_v39 }
 0x588   :  { %v789_v40 = vpop.f32.mrf.mxu3 }
 0x589   :  { %v790_v19 = vadd.f32 %v789_v40, %v3077_v54 }
 0x58b   :  { %812 = vmax.xlane.f32.xlu1 %v775_v43 }
 0x590   :  { %v791_v55 = vpop.f32.mrf.mxu3 }
 0x593   :  { %808 = vmax.xlane.f32.xlu1 %v3272_v14 }
 0x598   :  { %v794_v35 = vpop.f32.mrf.mxu3 }
 0x599   :  { %v795_v53 = vadd.f32 %v794_v35, %v3096_v63  ;;  %v787_v63 = vadd.f32 %v786_v56, %v3059_v49 }
 0x59b   :  { %804 = vmax.xlane.f32.xlu1 %v3276_v44 }
 0x5a0   :  { %v796_v45 = vpop.f32.mrf.mxu3 }
 0x5a1   :  { %v3286_v15 = vadd.f32 %v796_v45, %v3102_v2  ;;  %v3298_v2 = vadd.f32 %v771_v62, %v3152_v20 }
 0x5a8   :  { %v799_v17 = vpop.f32.mrf.mxu3 }
 0x5a9   :  { %v800_v48 = vadd.f32 %v799_v17, %v3108_v5  ;;  %v3291_v5 = vadd.f32 %v791_v55, %v3087_v58  ;;  %v3302_v58 = vadd.f32 %v766_v34, %v3165_v26 }
 0x5ab   :  { %832 = vmax.xlane.f32.xlu2 %v800_v48 }
 0x5b0   :  { %v801_v0 = vpop.f32.mrf.mxu3 }
 0x5b1   :  { %v3282_v46 = vadd.f32 %v801_v0, %v3114_v8  ;;  %v782_v8 = vadd.f32 %v781_v38, %v3119_v9 }
 0x5b3   :  { %834 = vmax.xlane.f32.xlu0 %v3282_v46  ;;  %828 = vmax.xlane.f32.xlu2 %v795_v53 }
 0x5bb   :  { %830 = vmax.xlane.f32.xlu2 %v3286_v15 }
 0x5c3   :  { %824 = vmax.xlane.f32.xlu2 %v790_v19 }
 0x5cb   :  { %826 = vmax.xlane.f32.xlu2 %v3291_v5 }
 0x5d3   :  { %822 = vmax.xlane.f32.xlu2 %v787_v63 }
 0x5db   :  { %818 = vmax.xlane.f32.xlu2 %v782_v8 }
 0x5e3   :  { %814 = vmax.xlane.f32.xlu2 %v777_v18 }
 0x5eb   :  { %810 = vmax.xlane.f32.xlu2 %v3298_v2 }
 0x5ee   :  { %v821_v54 = vpop.xlane.xlu1 %820 }
 0x5ef   :  { %v844_v20 = vsub.f32 %v785_v47, %v821_v54 }
 0x5f1   :  { %v868_v21 = vmul.f32 1.442695, %v844_v20 }
 0x5f3   :  { %806 = vmax.xlane.f32.xlu2 %v3302_v58 }
 0x5f6   :  { %v817_v61 = vpop.xlane.xlu1 %816 }
 0x5f7   :  { %v842_v9 = vsub.f32 %v780_v39, %v817_v61  ;;  %v257_v39 = vld [vmem:[%s4115_s8 + $0x10] sm:$0xff] }
 0x5f9   :  { %v864_v30 = vmul.f32 1.442695, %v842_v9 }
 0x5fe   :  { %v813_v49 = vpop.xlane.xlu1 %812 }
 0x5ff   :  { %v840_v42 = vsub.f32 %v775_v43, %v813_v49  ;;  %v2427_v43 = vld [vmem:[%s4114_s7 + $0x18] sm:$0xff] }
 0x600   :  { %2331 = vmatmul.msk.bf16.gmra.mxu1 %vm357_vm4, %v2427_v43 }
 0x601   :  { %v860_v3 = vmul.f32 1.442695, %v840_v42 }
 0x603   :  { %2538 = vpow2.f32 %v860_v3 }
 0x604   :  { %2540 = vpow2.f32 %v864_v30 }
 0x605   :  { %2542 = vpow2.f32 %v868_v21 }
 0x606   :  { %v809_v0 = vpop.xlane.xlu1 %808 }
 0x609   :  { %v3305_v16 = vpop.eup %2538 }
 0x60a   :  { %892 = vadd.xlane.f32.xlu1 %v3305_v16  ;;  %v3308_v1 = vpop.eup %2540 }
 0x60b   :  { %v3311_v26 = vpop.eup %2542 }
 0x60e   :  { %v805_v42 = vpop.xlane.xlu1 %804 }
 0x612   :  { %896 = vadd.xlane.f32.xlu1 %v3308_v1 }
 0x61a   :  { %900 = vadd.xlane.f32.xlu1 %v3311_v26 }
 0x61e   :  { %v833_v4 = vpop.xlane.xlu2 %832 }
 0x61f   :  { %v850_v31 = vsub.f32 %v800_v48, %v833_v4 }
 0x621   :  { %v880_v51 = vmul.f32 1.442695, %v850_v31 }
 0x626   :  { %v829_v6 = vpop.xlane.xlu2 %828  ;;  %v835_v20 = vpop.xlane.xlu0 %834 }
 0x627   :  { %v848_v29 = vsub.f32 %v795_v53, %v829_v6  ;;  %v851_v4 = vsub.f32 %v3282_v46, %v835_v20 }
 0x629   :  { %v876_v41 = vmul.f32 1.442695, %v848_v29  ;;  %v263_v29 = vld [vmem:[%s4115_s8 + $0x40] sm:$0xff] }
 0x62e   :  { %v831_v7 = vpop.xlane.xlu2 %830 }
 0x62f   :  { %v849_v17 = vsub.f32 %v3286_v15, %v831_v7 }
 0x631   :  { %v878_v48 = vmul.f32 1.442695, %v849_v17 }
 0x636   :  { %v825_v12 = vpop.xlane.xlu2 %824 }
 0x637   :  { %v846_v25 = vsub.f32 %v790_v19, %v825_v12  ;;  %v264_v12 = vld [vmem:[%s4115_s8 + $0x48] sm:$0xff] }
 0x639   :  { %v872_v24 = vmul.f32 1.442695, %v846_v25  ;;  %v261_v25 = vld [vmem:[%s4115_s8 + $0x30] sm:$0xff] }
 0x63b   :  { %2544 = vpow2.f32 %v872_v24 }
 0x63c   :  { %2546 = vpow2.f32 %v876_v41 }
 0x63d   :  { %2548 = vpow2.f32 %v880_v51 }
 0x63e   :  { %v827_v50 = vpop.xlane.xlu2 %826 }
 0x63f   :  { %v847_v55 = vsub.f32 %v3291_v5, %v827_v50  ;;  %v2428_v5 = vld [vmem:[%s4114_s7 + $0x20] sm:$0xff] }
 0x640   :  { %2332 = vmatmul.msk.bf16.gmra.mxu1 %vm357_vm4, %v2428_v5 }
 0x641   :  { %v3314_v27 = vpop.eup %2544  ;;  %v874_v35 = vmul.f32 1.442695, %v847_v55 }
 0x642   :  { %904 = vadd.xlane.f32.xlu1 %v3314_v27  ;;  %v3317_v36 = vpop.eup %2546 }
 0x643   :  { %v3320_v33 = vpop.eup %2548 }
 0x646   :  { %v823_v13 = vpop.xlane.xlu2 %822 }
 0x647   :  { %v845_v47 = vsub.f32 %v787_v63, %v823_v13  ;;  %v838_v63 = vsub.f32 %v3272_v14, %v809_v0  ;;  %v836_v14 = vsub.f32 %v3276_v44, %v805_v42 }
 0x649   :  { %v870_v56 = vmul.f32 1.442695, %v845_v47  ;;  %v852_v30 = vmul.f32 1.442695, %v836_v14 }
 0x64a   :  { %908 = vadd.xlane.f32.xlu1 %v3317_v36 }
 0x64e   :  { %v819_v34 = vpop.xlane.xlu2 %818 }
 0x64f   :  { %v843_v52 = vsub.f32 %v782_v8, %v819_v34  ;;  %v856_v8 = vmul.f32 1.442695, %v838_v63 }
 0x651   :  { %v866_v38 = vmul.f32 1.442695, %v843_v52 }
 0x652   :  { %912 = vadd.xlane.f32.xlu1 %v3320_v33 }
 0x656   :  { %v815_v62 = vpop.xlane.xlu2 %814 }
 0x657   :  { %v841_v32 = vsub.f32 %v777_v18, %v815_v62 }
 0x659   :  { %v862_v37 = vmul.f32 1.442695, %v841_v32 }
 0x65b   :  { %2550 = vpow2.f32 %v862_v37 }
 0x65c   :  { %2552 = vpow2.f32 %v866_v38 }
 0x65d   :  { %2554 = vpow2.f32 %v870_v56 }
 0x65e   :  { %2556 = vpow2.f32 %v874_v35  ;;  %v811_v19 = vpop.xlane.xlu2 %810 }
 0x65f   :  { %2558 = vpow2.f32 %v878_v48  ;;  %v839_v15 = vsub.f32 %v3298_v2, %v811_v19 }
 0x660   :  { %2560 = vpow2.f32 %v856_v8 }
 0x661   :  { %v3323_v28 = vpop.eup %2550  ;;  %v858_v49 = vmul.f32 1.442695, %v839_v15 }
 0x662   :  { %894 = vadd.xlane.f32.xlu2 %v3323_v28  ;;  %v3329_v40 = vpop.eup %2552 }
 0x663   :  { %v3337_v45 = vpop.eup %2554  ;;  %2562 = vpow2.f32 %v858_v49 }
 0x664   :  { %v3341_v53 = vpop.eup %2556 }
 0x665   :  { %v3349_v18 = vpop.eup %2558 }
 0x666   :  { %v807_v54 = vpop.xlane.xlu2 %806  ;;  %v2561_v3 = vpop.eup %2560 }
 0x667   :  { %v837_v61 = vsub.f32 %v3302_v58, %v807_v54  ;;  %v882_v58 = vmul.f32 1.442695, %v851_v4 }
 0x669   :  { %v854_v9 = vmul.f32 1.442695, %v837_v61  ;;  %v2563_v21 = vpop.eup %2562 }
 0x66a   :  { %898 = vadd.xlane.f32.xlu2 %v3329_v40 }
 0x66b   :  { %279 = vperm.xlu1 %2472, %v257_v39   ;;  %2564 = vpow2.f32 %v854_v9 }
 0x66c   :  { %2566 = vpow2.f32 %v852_v30 }
 0x66d   :  { %2568 = vpow2.f32 %v882_v58 }
 0x671   :  { %v3356_v2 = vpop.eup %2564 }
 0x672   :  { %902 = vadd.xlane.f32.xlu2 %v3337_v45  ;;  %v3359_v6 = vpop.eup %2566 }
 0x673   :  { %v2569_v44 = vpop.eup %2568 }
 0x67a   :  { %906 = vadd.xlane.f32.xlu2 %v3341_v53 }
 0x67d   :  { %v3362_v7 = vpop.xlane.xlu1 %892  ;;  %v400_v8 = vpop.f32.mrf.mxu1 }
 0x682   :  { %910 = vadd.xlane.f32.xlu2 %v3349_v18 }
 0x685   :  { %v3367_v46 = vpop.xlane.xlu1 %896 }
 0x68a   :  { %888 = vadd.xlane.f32.xlu2 %v2561_v3 }
 0x68d   :  { %v901_v24 = vpop.xlane.xlu1 %900 }
 0x68e   :  { %2570 = vrcp.f32 %v901_v24 }
 0x692   :  { %890 = vadd.xlane.f32.xlu2 %v2563_v21 }
 0x694   :  { %v2571_v52 = vpop.eup %2570 }
 0x695   :  { %886 = vadd.xlane.f32.xlu1 %v3356_v2  ;;  %v940_v56 = vmul.f32 %v2571_v52, %v3311_v26  ;;  %v3380_v26 = vpop.f32.mrf.mxu1 }
 0x69a   :  { %884 = vadd.xlane.f32.xlu2 %v3359_v6 }
 0x6a2   :  { %914 = vadd.xlane.f32.xlu2 %v2569_v44 }
 0x6ae   :  { %314 = vperm.xlu1 %2472, %v264_v12  }
 0x6b5   :  { %v905_v50 = vpop.xlane.xlu1 %904 }
 0x6ba   :  { %299 = vperm.xlu2 %2471, %v261_v25  }
 0x6bd   :  { %v909_v41 = vpop.xlane.xlu1 %908  ;;  %v405_v20 = vpop.f32.mrf.mxu1 }
 0x6c2   :  { %309 = vperm.xlu2 %2471, %v263_v29  }
 0x6c5   :  { %v913_v13 = vpop.xlane.xlu1 %912 }
 0x6d5   :  { %v3375_v31 = vpop.xlane.xlu2 %894 }
 0x6dd   :  { %v899_v51 = vpop.xlane.xlu2 %898  ;;  %v280_v34 = vpop.permute.xlu1 %279 }
 0x6de   :  { %v391_v62 = vadd.f32 %v3029_v22, %v280_v34 }
 0x6e0   :  { %v985_v37 = vpack.c.bf16 %v391_v62, %v391_v62 }
 0x6e5   :  { %v903_v32 = vpop.xlane.xlu2 %902 }
 0x6e6   :  { %2572 = vrcp.f32 %v903_v32 }
 0x6e8   :  { %988 = vxpose.xlu2.c.b16.start.end [1/1] (short) %v985_v37, 128 }
 0x6ec   :  { %v2573_v38 = vpop.eup %2572 }
 0x6ed   :  { %v907_v47 = vpop.xlane.xlu2 %906  ;;  %v941_v39 = vmul.f32 %v2573_v38, %v3337_v45  ;;  %v407_v38 = vpop.f32.mrf.mxu1 }
 0x6ef   :  { %v952_v43 = vpack.c.bf16 %v941_v39, %v940_v56 }
 0x6f5   :  { %v911_v55 = vpop.xlane.xlu2 %910 }
 0x6fd   :  { %v889_v35 = vpop.xlane.xlu2 %888 }
 0x6fe   :  { %2574 = vrcp.f32 %v889_v35 }
 0x704   :  { %v2575_v48 = vpop.eup %2574 }
 0x705   :  { %v891_v17 = vpop.xlane.xlu2 %890  ;;  %v934_v19 = vmul.f32 %v2575_v48, %v2561_v3 }
 0x706   :  { %2576 = vrcp.f32 %v891_v17 }
 0x707   :  { %2578 = vrcp.f32 %v913_v13 }
 0x708   :  { %v887_v32 = vpop.xlane.xlu1 %886 }
 0x70c   :  { %v2577_v22 = vpop.eup %2576 }
 0x70d   :  { %v885_v0 = vpop.xlane.xlu2 %884  ;;  %v935_v5 = vmul.f32 %v2577_v22, %v2563_v21  ;;  %v2579_v54 = vpop.eup %2578 }
 0x70e   :  { %v946_v49 = vmul.f32 %v2579_v54, %v3320_v33 }
 0x70f   :  { %v949_v63 = vpack.c.bf16 %v935_v5, %v934_v19 }
 0x715   :  { %v915_v15 = vpop.xlane.xlu2 %914 }
 0x716   :  { %2580 = vrcp.f32 %v915_v15 }
 0x717   :  { %2582 = vrcp.f32 %v911_v55 }
 0x718   :  { %2584 = vrcp.f32 %v909_v41 }
 0x719   :  { %2586 = vrcp.f32 %v907_v47 }
 0x71a   :  { %2588 = vrcp.f32 %v905_v50 }
 0x71b   :  { %2590 = vrcp.f32 %v899_v51 }
 0x71c   :  { %v2581_v45 = vpop.eup %2580  ;;  %2592 = vrcp.f32 %v3367_v46 }
 0x71d   :  { %v300_v61 = vpop.permute.xlu2 %299  ;;  %v947_v42 = vmul.f32 %v2581_v45, %v2569_v44  ;;  %v2583_v14 = vpop.eup %2582  ;;  %2594 = vrcp.f32 %v3375_v31 }
 0x71e   :  { %v2585_v3 = vpop.eup %2584  ;;  %v945_v30 = vmul.f32 %v2583_v14, %v3349_v18  ;;  %2596 = vrcp.f32 %v3362_v7  ;;  %v401_v31 = vadd.f32 %v400_v8, %v300_v61 }
 0x71f   :  { %v955_v9 = vpack.c.bf16 %v947_v42, %v946_v49  ;;  %v944_v4 = vmul.f32 %v2585_v3, %v3317_v36  ;;  %v2587_v25 = vpop.eup %2586  ;;  %2598 = vrcp.f32 %v885_v0 }
 0x720   :  { %v2589_v33 = vpop.eup %2588  ;;  %v943_v44 = vmul.f32 %v2587_v25, %v3341_v53  ;;  %2600 = vrcp.f32 %v887_v32  ;;  %v986_v37 = vpack.c.bf16 %v401_v31, %v401_v31  ;;  %v3441_v25 = vld [vmem:[%s4139_s6 + $0x30] sm:$0xff]  ;;  %v3480_v32 = vld [vmem:[%s4139_s6 + $0x48] sm:$0xff] }
 0x721   :  { %956 = vmatpush.bf16.xpose.msrb.mxu1 %v955_v9  ;;  %971 = vmatpush.bf16.xpose.msra.mxu0 %v955_v9  ;;  %v954_v12 = vpack.c.bf16 %v945_v30, %v944_v4  ;;  %v942_v29 = vmul.f32 %v2589_v33, %v3314_v27  ;;  %v2591_v18 = vpop.eup %2590  ;;  %v3423_v30 = vld [vmem:[%s4139_s6 + $0x20] sm:$0xff] }
 0x722   :  { %v2593_v36 = vpop.eup %2592  ;;  %v939_v50 = vmul.f32 %v2591_v18, %v3329_v40 }
 0x723   :  { %v953_v41 = vpack.c.bf16 %v943_v44, %v942_v29  ;;  %v938_v53 = vmul.f32 %v2593_v36, %v3308_v1  ;;  %v2595_v27 = vpop.eup %2594 }
 0x724   :  { %v2597_v34 = vpop.eup %2596  ;;  %v937_v51 = vmul.f32 %v2595_v27, %v3323_v28  ;;  %v315_v28 = vpop.permute.xlu1 %314  ;;  %v3465_v27 = vld [vmem:[%s4139_s6 + $0x40] sm:$0xff] }
 0x725   :  { %v310_v21 = vpop.permute.xlu2 %309  ;;  %v951_v13 = vpack.c.bf16 %v939_v50, %v938_v53  ;;  %v936_v46 = vmul.f32 %v2597_v34, %v3305_v16  ;;  %v2599_v40 = vpop.eup %2598  ;;  %v1029_v16 = vsel %vm476_vm5, %v986_v37, 0  ;;  %v408_v56 = vadd.f32 %v407_v38, %v315_v28  ;;  %v3456_v50 = vld [vmem:[%s4139_s6 + $0x58] sm:$0xff]  ;;  %v3495_v37 = vld [vmem:[%s4139_s6 + $0x70] sm:$0xff] }
 0x726   :  { %v406_v58 = vadd.f32 %v405_v20, %v310_v21  ;;  %v2601_v1 = vpop.eup %2600  ;;  %v932_v7 = vmul.f32 %v2599_v40, %v3359_v6  ;;  %v3432_v21 = vld [vmem:[%s4139_s6 + $0x10] sm:$0xff]  ;;  %v3501_v28 = vld [vmem:[%s4139_s6 + $0x78] sm:$0xff] }
 0x727   :  { %v950_v62 = vpack.c.bf16 %v937_v51, %v936_v46  ;;  %v933_v52 = vmul.f32 %v2601_v1, %v3356_v2  ;;  %v711_v39 = vpack.c.bf16 %v408_v56, %v408_v56  ;;  %v3473_v51 = vld [vmem:[%s4139_s6 + $0x60] sm:$0xff]  ;;  %v3489_v1 = vld [vmem:[%s4139_s6 + $0x68] sm:$0xff] }
 0x728   :  { %v434_v24 = vpack.c.bf16 %v406_v58, %v406_v58 }
 0x729   :  { %957 = vmatpush.bf16.xpose.msrb.mxu1 %v954_v12  ;;  %972 = vmatpush.bf16.xpose.msra.mxu0 %v954_v12  ;;  %v948_v47 = vpack.c.bf16 %v933_v52, %v932_v7 }
 0x72a   :  { %703 = vmatmul.bf16.vlgmr.msrb.gmra.mxu0 %v434_v24 }
 0x731   :  { %958 = vmatpush.bf16.xpose.msrb.mxu1 %v953_v41  ;;  %973 = vmatpush.bf16.xpose.msra.mxu0 %v953_v41  ;;  %v3450_v41 = vld [vmem:[%s4139_s6 + $0x50] sm:$0xff] }
 0x739   :  { %959 = vmatpush.bf16.xpose.msrb.mxu1 %v952_v43  ;;  %974 = vmatpush.bf16.xpose.msra.mxu0 %v952_v43  ;;  %v2429_v43 = vld [vmem:[%s4114_s7 + $0x28] sm:$0xff] }
 0x73a   :  { %2333 = vmatmul.msk.bf16.gmra.mxu1 %vm357_vm4, %v2429_v43 }
 0x741   :  { %960 = vmatpush.bf16.xpose.msrb.mxu1 %v951_v13  ;;  %975 = vmatpush.bf16.xpose.msra.mxu0 %v951_v13 }
 0x749   :  { %961 = vmatpush.bf16.xpose.msrb.mxu1 %v950_v62  ;;  %976 = vmatpush.bf16.xpose.msra.mxu0 %v950_v62 }
 0x751   :  { %962 = vmatpush.bf16.xpose.msrb.mxu1 %v949_v63  ;;  %977 = vmatpush.bf16.xpose.msra.mxu0 %v949_v63 }
 0x759   :  { %963 = vmatpush.bf16.xpose.msrb.mxu1 %v948_v47  ;;  %978 = vmatpush.bf16.xpose.msra.mxu0 %v948_v47 }
 0x760   :  { %979 = vmatmul.bf16.vlgmr.msra.gmra.mxu0 %v711_v39  ;;  %964 = vmatmul.bf16.vlgmr.msrb.gmra.mxu1 %v3257_v57  ;;  %v3515_v39 = vld [vmem:[%s4139_s6 + $0x28] sm:$0xff] }
 0x761   :  { %1038 = vmatpush.bf16.msrb.mxu0 %v1029_v16  ;;  %2442 = vmatpush.bf16.msra.mxu1 %v1029_v16  ;;  %v3507_v16 = vld [vmem:[%s4139_s6] sm:$0xff] }
 0x789   :  { %v996_v6 = vpop.trf.xlu2 }
 0x78a   :  { %2350 = vmatmul.msk.bf16.vlgmr.msrb.gmra.mxu0 %vm451_vm6, %v996_v6  ;;  %v3525_v6 = vld [vmem:[%s4139_s6 + $0x18] sm:$0xff] }
 0x799   :  { %v997_v2 = vpop.trf.xlu2 }
 0x79a   :  { %2351 = vmatmul.msk.bf16.gmra.mxu0 %vm451_vm6, %v997_v2 }
 0x7a7   :  { %v3404_v55 = vpop.f32.mrf.mxu0 }
 0x7a9   :  { %v998_v35 = vpop.trf.xlu2 }
 0x7aa   :  { %2352 = vmatmul.msk.bf16.gmra.mxu0 %vm451_vm6, %v998_v35  ;;  %v3534_v35 = vld [vmem:[%s4139_s6 + $0x8] sm:$0xff] }
 0x7af   :  { %v706_v17 = vpop.f32.mrf.mxu0 }
 0x7b7   :  { %v3415_v15 = vpop.f32.mrf.mxu1 }
 0x7b9   :  { %v999_v48 = vpop.trf.xlu2 }
 0x7ba   :  { %2353 = vmatmul.msk.bf16.gmra.mxu0 %vm451_vm6, %v999_v48 }
 0x7bf   :  { %v3418_v54 = vpop.f32.mrf.mxu1 }
 0x7c9   :  { %v1000_v22 = vpop.trf.xlu2 }
 0x7ca   :  { %2354 = vmatmul.msk.bf16.vlgmr.msra.gmra.mxu1 %vm451_vm6, %v1000_v22  ;;  %v3543_v22 = vld [vmem:[%s4139_s6 + $0x38] sm:$0xff] }
 0x7d9   :  { %v1001_v0 = vpop.trf.xlu2 }
 0x7da   :  { %2355 = vmatmul.msk.bf16.gmra.mxu1 %vm451_vm6, %v1001_v0 }
 0x7dd   :  { %v3410_v19 = vpop.f32.mrf.mxu0  ;;  %v965_v61 = vpop.f32.mrf.mxu1 }
 0x7de   :  { %v1545_v57 = vpack.c.bf16 %v3410_v19, %v3404_v55  ;;  %970 = vst [vmem:[#allocation5 + $0x8] sm:$0xff] %v965_v61 }
 0x7e5   :  { %v982_v5 = vpop.f32.mrf.mxu0  ;;  %v967_v42 = vpop.f32.mrf.mxu1 }
 0x7e9   :  { %v1002_v63 = vpop.trf.xlu2 }
 0x7ea   :  { %2356 = vmatmul.msk.bf16.gmra.mxu1 %vm451_vm6, %v1002_v63 }
 0x7f9   :  { %v1003_v8 = vpop.trf.xlu2 }
 0x7fa   :  { %2357 = vmatmul.msk.bf16.gmra.mxu1 %vm451_vm6, %v1003_v8 }
 0x807   :  { %v1040_v45 = vpop.f32.mrf.mxu0 }
 0x808   :  { %v3510_v56 = vadd.f32 %v3507_v16, %v1040_v45 }
 0x80f   :  { %v1042_v49 = vpop.f32.mrf.mxu0 }
 0x810   :  { %v3537_v17 = vadd.f32 %v3534_v35, %v1042_v49 }
 0x817   :  { %v1045_v9 = vpop.f32.mrf.mxu0 }
 0x818   :  { %v3435_v4 = vadd.f32 %v3432_v21, %v1045_v9 }
 0x81f   :  { %v1047_v14 = vpop.f32.mrf.mxu0 }
 0x820   :  { %v3528_v2 = vadd.f32 %v3525_v6, %v1047_v14 }
 0x827   :  { %v1050_v3 = vpop.f32.mrf.mxu0 }
 0x828   :  { %v3426_v20 = vadd.f32 %v3423_v30, %v1050_v3 }
 0x82a   :  { %1088 = vmax.xlane.f32.xlu1 %v3426_v20 }
 0x82f   :  { %v1052_v58 = vpop.f32.mrf.mxu0 }
 0x830   :  { %v3518_v43 = vadd.f32 %v3515_v39, %v1052_v58 }
 0x832   :  { %1084 = vmax.xlane.f32.xlu1 %v3435_v4 }
 0x837   :  { %v1055_v12 = vpop.f32.mrf.mxu0 }
 0x838   :  { %v3444_v24 = vadd.f32 %v3441_v25, %v1055_v12 }
 0x83a   :  { %1092 = vmax.xlane.f32.xlu1 %v3444_v24 }
 0x83f   :  { %v1057_v48 = vpop.f32.mrf.mxu0 }
 0x840   :  { %v3546_v0 = vadd.f32 %v3543_v22, %v1057_v48 }
 0x847   :  { %v1060_v33 = vpop.f32.mrf.mxu1 }
 0x848   :  { %v3468_v34 = vadd.f32 %v3465_v27, %v1060_v33 }
 0x84f   :  { %v1062_v44 = vpop.f32.mrf.mxu1 }
 0x850   :  { %v3483_v40 = vadd.f32 %v3480_v32, %v1062_v44 }
 0x857   :  { %v1065_v29 = vpop.f32.mrf.mxu1 }
 0x858   :  { %v1066_v18 = vadd.f32 %v3450_v41, %v1065_v29 }
 0x85a   :  { %1100 = vmax.xlane.f32.xlu0 %v1066_v18 }
 0x85f   :  { %v1067_v36 = vpop.f32.mrf.mxu1 }
 0x860   :  { %v3459_v53 = vadd.f32 %v3456_v50, %v1067_v36 }
 0x862   :  { %1102 = vmax.xlane.f32.xlu0 %v3459_v53 }
 0x867   :  { %v1070_v13 = vpop.f32.mrf.mxu1 }
 0x868   :  { %v1071_v46 = vadd.f32 %v3473_v51, %v1070_v13 }
 0x86a   :  { %1096 = vmax.xlane.f32.xlu0 %v3468_v34  ;;  %1104 = vmax.xlane.f32.xlu2 %v1071_v46 }
 0x86f   :  { %v1072_v62 = vpop.f32.mrf.mxu1 }
 0x870   :  { %v1073_v7 = vadd.f32 %v3489_v1, %v1072_v62 }
 0x872   :  { %1098 = vmax.xlane.f32.xlu0 %v3483_v40 }
 0x877   :  { %v1075_v31 = vpop.f32.mrf.mxu1 }
 0x878   :  { %v1076_v52 = vadd.f32 %v3495_v37, %v1075_v31 }
 0x87a   :  { %1106 = vmax.xlane.f32.xlu0 %v1073_v7 }
 0x87f   :  { %v1077_v38 = vpop.f32.mrf.mxu1 }
 0x880   :  { %v1078_v47 = vadd.f32 %v3501_v28, %v1077_v38 }
 0x882   :  { %1110 = vmax.xlane.f32.xlu1 %v1078_v47  ;;  %1108 = vmax.xlane.f32.xlu0 %v1076_v52 }
 0x88a   :  { %1080 = vmax.xlane.f32.xlu1 %v3510_v56  ;;  %1090 = vmax.xlane.f32.xlu0 %v3518_v43 }
 0x892   :  { %1086 = vmax.xlane.f32.xlu0 %v3528_v2 }
 0x89a   :  { %1082 = vmax.xlane.f32.xlu0 %v3537_v17 }
 0x89d   :  { %v1089_v49 = vpop.xlane.xlu1 %1088 }
 0x8a2   :  { %1094 = vmax.xlane.f32.xlu0 %v3546_v0 }
 0x8a5   :  { %v1085_v58 = vpop.xlane.xlu1 %1084 }
 0x8ad   :  { %v1093_v44 = vpop.xlane.xlu1 %1092 }
 0x8cd   :  { %v1101_v5 = vpop.xlane.xlu0 %1100 }
 0x8ce   :  { %v1122_v63 = vsub.f32 %v1066_v18, %v1101_v5 }
 0x8d0   :  { %v1148_v8 = vmul.f32 1.442695, %v1122_v63 }
 0x8d2   :  { %2602 = vpow2.f32 %v1148_v8 }
 0x8d5   :  { %v1103_v45 = vpop.xlane.xlu0 %1102 }
 0x8d6   :  { %v1123_v63 = vsub.f32 %v3459_v53, %v1103_v45  ;;  %v1118_v53 = vsub.f32 %v3444_v24, %v1093_v44 }
 0x8d8   :  { %v3549_v61 = vpop.eup %2602  ;;  %v1140_v45 = vmul.f32 1.442695, %v1118_v53 }
 0x8d9   :  { %1180 = vadd.xlane.f32.xlu1 %v3549_v61 }
 0x8dd   :  { %v1097_v42 = vpop.xlane.xlu0 %1096  ;;  %v1105_v9 = vpop.xlane.xlu2 %1104 }
 0x8de   :  { %v1124_v14 = vsub.f32 %v1071_v46, %v1105_v9  ;;  %v1120_v8 = vsub.f32 %v3468_v34, %v1097_v42 }
 0x8e0   :  { %v1152_v3 = vmul.f32 1.442695, %v1124_v14  ;;  %v1144_v14 = vmul.f32 1.442695, %v1120_v8 }
 0x8e2   :  { %2604 = vpow2.f32 %v1152_v3 }
 0x8e5   :  { %v1099_v12 = vpop.xlane.xlu0 %1098 }
 0x8e8   :  { %v3552_v33 = vpop.eup %2604 }
 0x8e9   :  { %1184 = vadd.xlane.f32.xlu1 %v3552_v33 }
 0x8ed   :  { %v1107_v29 = vpop.xlane.xlu0 %1106 }
 0x8ee   :  { %v1125_v18 = vsub.f32 %v1073_v7, %v1107_v29  ;;  %v1150_v7 = vmul.f32 1.442695, %v1123_v63 }
 0x8f0   :  { %v1154_v36 = vmul.f32 1.442695, %v1125_v18 }
 0x8f2   :  { %2606 = vpow2.f32 %v1154_v36 }
 0x8f5   :  { %v1111_v13 = vpop.xlane.xlu1 %1110  ;;  %v1109_v62 = vpop.xlane.xlu0 %1108 }
 0x8f6   :  { %v1127_v31 = vsub.f32 %v1078_v47, %v1111_v13  ;;  %v1126_v38 = vsub.f32 %v1076_v52, %v1109_v62  ;;  %v1121_v52 = vsub.f32 %v3483_v40, %v1099_v12  ;;  %v1116_v40 = vsub.f32 %v3426_v20, %v1089_v49 }
 0x8f8   :  { %v3555_v48 = vpop.eup %2606  ;;  %v1158_v46 = vmul.f32 1.442695, %v1127_v31  ;;  %v1156_v5 = vmul.f32 1.442695, %v1126_v38  ;;  %v1146_v34 = vmul.f32 1.442695, %v1121_v52 }
 0x8f9   :  { %1186 = vadd.xlane.f32.xlu0 %v3555_v48  ;;  %v1136_v44 = vmul.f32 1.442695, %v1116_v40 }
 0x8fa   :  { %2608 = vpow2.f32 %v1158_v46 }
 0x8fb   :  { %2610 = vpow2.f32 %v1156_v5 }
 0x8fc   :  { %2612 = vpow2.f32 %v1150_v7 }
 0x8fd   :  { %v1091_v9 = vpop.xlane.xlu0 %1090  ;;  %2614 = vpow2.f32 %v1144_v14  ;;  %v1081_v46 = vpop.xlane.xlu1 %1080 }
 0x8fe   :  { %2616 = vpow2.f32 %v1146_v34  ;;  %v1117_v36 = vsub.f32 %v3518_v43, %v1091_v9  ;;  %v1114_v43 = vsub.f32 %v3435_v4, %v1085_v58  ;;  %v1112_v4 = vsub.f32 %v3510_v56, %v1081_v46 }
 0x8ff   :  { %2618 = vpow2.f32 %v1140_v45 }
 0x900   :  { %v3560_v3 = vpop.eup %2608  ;;  %v1138_v24 = vmul.f32 1.442695, %v1117_v36  ;;  %v1132_v20 = vmul.f32 1.442695, %v1114_v43  ;;  %v1128_v9 = vmul.f32 1.442695, %v1112_v4 }
 0x901   :  { %v3562_v29 = vpop.eup %2610  ;;  %1190 = vadd.xlane.f32.xlu0 %v3560_v3 }
 0x902   :  { %1188 = vadd.xlane.f32.xlu1 %v3562_v29  ;;  %v3568_v42 = vpop.eup %2612  ;;  %2620 = vpow2.f32 %v1138_v24 }
 0x903   :  { %v3570_v18 = vpop.eup %2614  ;;  %2622 = vpow2.f32 %v1136_v44 }
 0x904   :  { %v3576_v13 = vpop.eup %2616 }
 0x905   :  { %v1087_v47 = vpop.xlane.xlu0 %1086  ;;  %v3578_v62 = vpop.eup %2618 }
 0x906   :  { %v1115_v8 = vsub.f32 %v3528_v2, %v1087_v47  ;;  %v262_v47 = vld [vmem:[%s4115_s8 + $0x38] sm:$0xff] }
 0x908   :  { %v3584_v49 = vpop.eup %2620  ;;  %v1134_v58 = vmul.f32 1.442695, %v1115_v8 }
 0x909   :  { %1182 = vadd.xlane.f32.xlu0 %v3568_v42  ;;  %v3586_v63 = vpop.eup %2622 }
 0x90a   :  { %1176 = vadd.xlane.f32.xlu1 %v3570_v18 }
 0x90d   :  { %v1083_v12 = vpop.xlane.xlu0 %1082 }
 0x90e   :  { %v1113_v14 = vsub.f32 %v3537_v17, %v1083_v12  ;;  %v258_v17 = vld [vmem:[%s4115_s8 + $0x18] sm:$0xff] }
 0x910   :  { %v1130_v2 = vmul.f32 1.442695, %v1113_v14 }
 0x911   :  { %1178 = vadd.xlane.f32.xlu0 %v3576_v13 }
 0x912   :  { %1172 = vadd.xlane.f32.xlu1 %v3578_v62 }
 0x915   :  { %v1095_v31 = vpop.xlane.xlu0 %1094 }
 0x916   :  { %v1119_v38 = vsub.f32 %v3546_v0, %v1095_v31 }
 0x918   :  { %v1142_v5 = vmul.f32 1.442695, %v1119_v38 }
 0x919   :  { %1170 = vadd.xlane.f32.xlu0 %v3584_v49 }
 0x91a   :  { %2624 = vpow2.f32 %v1142_v5  ;;  %1168 = vadd.xlane.f32.xlu1 %v3586_v63 }
 0x91b   :  { %2626 = vpow2.f32 %v1132_v20 }
 0x91c   :  { %2628 = vpow2.f32 %v1134_v58 }
 0x91d   :  { %2630 = vpow2.f32 %v1128_v9 }
 0x91e   :  { %2632 = vpow2.f32 %v1130_v2 }
 0x920   :  { %v3592_v0 = vpop.eup %2624 }
 0x921   :  { %v3594_v7 = vpop.eup %2626  ;;  %1174 = vadd.xlane.f32.xlu0 %v3592_v0 }
 0x922   :  { %1164 = vadd.xlane.f32.xlu1 %v3594_v7  ;;  %v3599_v52 = vpop.eup %2628 }
 0x923   :  { %v3601_v53 = vpop.eup %2630 }
 0x924   :  { %v3605_v56 = vpop.eup %2632 }
 0x929   :  { %1166 = vadd.xlane.f32.xlu0 %v3599_v52 }
 0x92a   :  { %1160 = vadd.xlane.f32.xlu1 %v3601_v53 }
 0x931   :  { %1162 = vadd.xlane.f32.xlu0 %v3605_v56 }
 0x943   :  { %284 = vperm.xlu1 %2472, %v258_v17  }
 0x945   :  { %304 = vperm.xlu0 %2473, %v262_v47  }
 0x94c   :  { %v1181_v34 = vpop.xlane.xlu1 %1180 }
 0x95c   :  { %v1185_v36 = vpop.xlane.xlu1 %1184 }
 0x96c   :  { %v1187_v45 = vpop.xlane.xlu0 %1186 }
 0x974   :  { %v1191_v40 = vpop.xlane.xlu0 %1190 }
 0x975   :  { %2634 = vrcp.f32 %v1191_v40  ;;  %v1189_v12 = vpop.xlane.xlu1 %1188 }
 0x976   :  { %2636 = vrcp.f32 %v1189_v12 }
 0x977   :  { %2638 = vrcp.f32 %v1187_v45 }
 0x978   :  { %2640 = vrcp.f32 %v1185_v36 }
 0x97b   :  { %v2635_v24 = vpop.eup %2634 }
 0x97c   :  { %v2637_v44 = vpop.eup %2636  ;;  %v1183_v43 = vpop.xlane.xlu0 %1182  ;;  %v1223_v31 = vmul.f32 %v2635_v24, %v3560_v3 }
 0x97d   :  { %v1222_v38 = vmul.f32 %v2637_v44, %v3562_v29  ;;  %v2639_v46 = vpop.eup %2638  ;;  %v1177_v5 = vpop.xlane.xlu1 %1176  ;;  %2642 = vrcp.f32 %v1183_v43 }
 0x97e   :  { %v2641_v8 = vpop.eup %2640  ;;  %v1221_v4 = vmul.f32 %v2639_v46, %v3555_v48  ;;  %2644 = vrcp.f32 %v1181_v34 }
 0x97f   :  { %v1231_v20 = vpack.c.bf16 %v1223_v31, %v1222_v38  ;;  %v1220_v9 = vmul.f32 %v2641_v8, %v3552_v33 }
 0x981   :  { %1232 = vmatpush.bf16.xpose.msrb.mxu2 %v1231_v20  ;;  %1247 = vmatpush.bf16.xpose.msra.mxu0 %v1231_v20  ;;  %v1230_v14 = vpack.c.bf16 %v1221_v4, %v1220_v9 }
 0x983   :  { %v2643_v2 = vpop.eup %2642 }
 0x984   :  { %v1179_v58 = vpop.xlane.xlu0 %1178  ;;  %v2645_v3 = vpop.eup %2644  ;;  %v1219_v17 = vmul.f32 %v2643_v2, %v3568_v42 }
 0x985   :  { %2646 = vrcp.f32 %v1179_v58  ;;  %v1173_v29 = vpop.xlane.xlu1 %1172  ;;  %v1218_v45 = vmul.f32 %v2645_v3, %v3549_v61 }
 0x986   :  { %2648 = vrcp.f32 %v1177_v5 }
 0x987   :  { %v1229_v36 = vpack.c.bf16 %v1219_v17, %v1218_v45  ;;  %2650 = vrcp.f32 %v1173_v29 }
 0x989   :  { %1233 = vmatpush.bf16.xpose.msrb.mxu2 %v1230_v14  ;;  %1248 = vmatpush.bf16.xpose.msra.mxu0 %v1230_v14 }
 0x98b   :  { %v2647_v40 = vpop.eup %2646 }
 0x98c   :  { %v1171_v47 = vpop.xlane.xlu0 %1170  ;;  %v2649_v48 = vpop.eup %2648  ;;  %v1217_v33 = vmul.f32 %v2647_v40, %v3576_v13 }
 0x98d   :  { %v1169_v12 = vpop.xlane.xlu1 %1168  ;;  %v1216_v24 = vmul.f32 %v2649_v48, %v3570_v18  ;;  %v2651_v43 = vpop.eup %2650 }
 0x98e   :  { %v1214_v42 = vmul.f32 %v2651_v43, %v3578_v62 }
 0x98f   :  { %v1228_v44 = vpack.c.bf16 %v1217_v33, %v1216_v24 }
 0x991   :  { %1234 = vmatpush.bf16.xpose.msrb.mxu2 %v1229_v36  ;;  %1249 = vmatpush.bf16.xpose.msra.mxu0 %v1229_v36 }
 0x994   :  { %v1175_v34 = vpop.xlane.xlu0 %1174 }
 0x995   :  { %2652 = vrcp.f32 %v1175_v34  ;;  %v1165_v13 = vpop.xlane.xlu1 %1164 }
 0x996   :  { %2654 = vrcp.f32 %v1171_v47 }
 0x997   :  { %2656 = vrcp.f32 %v1169_v12 }
 0x999   :  { %1235 = vmatpush.bf16.xpose.msrb.mxu2 %v1228_v44  ;;  %1250 = vmatpush.bf16.xpose.msra.mxu0 %v1228_v44 }
 0x99b   :  { %v2653_v61 = vpop.eup %2652 }
 0x99c   :  { %v1215_v31 = vmul.f32 %v2653_v61, %v3592_v0  ;;  %v1167_v38 = vpop.xlane.xlu0 %1166  ;;  %v2655_v46 = vpop.eup %2654 }
 0x99d   :  { %v2657_v5 = vpop.eup %2656  ;;  %2658 = vrcp.f32 %v1167_v38  ;;  %v1213_v8 = vmul.f32 %v2655_v46, %v3584_v49  ;;  %v1161_v14 = vpop.xlane.xlu1 %1160 }
 0x99e   :  { %v1227_v20 = vpack.c.bf16 %v1215_v31, %v1214_v42  ;;  %v1212_v18 = vmul.f32 %v2657_v5, %v3586_v63  ;;  %2660 = vrcp.f32 %v1165_v13 }
 0x9a0   :  { %v1226_v58 = vpack.c.bf16 %v1213_v8, %v1212_v18 }
 0x9a1   :  { %1236 = vmatpush.bf16.xpose.msrb.mxu2 %v1227_v20  ;;  %1251 = vmatpush.bf16.xpose.msra.mxu0 %v1227_v20 }
 0x9a3   :  { %v2659_v9 = vpop.eup %2658 }
 0x9a4   :  { %v1163_v4 = vpop.xlane.xlu0 %1162  ;;  %v2661_v62 = vpop.eup %2660  ;;  %v1211_v0 = vmul.f32 %v2659_v9, %v3599_v52 }
 0x9a5   :  { %2662 = vrcp.f32 %v1163_v4  ;;  %v1210_v2 = vmul.f32 %v2661_v62, %v3594_v7 }
 0x9a6   :  { %2664 = vrcp.f32 %v1161_v14 }
 0x9a7   :  { %v1225_v3 = vpack.c.bf16 %v1211_v0, %v1210_v2 }
 0x9a9   :  { %1237 = vmatpush.bf16.xpose.msrb.mxu2 %v1226_v58  ;;  %1252 = vmatpush.bf16.xpose.msra.mxu0 %v1226_v58 }
 0x9ab   :  { %v2663_v29 = vpop.eup %2662 }
 0x9ac   :  { %v2665_v63 = vpop.eup %2664  ;;  %v1209_v49 = vmul.f32 %v2663_v29, %v3605_v56  ;;  %v3636_v56 = vld [vmem:[%s4140_s1] sm:$0xf]  ;;  %s2843_s1 = smov 128  }
 0x9ad   :  { %v1208_v47 = vmul.f32 %v2665_v63, %v3601_v53 }
 0x9af   :  { %v1224_v40 = vpack.c.bf16 %v1209_v49, %v1208_v47 }
 0x9b1   :  { %1238 = vmatpush.bf16.xpose.msrb.mxu2 %v1225_v3  ;;  %1253 = vmatpush.bf16.xpose.msra.mxu0 %v1225_v3 }
 0x9b5   :  { %v285_v17 = vpop.permute.xlu1 %284 }
 0x9b6   :  { %v393_v45 = vadd.f32 %v3031_v23, %v285_v17  ;;  %v1744_v17 = vld [vmem:[%s4121_s14 + $0x50] sm:$0xff] }
 0x9b7   :  { %v305_v36 = vpop.permute.xlu0 %304 }
 0x9b8   :  { %v1261_v48 = vpack.c.bf16 %v393_v45, %v393_v45  ;;  %v403_v52 = vadd.f32 %v3380_v26, %v305_v36  ;;  %v2101_v45 = vld [vmem:[%s4123_s16 + $0x10] sm:$0xff] }
 0x9b9   :  { %1239 = vmatpush.bf16.xpose.msrb.mxu2 %v1224_v40  ;;  %1254 = vmatpush.bf16.xpose.msra.mxu0 %v1224_v40  ;;  %v2162_v40 = vld [vmem:[%s4125_s18] sm:$0xff] }
 0x9ba   :  { %v1262_v7 = vpack.c.bf16 %v403_v52, %v403_v52  ;;  %1264 = vxpose.xlu1.c.b16.start.end [1/1] (short) %v1261_v48, 128 }
 0x9bc   :  { %v1305_v33 = vsel %vm476_vm5, %v1262_v7, 0 }
 0x9c0   :  { %1240 = vmatmul.bf16.vlgmr.msrb.gmra.mxu2 %v3636_v56 }
 0x9c1   :  { %1314 = vmatpush.bf16.msra.mxu2 %v1305_v33 }
 0xa43   :  { %v1241_v24 = vpop.f32.mrf.mxu2 }
 0xa44   :  { %1246 = vst [vmem:[#allocation5 + $0x10] sm:$0xff] %v1241_v24 }
 0xa4b   :  { %v1243_v44 = vpop.f32.mrf.mxu2 }
 0xa66   :  { %v1272_v23 = vpop.trf.xlu1 }
 0xa67   :  { %2358 = vmatmul.msk.bf16.vlgmr.msra.gmra.mxu2 %vm451_vm6, %v1272_v23 }
 0xa76   :  { %v1273_v53 = vpop.trf.xlu1 }
 0xa77   :  { %2359 = vmatmul.msk.bf16.gmra.mxu2 %vm451_vm6, %v1273_v53 }
 0xa86   :  { %v1274_v26 = vpop.trf.xlu1 }
 0xa87   :  { %2360 = vmatmul.msk.bf16.gmra.mxu2 %vm451_vm6, %v1274_v26 }
 0xa96   :  { %v1275_v34 = vpop.trf.xlu1 }
 0xa97   :  { %2361 = vmatmul.msk.bf16.gmra.mxu2 %vm451_vm6, %v1275_v34 }
 0xaa6   :  { %v1276_v12 = vpop.trf.xlu1 }
 0xaa7   :  { %2362 = vmatmul.msk.bf16.gmra.mxu2 %vm451_vm6, %v1276_v12 }
 0xab6   :  { %v1277_v43 = vpop.trf.xlu1 }
 0xab7   :  { %2363 = vmatmul.msk.bf16.gmra.mxu2 %vm451_vm6, %v1277_v43 }
 0xac6   :  { %v1278_v61 = vpop.trf.xlu1 }
 0xac7   :  { %2364 = vmatmul.msk.bf16.gmra.mxu2 %vm451_vm6, %v1278_v61 }
 0xad6   :  { %v1279_v42 = vpop.trf.xlu1 }
 0xad7   :  { %2365 = vmatmul.msk.bf16.gmra.mxu2 %vm451_vm6, %v1279_v42 }
 0xaea   :  { %v1316_v31 = vpop.f32.mrf.mxu2 }
 0xaeb   :  { %v3661_v29 = vadd.f32 %v3507_v16, %v1316_v31 }
 0xaf2   :  { %v1318_v38 = vpop.f32.mrf.mxu2 }
 0xafa   :  { %v1321_v20 = vpop.f32.mrf.mxu2 }
 0xafb   :  { %v3657_v3 = vadd.f32 %v3432_v21, %v1321_v20 }
 0xb02   :  { %v1323_v46 = vpop.f32.mrf.mxu2 }
 0xb03   :  { %v3698_v36 = vadd.f32 %v3525_v6, %v1323_v46  ;;  %v2165_v6 = vld [vmem:[%s4125_s18 + $0x18] sm:$0xff] }
 0xb0a   :  { %v1326_v13 = vpop.f32.mrf.mxu2 }
 0xb0b   :  { %v3653_v0 = vadd.f32 %v3423_v30, %v1326_v13 }
 0xb12   :  { %v1328_v5 = vpop.f32.mrf.mxu2 }
 0xb1a   :  { %v1331_v18 = vpop.f32.mrf.mxu2 }
 0xb1b   :  { %v3649_v14 = vadd.f32 %v3441_v25, %v1331_v18 }
 0xb22   :  { %v1333_v8 = vpop.f32.mrf.mxu2 }
 0xb2a   :  { %v1336_v4 = vpop.f32.mrf.mxu2 }
 0xb2b   :  { %v1337_v58 = vadd.f32 %v3465_v27, %v1336_v4 }
 0xb2d   :  { %1372 = vmax.xlane.f32.xlu2 %v1337_v58 }
 0xb32   :  { %v1338_v9 = vpop.f32.mrf.mxu2 }
 0xb33   :  { %v1339_v16 = vadd.f32 %v3480_v32, %v1338_v9 }
 0xb35   :  { %1368 = vmax.xlane.f32.xlu2 %v3649_v14 }
 0xb3a   :  { %v1341_v62 = vpop.f32.mrf.mxu2 }
 0xb3b   :  { %v1342_v30 = vadd.f32 %v3450_v41, %v1341_v62  ;;  %v3680_v41 = vadd.f32 %v3515_v39, %v1328_v5 }
 0xb3d   :  { %1364 = vmax.xlane.f32.xlu2 %v3653_v0 }
 0xb42   :  { %v1343_v2 = vpop.f32.mrf.mxu2 }
 0xb43   :  { %v1344_v21 = vadd.f32 %v3456_v50, %v1343_v2  ;;  %v1736_v50 = vld [vmem:[%s4121_s14 + $0x10] sm:$0xff] }
 0xb45   :  { %1360 = vmax.xlane.f32.xlu2 %v3657_v3 }
 0xb4a   :  { %v1346_v27 = vpop.f32.mrf.mxu2 }
 0xb4b   :  { %v1347_v25 = vadd.f32 %v3473_v51, %v1346_v27  ;;  %v3673_v51 = vadd.f32 %v3543_v22, %v1333_v8  ;;  %v1735_v22 = vld [vmem:[%s4121_s14 + $0x8] sm:$0xff] }
 0xb4d   :  { %1356 = vmax.xlane.f32.xlu2 %v3661_v29  ;;  %1380 = vmax.xlane.f32.xlu0 %v1347_v25 }
 0xb52   :  { %v1348_v63 = vpop.f32.mrf.mxu2 }
 0xb53   :  { %v3667_v49 = vadd.f32 %v3489_v1, %v1348_v63 }
 0xb55   :  { %1382 = vmax.xlane.f32.xlu1 %v3667_v49  ;;  %1376 = vmax.xlane.f32.xlu0 %v1342_v30 }
 0xb5a   :  { %v1351_v32 = vpop.f32.mrf.mxu2 }
 0xb5b   :  { %v1352_v1 = vadd.f32 %v3495_v37, %v1351_v32  ;;  %v2159_v37 = vld [vmem:[%s4124_s17 + $0x8] sm:$0xff] }
 0xb5d   :  { %1378 = vmax.xlane.f32.xlu0 %v1344_v21 }
 0xb62   :  { %v1353_v47 = vpop.f32.mrf.mxu2 }
 0xb63   :  { %v3691_v39 = vadd.f32 %v3501_v28, %v1353_v47  ;;  %v3705_v28 = vadd.f32 %v3534_v35, %v1318_v38 }
 0xb65   :  { %1374 = vmax.xlane.f32.xlu0 %v1339_v16 }
 0xb6d   :  { %1370 = vmax.xlane.f32.xlu0 %v3673_v51 }
 0xb6e   :  { %1802 = vperm.xlu1 %2472, %v1744_v17  }
 0xb75   :  { %1366 = vmax.xlane.f32.xlu0 %v3680_v41 }
 0xb76   :  { %1762 = vperm.xlu1 %2472, %v1736_v50  }
 0xb7d   :  { %1384 = vmax.xlane.f32.xlu0 %v1352_v1 }
 0xb7e   :  { %1757 = vperm.xlu1 %2472, %v1735_v22  }
 0xb85   :  { %1386 = vmax.xlane.f32.xlu0 %v3691_v39 }
 0xb86   :  { %2115 = vperm.xlu1 %2472, %v2101_v45  }
 0xb8d   :  { %1362 = vmax.xlane.f32.xlu0 %v3698_v36 }
 0xb8e   :  { %2216 = vperm.xlu1 %2472, %v2159_v37  }
 0xb95   :  { %1358 = vmax.xlane.f32.xlu0 %v3705_v28 }
 0xb96   :  { %2235 = vperm.xlu1 %2472, %v2162_v40  }
 0xb9e   :  { %2250 = vperm.xlu1 %2472, %v2165_v6  }
 0xba0   :  { %v1373_v48 = vpop.xlane.xlu2 %1372 }
 0xba1   :  { %v1396_v52 = vsub.f32 %v1337_v58, %v1373_v48 }
 0xba3   :  { %v1420_v7 = vmul.f32 1.442695, %v1396_v52 }
 0xba5   :  { %2666 = vpow2.f32 %v1420_v7 }
 0xba8   :  { %v1369_v9 = vpop.xlane.xlu2 %1368 }
 0xba9   :  { %v1394_v63 = vsub.f32 %v3649_v14, %v1369_v9  ;;  %v1617_v9 = vld [vmem:[%s4119_s12 + $0x18] sm:$0xff] }
 0xbab   :  { %v3714_v33 = vpop.eup %2666 }
 0xbac   :  { %1452 = vadd.xlane.f32.xlu2 %v3714_v33 }
 0xbc0   :  { %v1381_v35 = vpop.xlane.xlu0 %1380 }
 0xbc1   :  { %v1400_v34 = vsub.f32 %v1347_v25, %v1381_v35 }
 0xbc3   :  { %v1428_v24 = vmul.f32 1.442695, %v1400_v34 }
 0xbc8   :  { %v1377_v23 = vpop.xlane.xlu0 %1376  ;;  %v1383_v13 = vpop.xlane.xlu1 %1382 }
 0xbc9   :  { %v1398_v53 = vsub.f32 %v1342_v30, %v1377_v23  ;;  %v1401_v18 = vsub.f32 %v3667_v49, %v1383_v13  ;;  %v1365_v30 = vpop.xlane.xlu2 %1364  ;;  %v1416_v49 = vmul.f32 1.442695, %v1394_v63  ;;  %v1612_v13 = vld [vmem:[%s4118_s11 + $0x10] sm:$0xff]  ;;  %v1611_v63 = vld [vmem:[%s4118_s11 + $0x8] sm:$0xff] }
 0xbca   :  { %v1392_v32 = vsub.f32 %v3653_v0, %v1365_v30  ;;  %v1614_v30 = vld [vmem:[%s4119_s12] sm:$0xff] }
 0xbcb   :  { %v1424_v26 = vmul.f32 1.442695, %v1398_v53  ;;  %v1430_v4 = vmul.f32 1.442695, %v1401_v18  ;;  %v1613_v18 = vld [vmem:[%s4118_s11 + $0x18] sm:$0xff] }
 0xbcc   :  { %v1412_v22 = vmul.f32 1.442695, %v1392_v32  ;;  %v1749_v32 = vld [vmem:[%s4121_s14 + $0x78] sm:$0xff] }
 0xbcd   :  { %2668 = vpow2.f32 %v1424_v26 }
 0xbce   :  { %2670 = vpow2.f32 %v1428_v24 }
 0xbd0   :  { %v1379_v12 = vpop.xlane.xlu0 %1378 }
 0xbd1   :  { %v1399_v38 = vsub.f32 %v1344_v21, %v1379_v12  ;;  %v1361_v14 = vpop.xlane.xlu2 %1360 }
 0xbd3   :  { %v3717_v44 = vpop.eup %2668  ;;  %v1426_v46 = vmul.f32 1.442695, %v1399_v38  ;;  %v1548_v38 = vld [vmem:[%s4117_s10 + $0x8] sm:$0xff] }
 0xbd4   :  { %1456 = vadd.xlane.f32.xlu2 %v3717_v44  ;;  %v3720_v42 = vpop.eup %2670 }
 0xbd8   :  { %v1375_v43 = vpop.xlane.xlu0 %1374 }
 0xbd9   :  { %v1397_v61 = vsub.f32 %v1339_v16, %v1375_v43  ;;  %v1357_v6 = vpop.xlane.xlu2 %1356 }
 0xbda   :  { %v1388_v35 = vsub.f32 %v3661_v29, %v1357_v6  ;;  %v1742_v6 = vld [vmem:[%s4121_s14 + $0x40] sm:$0xff] }
 0xbdb   :  { %v1422_v31 = vmul.f32 1.442695, %v1397_v61  ;;  %v265_v61 = vld [vmem:[%s4115_s8 + $0x50] sm:$0xff] }
 0xbdc   :  { %1460 = vadd.xlane.f32.xlu2 %v3720_v42  ;;  %v1404_v23 = vmul.f32 1.442695, %v1388_v35 }
 0xbdd   :  { %2672 = vpow2.f32 %v1422_v31  ;;  %v1547_v31 = vld [vmem:[%s4117_s10] sm:$0xff] }
 0xbde   :  { %2674 = vpow2.f32 %v1426_v46  ;;  %v1550_v46 = vld [vmem:[%s4117_s10 + $0x18] sm:$0xff] }
 0xbdf   :  { %2676 = vpow2.f32 %v1430_v4 }
 0xbe0   :  { %v1371_v20 = vpop.xlane.xlu0 %1370 }
 0xbe3   :  { %v3723_v5 = vpop.eup %2672 }
 0xbe4   :  { %1454 = vadd.xlane.f32.xlu0 %v3723_v5  ;;  %v3727_v58 = vpop.eup %2674 }
 0xbe5   :  { %v3730_v27 = vpop.eup %2676 }
 0xbe8   :  { %v1367_v8 = vpop.xlane.xlu0 %1366 }
 0xbe9   :  { %v1393_v0 = vsub.f32 %v3680_v41, %v1367_v8  ;;  %v1616_v8 = vld [vmem:[%s4119_s12 + $0x10] sm:$0xff] }
 0xbeb   :  { %v1414_v48 = vmul.f32 1.442695, %v1393_v0 }
 0xbec   :  { %1458 = vadd.xlane.f32.xlu0 %v3727_v58 }
 0xbf0   :  { %v1385_v62 = vpop.xlane.xlu0 %1384 }
 0xbf1   :  { %v1402_v2 = vsub.f32 %v1352_v1, %v1385_v62  ;;  %v1395_v1 = vsub.f32 %v3673_v51, %v1371_v20  ;;  %v1549_v20 = vld [vmem:[%s4117_s10 + $0x10] sm:$0xff]  ;;  %v1610_v62 = vld [vmem:[%s4118_s11] sm:$0xff] }
 0xbf3   :  { %v1432_v25 = vmul.f32 1.442695, %v1402_v2  ;;  %v1418_v47 = vmul.f32 1.442695, %v1395_v1 }
 0xbf4   :  { %1462 = vadd.xlane.f32.xlu0 %v3730_v27 }
 0xbf5   :  { %2678 = vpow2.f32 %v1432_v25 }
 0xbf6   :  { %2680 = vpow2.f32 %v1416_v49 }
 0xbf8   :  { %v1387_v21 = vpop.xlane.xlu0 %1386 }
 0xbf9   :  { %v1403_v16 = vsub.f32 %v3691_v39, %v1387_v21  ;;  %v1390_v39 = vsub.f32 %v3657_v3, %v1361_v14  ;;  %v1615_v21 = vld [vmem:[%s4119_s12 + $0x8] sm:$0xff] }
 0xbfb   :  { %v3735_v17 = vpop.eup %2678  ;;  %v1434_v50 = vmul.f32 1.442695, %v1403_v16  ;;  %v1408_v40 = vmul.f32 1.442695, %v1390_v39 }
 0xbfc   :  { %1464 = vadd.xlane.f32.xlu2 %v3735_v17  ;;  %v3740_v45 = vpop.eup %2680 }
 0xbfd   :  { %2682 = vpow2.f32 %v1434_v50  ;;  %v1748_v50 = vld [vmem:[%s4121_s14 + $0x70] sm:$0xff] }
 0xbfe   :  { %2684 = vpow2.f32 %v1412_v22  ;;  %v1746_v22 = vld [vmem:[%s4121_s14 + $0x60] sm:$0xff] }
 0xbff   :  { %2686 = vpow2.f32 %v1418_v47  ;;  %v1747_v47 = vld [vmem:[%s4121_s14 + $0x68] sm:$0xff] }
 0xc00   :  { %v1363_v51 = vpop.xlane.xlu0 %1362  ;;  %2688 = vpow2.f32 %v1408_v40  ;;  %v1745_v40 = vld [vmem:[%s4121_s14 + $0x58] sm:$0xff] }
 0xc01   :  { %2690 = vpow2.f32 %v1414_v48  ;;  %v1391_v3 = vsub.f32 %v3698_v36, %v1363_v51 }
 0xc02   :  { %2692 = vpow2.f32 %v1404_v23 }
 0xc03   :  { %v3742_v37 = vpop.eup %2682  ;;  %v1410_v41 = vmul.f32 1.442695, %v1391_v3 }
 0xc04   :  { %1448 = vadd.xlane.f32.xlu2 %v3740_v45  ;;  %1466 = vadd.xlane.f32.xlu0 %v3742_v37  ;;  %v3748_v52 = vpop.eup %2684 }
 0xc05   :  { %v3750_v7 = vpop.eup %2686  ;;  %2694 = vpow2.f32 %v1410_v41 }
 0xc06   :  { %v3756_v53 = vpop.eup %2688 }
 0xc07   :  { %v3758_v34 = vpop.eup %2690 }
 0xc08   :  { %v1359_v26 = vpop.xlane.xlu0 %1358  ;;  %v3763_v24 = vpop.eup %2692 }
 0xc09   :  { %v1389_v29 = vsub.f32 %v3705_v28, %v1359_v26  ;;  %v266_v28 = vld [vmem:[%s4115_s8 + $0x58] sm:$0xff]  ;;  %v1743_v26 = vld [vmem:[%s4121_s14 + $0x48] sm:$0xff] }
 0xc0b   :  { %v1406_v12 = vmul.f32 1.442695, %v1389_v29  ;;  %v3765_v43 = vpop.eup %2694 }
 0xc0c   :  { %1444 = vadd.xlane.f32.xlu2 %v3748_v52  ;;  %1450 = vadd.xlane.f32.xlu0 %v3750_v7 }
 0xc0d   :  { %2696 = vpow2.f32 %v1406_v12 }
 0xc13   :  { %v3769_v36 = vpop.eup %2696 }
 0xc14   :  { %1440 = vadd.xlane.f32.xlu2 %v3756_v53  ;;  %1446 = vadd.xlane.f32.xlu0 %v3758_v34 }
 0xc1c   :  { %1436 = vadd.xlane.f32.xlu2 %v3763_v24  ;;  %1442 = vadd.xlane.f32.xlu0 %v3765_v43 }
 0xc1f   :  { %v3799_v4 = vpop.xlane.xlu2 %1452 }
 0xc24   :  { %1438 = vadd.xlane.f32.xlu0 %v3769_v36 }
 0xc34   :  { %319 = vperm.xlu2 %2471, %v265_v61   ;;  %v1740_v61 = vld [vmem:[%s4121_s14 + $0x30] sm:$0xff] }
 0xc38   :  { %324 = vperm.xlu0 %2473, %v266_v28  }
 0xc3c   :  { %1553 = vperm.xlu2 %2471, %v1547_v31  }
 0xc40   :  { %1558 = vperm.xlu0 %2473, %v1548_v38   ;;  %v1741_v38 = vld [vmem:[%s4121_s14 + $0x38] sm:$0xff] }
 0xc44   :  { %1563 = vperm.xlu2 %2471, %v1549_v20  }
 0xc47   :  { %v1457_v25 = vpop.xlane.xlu2 %1456 }
 0xc48   :  { %1568 = vperm.xlu0 %2473, %v1550_v46  }
 0xc4c   :  { %1680 = vperm.xlu2 %2471, %v1612_v13  }
 0xc4f   :  { %v1461_v16 = vpop.xlane.xlu2 %1460 }
 0xc50   :  { %1685 = vperm.xlu0 %2473, %v1613_v18  }
 0xc54   :  { %1704 = vperm.xlu2 %2471, %v1616_v8  }
 0xc57   :  { %v1455_v2 = vpop.xlane.xlu0 %1454 }
 0xc58   :  { %1709 = vperm.xlu0 %2473, %v1617_v9  }
 0xc5c   :  { %1670 = vperm.xlu2 %2471, %v1610_v62   ;;  %v1739_v62 = vld [vmem:[%s4121_s14 + $0x28] sm:$0xff] }
 0xc5f   :  { %v1459_v49 = vpop.xlane.xlu0 %1458 }
 0xc60   :  { %1675 = vperm.xlu0 %2473, %v1611_v63  }
 0xc64   :  { %1694 = vperm.xlu2 %2471, %v1614_v30  }
 0xc67   :  { %v1463_v1 = vpop.xlane.xlu0 %1462 }
 0xc68   :  { %1699 = vperm.xlu0 %2473, %v1615_v21  }
 0xc6c   :  { %1822 = vperm.xlu2 %2471, %v1748_v50   ;;  %v1734_v50 = vld [vmem:[%s4121_s14] sm:$0xff] }
 0xc6f   :  { %v1465_v14 = vpop.xlane.xlu2 %1464 }
 0xc70   :  { %1827 = vperm.xlu0 %2473, %v1749_v32   ;;  %2698 = vrcp.f32 %v1465_v14 }
 0xc74   :  { %1812 = vperm.xlu2 %2471, %v1746_v22  }
 0xc76   :  { %v2699_v51 = vpop.eup %2698 }
 0xc77   :  { %v1449_v39 = vpop.xlane.xlu2 %1448  ;;  %v1467_v0 = vpop.xlane.xlu0 %1466  ;;  %v1498_v3 = vmul.f32 %v2699_v51, %v3735_v17 }
 0xc78   :  { %1817 = vperm.xlu0 %2473, %v1747_v47   ;;  %2700 = vrcp.f32 %v1467_v0  ;;  %v2100_v47 = vld [vmem:[%s4123_s16 + $0x8] sm:$0xff] }
 0xc79   :  { %2702 = vrcp.f32 %v1463_v1 }
 0xc7a   :  { %2704 = vrcp.f32 %v1461_v16 }
 0xc7b   :  { %2706 = vrcp.f32 %v1459_v49 }
 0xc7c   :  { %1807 = vperm.xlu2 %2471, %v1745_v40   ;;  %2708 = vrcp.f32 %v1457_v25 }
 0xc7d   :  { %2710 = vrcp.f32 %v1455_v2 }
 0xc7e   :  { %v2701_v48 = vpop.eup %2700  ;;  %2712 = vrcp.f32 %v3799_v4 }
 0xc7f   :  { %v1445_v35 = vpop.xlane.xlu2 %1444  ;;  %v1499_v23 = vmul.f32 %v2701_v48, %v3742_v37  ;;  %v2703_v29 = vpop.eup %2702  ;;  %v2158_v48 = vld [vmem:[%s4124_s17] sm:$0xff] }
 0xc80   :  { %1792 = vperm.xlu0 %2473, %v1742_v6   ;;  %v2705_v12 = vpop.eup %2704  ;;  %v1497_v17 = vmul.f32 %v2703_v29, %v3730_v27  ;;  %v1451_v46 = vpop.xlane.xlu0 %1450  ;;  %v1738_v27 = vld [vmem:[%s4121_s14 + $0x20] sm:$0xff] }
 0xc81   :  { %v1507_v41 = vpack.c.bf16 %v1499_v23, %v1498_v3  ;;  %v1496_v28 = vmul.f32 %v2705_v12, %v3720_v42  ;;  %v2707_v20 = vpop.eup %2706  ;;  %2714 = vrcp.f32 %v1451_v46 }
 0xc82   :  { %v2709_v13 = vpop.eup %2708  ;;  %v1495_v18 = vmul.f32 %v2707_v20, %v3727_v58  ;;  %v1737_v58 = vld [vmem:[%s4121_s14 + $0x18] sm:$0xff]  ;;  %2716 = vrcp.f32 %v1449_v39 }
 0xc83   :  { %1508 = vmatpush.bf16.xpose.msra.mxu3 %v1507_v41  ;;  %1523 = vmatpush.bf16.xpose.msrb.mxu1 %v1507_v41  ;;  %v1506_v31 = vpack.c.bf16 %v1497_v17, %v1496_v28  ;;  %v1494_v8 = vmul.f32 %v2709_v13, %v3717_v44  ;;  %v2711_v25 = vpop.eup %2710  ;;  %v2164_v28 = vld [vmem:[%s4125_s18 + $0x10] sm:$0xff] }
 0xc84   :  { %1797 = vperm.xlu2 %2471, %v1743_v26   ;;  %v2713_v2 = vpop.eup %2712  ;;  %v1493_v63 = vmul.f32 %v2711_v25, %v3723_v5  ;;  %v2161_v26 = vld [vmem:[%s4124_s17 + $0x18] sm:$0xff] }
 0xc85   :  { %v1505_v9 = vpack.c.bf16 %v1495_v18, %v1494_v8  ;;  %v1492_v49 = vmul.f32 %v2713_v2, %v3714_v33 }
 0xc87   :  { %v1441_v37 = vpop.xlane.xlu2 %1440  ;;  %v1504_v16 = vpack.c.bf16 %v1493_v63, %v1492_v49  ;;  %v2715_v32 = vpop.eup %2714 }
 0xc88   :  { %1782 = vperm.xlu0 %2473, %v1740_v61   ;;  %v1447_v4 = vpop.xlane.xlu0 %1446  ;;  %v2717_v1 = vpop.eup %2716  ;;  %v1491_v5 = vmul.f32 %v2715_v32, %v3750_v7  ;;  %v2102_v7 = vld [vmem:[%s4123_s16 + $0x18] sm:$0xff]  ;;  %v2163_v61 = vld [vmem:[%s4125_s18 + $0x8] sm:$0xff]  ;;  %s2844_s18 = smov 8  }
 0xc89   :  { %2718 = vrcp.f32 %v1447_v4  ;;  %v1490_v14 = vmul.f32 %v2717_v1, %v3740_v45 }
 0xc8a   :  { %2720 = vrcp.f32 %v1445_v35 }
 0xc8b   :  { %1509 = vmatpush.bf16.xpose.msra.mxu3 %v1506_v31  ;;  %1524 = vmatpush.bf16.xpose.msrb.mxu1 %v1506_v31  ;;  %v1503_v22 = vpack.c.bf16 %v1491_v5, %v1490_v14 }
 0xc8c   :  { %1787 = vperm.xlu2 %2471, %v1741_v38  }
 0xc8f   :  { %v1437_v42 = vpop.xlane.xlu2 %1436  ;;  %v2719_v39 = vpop.eup %2718 }
 0xc90   :  { %1772 = vperm.xlu0 %2473, %v1738_v27   ;;  %v1443_v33 = vpop.xlane.xlu0 %1442  ;;  %v2721_v0 = vpop.eup %2720  ;;  %v1489_v40 = vmul.f32 %v2719_v39, %v3758_v34  ;;  %v2160_v34 = vld [vmem:[%s4124_s17 + $0x10] sm:$0xff]  ;;  %s2280_s17 = sshll.u32 %s4127_s20, 4  ;;  %s2281_s17 = int_to_ptr.hbm [resolvable:$true] %s2280_s17 }
 0xc91   :  { %2722 = vrcp.f32 %v1443_v33  ;;  %v1488_v45 = vmul.f32 %v2721_v0, %v3748_v52 }
 0xc92   :  { %2724 = vrcp.f32 %v1441_v37 }
 0xc93   :  { %1510 = vmatpush.bf16.xpose.msra.mxu3 %v1505_v9  ;;  %1525 = vmatpush.bf16.xpose.msrb.mxu1 %v1505_v9  ;;  %v1502_v6 = vpack.c.bf16 %v1489_v40, %v1488_v45  ;;  %v2841_v9 = vmov 32.0  }
 0xc94   :  { %1777 = vperm.xlu2 %2471, %v1739_v62  }
 0xc97   :  { %v320_v44 = vpop.permute.xlu2 %319  ;;  %v2723_v35 = vpop.eup %2722 }
 0xc98   :  { %v411_v30 = vadd.f32 %v3415_v15, %v320_v44  ;;  %1767 = vperm.xlu0 %2473, %v1737_v58   ;;  %v2099_v15 = vld [vmem:[%s4123_s16] sm:$0xff]  ;;  %v1439_v51 = vpop.xlane.xlu0 %1438  ;;  %v2725_v3 = vpop.eup %2724  ;;  %v1487_v23 = vmul.f32 %v2723_v35, %v3765_v43 }
 0xc99   :  { %2726 = vrcp.f32 %v1439_v51  ;;  %v1486_v52 = vmul.f32 %v2725_v3, %v3756_v53 }
 0xc9a   :  { %v987_v21 = vpack.c.bf16 %v411_v30, %v411_v30  ;;  %2728 = vrcp.f32 %v1437_v42 }
 0xc9b   :  { %1511 = vmatpush.bf16.xpose.msra.mxu3 %v1504_v16  ;;  %1526 = vmatpush.bf16.xpose.msrb.mxu1 %v1504_v16  ;;  %v1501_v41 = vpack.c.bf16 %v1487_v23, %v1486_v52  ;;  %2730 = vrcp.f32 %v2841_v9 }
 0xc9c   :  { %1752 = vperm.xlu2 %2471, %v1734_v50   ;;  %1255 = vmatmul.bf16.vlgmr.msra.gmra.mxu0 %v987_v21 }
 0xc9f   :  { %v2727_v29 = vpop.eup %2726  ;;  %v1554_v18 = vpop.permute.xlu2 %1553 }
 0xca0   :  { %2105 = vperm.xlu0 %2473, %v2099_v15   ;;  %v2729_v12 = vpop.eup %2728  ;;  %v1485_v43 = vmul.f32 %v2727_v29, %v3769_v36 }
 0xca1   :  { %v1484_v17 = vmul.f32 %v2729_v12, %v3763_v24  ;;  %v2430_v24 = vld [vmem:[%s4116_s9] sm:$0xff] }
 0xca3   :  { %1512 = vmatpush.bf16.xpose.msra.mxu3 %v1503_v22  ;;  %1527 = vmatpush.bf16.xpose.msrb.mxu1 %v1503_v22  ;;  %v1500_v37 = vpack.c.bf16 %v1485_v43, %v1484_v17 }
 0xca4   :  { %2110 = vperm.xlu2 %2471, %v2100_v47  }
 0xca7   :  { %v1564_v2 = vpop.permute.xlu2 %1563 }
 0xca8   :  { %2120 = vperm.xlu0 %2473, %v2102_v7  }
 0xcaa   :  { %v325_v53 = vpop.permute.xlu0 %324 }
 0xcab   :  { %1513 = vmatpush.bf16.xpose.msra.mxu3 %v1502_v6  ;;  %1528 = vmatpush.bf16.xpose.msrb.mxu1 %v1502_v6  ;;  %v413_v31 = vadd.f32 %v3418_v54, %v325_v53  ;;  %v2431_v54 = vld [vmem:[%s4116_s9 + $0x8] sm:$0xff] }
 0xcac   :  { %2211 = vperm.xlu2 %2471, %v2158_v48  }
 0xcad   :  { %v1263_v38 = vpack.c.bf16 %v413_v31, %v413_v31 }
 0xcb0   :  { %2221 = vperm.xlu0 %2473, %v2160_v34  }
 0xcb2   :  { %v1559_v8 = vpop.permute.xlu0 %1558 }
 0xcb3   :  { %1514 = vmatpush.bf16.xpose.msra.mxu3 %v1501_v41  ;;  %1529 = vmatpush.bf16.xpose.msrb.mxu1 %v1501_v41 }
 0xcb4   :  { %2226 = vperm.xlu2 %2471, %v2161_v26  }
 0xcb8   :  { %2240 = vperm.xlu0 %2473, %v2163_v61   ;;  %v1681_v61 = vpop.permute.xlu2 %1680 }
 0xcba   :  { %v1569_v44 = vpop.permute.xlu0 %1568 }
 0xcbb   :  { %1515 = vmatpush.bf16.xpose.msra.mxu3 %v1500_v37  ;;  %1530 = vmatpush.bf16.xpose.msrb.mxu1 %v1500_v37 }
 0xcbc   :  { %2245 = vperm.xlu2 %2471, %v2164_v28  }
 0xcc0   :  { %v1705_v28 = vpop.permute.xlu2 %1704 }
 0xcc2   :  { %1531 = vmatmul.bf16.vlgmr.msrb.gmra.mxu1 %v1263_v38  ;;  %1516 = vmatmul.bf16.vlgmr.msra.gmra.mxu3 %v3636_v56  ;;  %v1686_v43 = vpop.permute.xlu0 %1685 }
 0xcca   :  { %v1710_v31 = vpop.permute.xlu0 %1709 }
 0xd19   :  { %v1256_v20 = vpop.f32.mrf.mxu0 }
 0xd21   :  { %v1258_v36 = vpop.f32.mrf.mxu0 }
 0xd3f   :  { %v1532_v46 = vpop.f32.mrf.mxu1 }
 0xd40   :  { %v1546_v13 = vpack.c.bf16 %v1532_v46, %v1256_v20 }
 0xd42   :  { %1593 = vmatpush.bf16.msrb.mxu0 %v1546_v13  ;;  %v1671_v13 = vpop.permute.xlu2 %1670 }
 0xd46   :  { %1594 = vmatpush.bf16.msrb.mxu0 %v1545_v57  ;;  %v2731_v57 = vpop.eup %2730 }
 0xd47   :  { %v1534_v27 = vpop.f32.mrf.mxu1  ;;  %v1628_v49 = vmul.f32 32.0, %v2731_v57  ;;  %vm1632_vm7 = vweird.f32 %v2731_v57 }
 0xd49   :  { %2374 = vmatmul.msk.bf16.vlgmr.msrb.gmra.mxu0 %vm357_vm4, %v2430_v24  ;;  %v1629_v1 = vsub.f32 1.0, %v1628_v49  ;;  %v1676_v24 = vpop.permute.xlu0 %1675 }
 0xd4b   :  { %v1630_v33 = vmul.f32 %v2731_v57, %v1629_v1  ;;  %v1517_v1 = vpop.f32.mrf.mxu3 }
 0xd4c   :  { %1522 = vst [vmem:[#allocation5 + $0x18] sm:$0xff] %v1517_v1 }
 0xd4d   :  { %v1631_v47 = vadd.f32 %v2731_v57, %v1630_v33  ;;  %v2438_v33 = vld [vmem:[%s4120_s13 + $0x30] sm:$0xff] }
 0xd4e   :  { %2286 = dma.vmem_to_hbm [thread:$0]  %s2279_s22, 512, %s2281_s17, [#allocation6], %s2843_s1, %s2843_s1, %s2844_s18  }
 0xd4f   :  { %v3914_v39 = vsel %vm1632_vm7, %v2731_v57, %v1631_v47 }
 0xd59   :  { %2375 = vmatmul.msk.bf16.gmra.mxu0 %vm357_vm4, %v2431_v54 }
 0xdc6   :  { %v1596_v56 = vpop.f32.mrf.mxu0 }
 0xdc7   :  { %v1597_v55 = vadd.f32 %v1596_v56, %v1554_v18 }
 0xdc9   :  { %v1606_v4 = vadd.f32 %v1597_v55, %v3006_v10 }
 0xdce   :  { %v1598_v42 = vpop.f32.mrf.mxu0 }
 0xdcf   :  { %v1599_v25 = vadd.f32 %v1598_v42, %v1559_v8 }
 0xdd1   :  { %v1607_v58 = vadd.f32 %v1599_v25, %v3008_v11 }
 0xdd3   :  { %v1618_v21 = vadd.f32 %v1607_v58, %v1606_v4 }
 0xdd6   :  { %v1601_v62 = vpop.f32.mrf.mxu0 }
 0xdd7   :  { %v1602_v19 = vadd.f32 %v1601_v62, %v1564_v2 }
 0xdd9   :  { %v1608_v63 = vadd.f32 %v1602_v19, %v3000_v59 }
 0xddb   :  { %v1619_v50 = vadd.f32 %v1618_v21, %v1608_v63  ;;  %v2432_v21 = vld [vmem:[%s4120_s13] sm:$0xff] }
 0xdde   :  { %v1603_v30 = vpop.f32.mrf.mxu0 }
 0xddf   :  { %v1604_v16 = vadd.f32 %v1603_v30, %v1569_v44 }
 0xde1   :  { %v1609_v32 = vadd.f32 %v1604_v16, %v3002_v60  ;;  %v2436_v16 = vld [vmem:[%s4120_s13 + $0x20] sm:$0xff] }
 0xde3   :  { %v1620_v15 = vadd.f32 %v1619_v50, %v1609_v32  ;;  %v2433_v50 = vld [vmem:[%s4120_s13 + $0x8] sm:$0xff] }
 0xde5   :  { %v1621_v5 = vrot.slane %v1620_v15, 4 }
 0xde7   :  { %v1622_v14 = vadd.f32 %v1621_v5, %v1620_v15  ;;  %v1519_v15 = vpop.f32.mrf.mxu3  ;;  %v2434_v5 = vld [vmem:[%s4120_s13 + $0x10] sm:$0xff] }
 0xde9   :  { %v1623_v22 = vrot.slane %v1622_v14, 2 }
 0xdeb   :  { %v1624_v11 = vadd.f32 %v1623_v22, %v1622_v14  ;;  %v2435_v14 = vld [vmem:[%s4120_s13 + $0x18] sm:$0xff] }
 0xdec   :  { %v2439_v22 = vld [vmem:[%s4120_s13 + $0x38] sm:$0xff] }
 0xded   :  { %v1625_v10 = vrot.slane %v1624_v11, 1 }
 0xdef   :  { %v1626_v59 = vadd.f32 %v1625_v10, %v1624_v11 }
 0xdf1   :  { %v1634_v0 = vmul.f32 %v3914_v39, %v1626_v59 }
 0xdf3   :  { %v1635_v7 = vsub.f32 %v1606_v4, %v1634_v0  ;;  %v1636_v40 = vsub.f32 %v1607_v58, %v1634_v0  ;;  %v1637_v45 = vsub.f32 %v1608_v63, %v1634_v0  ;;  %v1638_v51 = vsub.f32 %v1609_v32, %v1634_v0  ;;  %v1695_v58 = vpop.permute.xlu2 %1694  ;;  %v1700_v4 = vpop.permute.xlu0 %1699  ;;  %v2437_v32 = vld [vmem:[%s4120_s13 + $0x28] sm:$0xff] }
 0xdf5   :  { %v1639_v60 = vmul.f32 %v1635_v7, %v1635_v7  ;;  %v1640_v6 = vmul.f32 %v1636_v40, %v1636_v40  ;;  %v1641_v48 = vmul.f32 %v1637_v45, %v1637_v45  ;;  %v1642_v3 = vmul.f32 %v1638_v51, %v1638_v51 }
 0xdf7   :  { %v1643_v35 = vadd.f32 %v1640_v6, %v1639_v60 }
 0xdf9   :  { %v1644_v34 = vadd.f32 %v1643_v35, %v1641_v48 }
 0xdfb   :  { %v1645_v23 = vadd.f32 %v1644_v34, %v1642_v3  ;;  %v1823_v59 = vpop.permute.xlu2 %1822 }
 0xdfd   :  { %v1646_v52 = vrot.slane %v1645_v23, 4 }
 0xdff   :  { %v1647_v41 = vadd.f32 %v1646_v52, %v1645_v23 }
 0xe01   :  { %v1648_v26 = vrot.slane %v1647_v41, 2 }
 0xe03   :  { %v1649_v29 = vadd.f32 %v1648_v26, %v1647_v41 }
 0xe05   :  { %v1650_v12 = vrot.slane %v1649_v29, 1 }
 0xe07   :  { %v1651_v17 = vadd.f32 %v1650_v12, %v1649_v29 }
 0xe09   :  { %v1652_v53 = vmul.f32 %v1651_v17, %v3914_v39 }
 0xe0b   :  { %v1653_v37 = vadd.f32 1e-05, %v1652_v53 }
 0xe0d   :  { %2732 = vrsqrt.f32 %v1653_v37  ;;  %vm1660_vm9 = vweird.f32 %v1653_v37 }
 0xe13   :  { %v2733_v38 = vpop.eup %2732 }
 0xe14   :  { %v1655_v20 = vmul.f32 %v2733_v38, %v1653_v37  ;;  %vm1661_vm8 = vweird.f32 %v2733_v38 }
 0xe15   :  { %vm1662_vm10 = vmor %vm1660_vm9, %vm1661_vm8 }
 0xe16   :  { %v1656_v36 = vmul.f32 %v2733_v38, %v1655_v20 }
 0xe18   :  { %v1657_v46 = vmul.f32 0.5, %v1656_v36 }
 0xe1a   :  { %v1658_v27 = vsub.f32 1.5, %v1657_v46 }
 0xe1c   :  { %v1659_v54 = vmul.f32 %v2733_v38, %v1658_v27 }
 0xe1e   :  { %v1663_v56 = vsel %vm1662_vm10, %v2733_v38, %v1659_v54 }
 0xe1f   :  { %v1667_v18 = vmul.f32 %v1663_v56, %v1638_v51  ;;  %v1666_v42 = vmul.f32 %v1663_v56, %v1637_v45  ;;  %v1664_v8 = vmul.f32 %v1663_v56, %v1635_v7  ;;  %v1665_v9 = vmul.f32 %v1663_v56, %v1636_v40  ;;  %v1828_v7 = vpop.permute.xlu0 %1827  ;;  %v1813_v45 = vpop.permute.xlu2 %1812 }
 0xe21   :  { %v1691_v62 = vmul.f32 %v1686_v43, %v1667_v18  ;;  %v1690_v25 = vmul.f32 %v1681_v61, %v1666_v42  ;;  %v1688_v2 = vmul.f32 %v1671_v13, %v1664_v8  ;;  %v1689_v55 = vmul.f32 %v1676_v24, %v1665_v9  ;;  %v1803_v43 = vpop.permute.xlu1 %1802 }
 0xe23   :  { %v3918_v19 = vadd.f32 %v1705_v28, %v1690_v25  ;;  %v3920_v57 = vadd.f32 %v1710_v31, %v1691_v62  ;;  %v3924_v44 = vadd.f32 %v1695_v58, %v1688_v2  ;;  %v3926_v30 = vadd.f32 %v1700_v4, %v1689_v55 }
 0xe25   :  { %v1733_v63 = vpack.c.bf16 %v3920_v57, %v3918_v19  ;;  %v1732_v49 = vpack.c.bf16 %v3926_v30, %v3924_v44 }
 0xe27   :  { %1900 = vmatpush.bf16.msra.mxu1 %v1733_v63  ;;  %2443 = vmatpush.bf16.msrb.mxu3 %v1733_v63  ;;  %v1818_v6 = vpop.permute.xlu0 %1817  ;;  %v1808_v35 = vpop.permute.xlu2 %1807 }
 0xe29   :  { %v1763_v25 = vpop.permute.xlu1 %1762 }
 0xe2b   :  { %1901 = vmatpush.bf16.msra.mxu1 %v1732_v49  ;;  %2444 = vmatpush.bf16.msrb.mxu3 %v1732_v49 }
 0xe2e   :  { %2408 = vmatmul.msk.bf16.vlgmr.msra.gmra.mxu1 %vm357_vm4, %v2432_v21  ;;  %2412 = vmatmul.msk.bf16.vlgmr.msrb.gmra.mxu3 %vm357_vm4, %v2436_v16 }
 0xe2f   :  { %v1793_v34 = vpop.permute.xlu0 %1792  ;;  %v1798_v41 = vpop.permute.xlu2 %1797 }
 0xe37   :  { %v1783_v26 = vpop.permute.xlu0 %1782  ;;  %v1788_v37 = vpop.permute.xlu2 %1787 }
 0xe3e   :  { %2409 = vmatmul.msk.bf16.gmra.mxu1 %vm357_vm4, %v2433_v50  ;;  %2413 = vmatmul.msk.bf16.gmra.mxu3 %vm357_vm4, %v2437_v32 }
 0xe3f   :  { %v1773_v13 = vpop.permute.xlu0 %1772  ;;  %v1778_v49 = vpop.permute.xlu2 %1777 }
 0xe4e   :  { %2410 = vmatmul.msk.bf16.gmra.mxu1 %vm357_vm4, %v2434_v5  ;;  %2414 = vmatmul.msk.bf16.gmra.mxu3 %vm357_vm4, %v2438_v33 }
 0xe5e   :  { %2411 = vmatmul.msk.bf16.gmra.mxu1 %vm357_vm4, %v2435_v14  ;;  %2415 = vmatmul.msk.bf16.gmra.mxu3 %vm357_vm4, %v2439_v22 }
 0xeab   :  { %v3962_v47 = vpop.f32.mrf.mxu1 }
 0xeb1   :  { %v1923_v11 = vpop.f32.mrf.mxu3 }
 0xeb2   :  { %v3987_v54 = vadd.f32 %v1923_v11, %v1793_v34 }
 0xeb3   :  { %v3964_v10 = vpop.f32.mrf.mxu1 }
 0xeb4   :  { %v1951_v4 = vmul.f32 %v3987_v54, %v3987_v54 }
 0xeb9   :  { %v1925_v0 = vpop.f32.mrf.mxu3 }
 0xeba   :  { %v3980_v20 = vadd.f32 %v1925_v0, %v1798_v41 }
 0xebb   :  { %v3966_v40 = vpop.f32.mrf.mxu1 }
 0xebc   :  { %v1952_v9 = vmul.f32 %v3980_v20, %v3980_v20 }
 0xebe   :  { %v1968_v32 = vmul.f32 %v1952_v9, %v3980_v20 }
 0xec1   :  { %v1928_v51 = vpop.f32.mrf.mxu3 }
 0xec2   :  { %v3976_v31 = vadd.f32 %v1928_v51, %v1803_v43  ;;  %v1768_v51 = vpop.permute.xlu0 %1767  ;;  %v4030_v43 = vadd.f32 %v3966_v40, %v1763_v25 }
 0xec3   :  { %v1910_v60 = vpop.f32.mrf.mxu1 }
 0xec4   :  { %v1953_v56 = vmul.f32 %v3976_v31, %v3976_v31 }
 0xec6   :  { %v1969_v63 = vmul.f32 %v1953_v56, %v3976_v31 }
 0xec8   :  { %v1985_v0 = vmul.f32 0.044715, %v1969_v63 }
 0xec9   :  { %v1930_v48 = vpop.f32.mrf.mxu3 }
 0xeca   :  { %v3972_v53 = vadd.f32 %v1930_v48, %v1808_v35 }
 0xecb   :  { %v1913_v3 = vpop.f32.mrf.mxu1 }
 0xecc   :  { %v1954_v36 = vmul.f32 %v3972_v53, %v3972_v53 }
 0xece   :  { %v1970_v62 = vmul.f32 %v1954_v36, %v3972_v53 }
 0xed0   :  { %v1986_v1 = vmul.f32 0.044715, %v1970_v62 }
 0xed1   :  { %v1933_v23 = vpop.f32.mrf.mxu3 }
 0xed2   :  { %v3970_v17 = vadd.f32 %v1933_v23, %v1813_v45  ;;  %v4015_v45 = vadd.f32 %v1913_v3, %v1773_v13  ;;  %v1984_v23 = vmul.f32 0.044715, %v1968_v32 }
 0xed3   :  { %v1915_v52 = vpop.f32.mrf.mxu1 }
 0xed4   :  { %v1955_v38 = vmul.f32 %v3970_v17, %v3970_v17  ;;  %v4006_v15 = vadd.f32 %v1915_v52, %v1778_v49  ;;  %v4022_v52 = vadd.f32 %v1910_v60, %v1768_v51  ;;  %v1947_v60 = vmul.f32 %v4015_v45, %v4015_v45 }
 0xed6   :  { %v1971_v42 = vmul.f32 %v1955_v38, %v3970_v17  ;;  %v1948_v41 = vmul.f32 %v4006_v15, %v4006_v15  ;;  %v1946_v40 = vmul.f32 %v4022_v52, %v4022_v52 }
 0xed8   :  { %v1987_v21 = vmul.f32 0.044715, %v1971_v42  ;;  %v1964_v42 = vmul.f32 %v1948_v41, %v4006_v15 }
 0xed9   :  { %v1935_v29 = vpop.f32.mrf.mxu3 }
 0xeda   :  { %v3968_v12 = vadd.f32 %v1935_v29, %v1818_v6  ;;  %v2003_v6 = vadd.f32 %v1987_v21, %v3970_v17  ;;  %v1980_v32 = vmul.f32 0.044715, %v1964_v42 }
 0xedb   :  { %v1918_v61 = vpop.f32.mrf.mxu1 }
 0xedc   :  { %v1956_v28 = vmul.f32 %v3968_v12, %v3968_v12  ;;  %v4003_v16 = vadd.f32 %v1918_v61, %v1783_v26  ;;  %v2019_v38 = vmul.f32 0.7978846, %v2003_v6 }
 0xede   :  { %v1972_v24 = vmul.f32 %v1956_v28, %v3968_v12  ;;  %v1949_v48 = vmul.f32 %v4003_v16, %v4003_v16  ;;  %v1758_v28 = vpop.permute.xlu1 %1757 }
 0xedf   :  { %v4037_v13 = vadd.f32 %v3964_v10, %v1758_v28  ;;  %v1945_v10 = vmul.f32 %v4030_v43, %v4030_v43 }
 0xee0   :  { %v1988_v2 = vmul.f32 0.044715, %v1972_v24  ;;  %v1965_v36 = vmul.f32 %v1949_v48, %v4003_v16  ;;  %v2000_v24 = vadd.f32 %v1984_v23, %v3980_v20 }
 0xee1   :  { %v1938_v46 = vpop.f32.mrf.mxu3  ;;  %v1944_v49 = vmul.f32 %v4037_v13, %v4037_v13 }
 0xee2   :  { %v3985_v27 = vadd.f32 %v1938_v46, %v1823_v59  ;;  %v2004_v33 = vadd.f32 %v1988_v2, %v3968_v12  ;;  %v1967_v59 = vmul.f32 %v1951_v4, %v3987_v54  ;;  %v1981_v4 = vmul.f32 0.044715, %v1965_v36 }
 0xee3   :  { %v1920_v18 = vpop.f32.mrf.mxu1  ;;  %v2016_v21 = vmul.f32 0.7978846, %v2000_v24  ;;  %v1960_v51 = vmul.f32 %v1944_v49, %v4037_v13 }
 0xee4   :  { %v1957_v8 = vmul.f32 %v3985_v27, %v3985_v27  ;;  %v3998_v58 = vadd.f32 %v1920_v18, %v1788_v37  ;;  %v2020_v3 = vmul.f32 0.7978846, %v2004_v33  ;;  %v1983_v61 = vmul.f32 0.044715, %v1967_v59  ;;  %v1753_v18 = vpop.permute.xlu2 %1752 }
 0xee5   :  { %v2001_v37 = vadd.f32 %v1985_v0, %v3976_v31  ;;  %v4045_v62 = vadd.f32 %v3962_v47, %v1753_v18  ;;  %v1962_v47 = vmul.f32 %v1946_v40, %v4022_v52  ;;  %v1997_v0 = vadd.f32 %v1981_v4, %v4003_v16 }
 0xee6   :  { %v1973_v55 = vmul.f32 %v1957_v8, %v3985_v27  ;;  %v1950_v22 = vmul.f32 %v3998_v58, %v3998_v58  ;;  %v1999_v25 = vadd.f32 %v1983_v61, %v3987_v54 }
 0xee7   :  { %v2017_v2 = vmul.f32 0.7978846, %v2001_v37  ;;  %v2013_v37 = vmul.f32 0.7978846, %v1997_v0 }
 0xee8   :  { %v1989_v50 = vmul.f32 0.044715, %v1973_v55  ;;  %v1966_v26 = vmul.f32 %v1950_v22, %v3998_v58  ;;  %v1963_v55 = vmul.f32 %v1947_v60, %v4015_v45  ;;  %v2015_v33 = vmul.f32 0.7978846, %v1999_v25 }
 0xee9   :  { %v1940_v5 = vpop.f32.mrf.mxu3  ;;  %v1961_v22 = vmul.f32 %v1945_v10, %v4030_v43 }
 0xeea   :  { %v2005_v14 = vadd.f32 %v1989_v50, %v3985_v27  ;;  %v4012_v11 = vadd.f32 %v1940_v5, %v1828_v7  ;;  %v2002_v7 = vadd.f32 %v1986_v1, %v3972_v53  ;;  %v1982_v8 = vmul.f32 0.044715, %v1966_v26 }
 0xeeb   :  { %v1943_v5 = vmul.f32 %v4045_v62, %v4045_v62  ;;  %v1979_v59 = vmul.f32 0.044715, %v1963_v55 }
 0xeec   :  { %v2021_v35 = vmul.f32 0.7978846, %v2005_v14  ;;  %v1958_v34 = vmul.f32 %v4012_v11, %v4012_v11  ;;  %v2018_v56 = vmul.f32 0.7978846, %v2002_v7  ;;  %v1998_v1 = vadd.f32 %v1982_v8, %v3998_v58 }
 0xeed   :  { %v1959_v41 = vmul.f32 %v1943_v5, %v4045_v62  ;;  %v1995_v61 = vadd.f32 %v1979_v59, %v4015_v45 }
 0xeee   :  { %v1974_v29 = vmul.f32 %v1958_v34, %v4012_v11  ;;  %2734 = vtanh.f32 %v2021_v35  ;;  %v1978_v35 = vmul.f32 0.044715, %v1962_v47  ;;  %v1996_v34 = vadd.f32 %v1980_v32, %v4006_v15 }
 0xeef   :  { %2736 = vtanh.f32 %v2020_v3  ;;  %v2014_v23 = vmul.f32 0.7978846, %v1998_v1  ;;  %v2011_v10 = vmul.f32 0.7978846, %v1995_v61 }
 0xef0   :  { %v1990_v46 = vmul.f32 0.044715, %v1974_v29  ;;  %2738 = vtanh.f32 %v2019_v38  ;;  %v1977_v29 = vmul.f32 0.044715, %v1961_v22  ;;  %v1994_v24 = vadd.f32 %v1978_v35, %v4022_v52 }
 0xef1   :  { %2740 = vtanh.f32 %v2018_v56  ;;  %v2012_v40 = vmul.f32 0.7978846, %v1996_v34 }
 0xef2   :  { %v2006_v9 = vadd.f32 %v1990_v46, %v4012_v11  ;;  %v1976_v46 = vmul.f32 0.044715, %v1960_v51  ;;  %v1993_v25 = vadd.f32 %v1977_v29, %v4030_v43 }
 0xef4   :  { %v2022_v63 = vmul.f32 0.7978846, %v2006_v9  ;;  %v2735_v50 = vpop.eup %2734  ;;  %v1975_v9 = vmul.f32 0.044715, %v1959_v41  ;;  %v2009_v22 = vmul.f32 0.7978846, %v1993_v25 }
 0xef5   :  { %v2737_v14 = vpop.eup %2736  ;;  %v2053_v6 = vadd.f32 1.0, %v2735_v50  ;;  %v2010_v50 = vmul.f32 0.7978846, %v1994_v24 }
 0xef6   :  { %2742 = vtanh.f32 %v2022_v63  ;;  %v2739_v48 = vpop.eup %2738  ;;  %v2052_v3 = vadd.f32 1.0, %v2737_v14  ;;  %v1991_v14 = vadd.f32 %v1975_v9, %v4045_v62 }
 0xef7   :  { %2744 = vtanh.f32 %v2017_v2  ;;  %v2741_v7 = vpop.eup %2740  ;;  %v2069_v60 = vmul.f32 0.5, %v2053_v6  ;;  %v2051_v38 = vadd.f32 1.0, %v2739_v48 }
 0xef8   :  { %2746 = vtanh.f32 %v2016_v21  ;;  %v2068_v18 = vmul.f32 0.5, %v2052_v3  ;;  %v2050_v42 = vadd.f32 1.0, %v2741_v7  ;;  %v1992_v21 = vadd.f32 %v1976_v46, %v4037_v13 }
 0xef9   :  { %2748 = vtanh.f32 %v2015_v33  ;;  %v2085_v2 = vmul.f32 %v2069_v60, %v3985_v27  ;;  %v2067_v4 = vmul.f32 0.5, %v2051_v38 }
 0xefa   :  { %2750 = vtanh.f32 %v2014_v23  ;;  %v2084_v32 = vmul.f32 %v2068_v18, %v3968_v12  ;;  %v2066_v1 = vmul.f32 0.5, %v2050_v42  ;;  %v2008_v51 = vmul.f32 0.7978846, %v1992_v21 }
 0xefb   :  { %2752 = vtanh.f32 %v2013_v37  ;;  %v2083_v27 = vmul.f32 %v2067_v4, %v3970_v17  ;;  %v2007_v23 = vmul.f32 0.7978846, %v1991_v14 }
 0xefc   :  { %v2743_v26 = vpop.eup %2742  ;;  %2754 = vtanh.f32 %v2012_v40  ;;  %v2082_v48 = vmul.f32 %v2066_v1, %v3972_v53  ;;  %v2116_v1 = vpop.permute.xlu1 %2115 }
 0xefd   :  { %v2054_v28 = vadd.f32 1.0, %v2743_v26  ;;  %v2745_v36 = vpop.eup %2744  ;;  %2756 = vtanh.f32 %v2011_v10  ;;  %v2097_v6 = vpack.c.bf16 %v2084_v32, %v2083_v27 }
 0xefe   :  { %v2747_v8 = vpop.eup %2746  ;;  %v2049_v63 = vadd.f32 1.0, %v2745_v36  ;;  %2758 = vtanh.f32 %v2010_v50 }
 0xeff   :  { %v2070_v56 = vmul.f32 0.5, %v2054_v28  ;;  %v2749_v49 = vpop.eup %2748  ;;  %v2048_v5 = vadd.f32 1.0, %v2747_v8  ;;  %2760 = vtanh.f32 %v2009_v22 }
 0xf00   :  { %v2751_v33 = vpop.eup %2750  ;;  %v2047_v59 = vadd.f32 1.0, %v2749_v49  ;;  %2762 = vtanh.f32 %v2008_v51 }
 0xf01   :  { %v2086_v55 = vmul.f32 %v2070_v56, %v4012_v11  ;;  %v2065_v11 = vmul.f32 0.5, %v2049_v63  ;;  %v2753_v0 = vpop.eup %2752  ;;  %v2064_v12 = vmul.f32 0.5, %v2048_v5  ;;  %v2046_v35 = vadd.f32 1.0, %v2751_v33  ;;  %v2111_v5 = vpop.permute.xlu2 %2110 }
 0xf02   :  { %v2755_v34 = vpop.eup %2754  ;;  %v2063_v41 = vmul.f32 0.5, %v2047_v59  ;;  %v2045_v3 = vadd.f32 1.0, %v2753_v0  ;;  %2764 = vtanh.f32 %v2007_v23 }
 0xf03   :  { %v2098_v47 = vpack.c.bf16 %v2086_v55, %v2085_v2  ;;  %v2081_v7 = vmul.f32 %v2065_v11, %v3976_v31  ;;  %v2757_v17 = vpop.eup %2756  ;;  %v2080_v29 = vmul.f32 %v2064_v12, %v3980_v20  ;;  %v2062_v61 = vmul.f32 0.5, %v2046_v35 }
 0xf04   :  { %v2044_v37 = vadd.f32 1.0, %v2755_v34  ;;  %v2759_v60 = vpop.eup %2758  ;;  %v2079_v53 = vmul.f32 %v2063_v41, %v3987_v54  ;;  %v2061_v28 = vmul.f32 0.5, %v2045_v3  ;;  %v2043_v38 = vadd.f32 1.0, %v2757_v17 }
 0xf05   :  { %2135 = vmatpush.bf16.msra.mxu0 %v2098_v47  ;;  %2445 = vmatpush.bf16.msrb.mxu1 %v2098_v47  ;;  %v2096_v26 = vpack.c.bf16 %v2082_v48, %v2081_v7  ;;  %v2761_v36 = vpop.eup %2760  ;;  %v2078_v31 = vmul.f32 %v2062_v61, %v3998_v58  ;;  %v2042_v40 = vadd.f32 1.0, %v2759_v60 }
 0xf06   :  { %v2095_v46 = vpack.c.bf16 %v2080_v29, %v2079_v53  ;;  %v2060_v24 = vmul.f32 0.5, %v2044_v37  ;;  %v2763_v56 = vpop.eup %2762  ;;  %v2077_v20 = vmul.f32 %v2061_v28, %v4003_v16  ;;  %v2059_v18 = vmul.f32 0.5, %v2043_v38 }
 0xf07   :  { %v2041_v42 = vadd.f32 1.0, %v2761_v36  ;;  %v2058_v54 = vmul.f32 0.5, %v2042_v40  ;;  %v2040_v10 = vadd.f32 1.0, %v2763_v56 }
 0xf08   :  { %v2765_v8 = vpop.eup %2764  ;;  %v2094_v9 = vpack.c.bf16 %v2078_v31, %v2077_v20  ;;  %v2076_v25 = vmul.f32 %v2060_v24, %v4006_v15  ;;  %v2075_v2 = vmul.f32 %v2059_v18, %v4015_v45  ;;  %v2440_v45 = vld [vmem:[%s4122_s15] sm:$0xff] }
 0xf09   :  { %2136 = vmatpush.bf16.msra.mxu0 %v2097_v6  ;;  %2446 = vmatpush.bf16.msrb.mxu1 %v2097_v6  ;;  %v2057_v58 = vmul.f32 0.5, %v2041_v42  ;;  %v2039_v55 = vadd.f32 1.0, %v2765_v8  ;;  %v2074_v63 = vmul.f32 %v2058_v54, %v4022_v52  ;;  %v2056_v49 = vmul.f32 0.5, %v2040_v10  ;;  %v2441_v52 = vld [vmem:[%s4122_s15 + $0x8] sm:$0xff]  ;;  %s2845_s15 = smov [#allocation3]  }
 0xf0a   :  { %v2093_v4 = vpack.c.bf16 %v2076_v25, %v2075_v2  ;;  %v2212_v25 = vpop.permute.xlu2 %2211  ;;  %s2265_s20 = sshll.u32 %s2845_s15, 4  ;;  %s2266_s20 = int_to_ptr.vmem [resolvable:$true] %s2265_s20 }
 0xf0b   :  { %v2073_v16 = vmul.f32 %v2057_v58, %v4030_v43  ;;  %v2055_v21 = vmul.f32 0.5, %v2039_v55  ;;  %v2072_v15 = vmul.f32 %v2056_v49, %v4037_v13  ;;  %v2106_v43 = vpop.permute.xlu0 %2105 }
 0xf0d   :  { %2137 = vmatpush.bf16.msra.mxu0 %v2096_v26  ;;  %2447 = vmatpush.bf16.msrb.mxu1 %v2096_v26  ;;  %v2092_v50 = vpack.c.bf16 %v2074_v63, %v2073_v16  ;;  %v2071_v47 = vmul.f32 %v2055_v21, %v4045_v62 }
 0xf0f   :  { %v2091_v32 = vpack.c.bf16 %v2072_v15, %v2071_v47 }
 0xf11   :  { %2138 = vmatpush.bf16.msra.mxu0 %v2095_v46  ;;  %2448 = vmatpush.bf16.msrb.mxu1 %v2095_v46 }
 0xf12   :  { %v2227_v63 = vpop.permute.xlu2 %2226 }
 0xf13   :  { %v2121_v59 = vpop.permute.xlu0 %2120 }
 0xf15   :  { %2139 = vmatpush.bf16.msra.mxu0 %v2094_v9  ;;  %2449 = vmatpush.bf16.msrb.mxu1 %v2094_v9  ;;  %v2217_v9 = vpop.permute.xlu1 %2216 }
 0xf19   :  { %2140 = vmatpush.bf16.msra.mxu0 %v2093_v4  ;;  %2450 = vmatpush.bf16.msrb.mxu1 %v2093_v4 }
 0xf1b   :  { %v2222_v55 = vpop.permute.xlu0 %2221 }
 0xf1d   :  { %2141 = vmatpush.bf16.msra.mxu0 %v2092_v50  ;;  %2451 = vmatpush.bf16.msrb.mxu1 %v2092_v50  ;;  %v2236_v58 = vpop.permute.xlu1 %2235 }
 0xf21   :  { %2142 = vmatpush.bf16.msra.mxu0 %v2091_v32  ;;  %2452 = vmatpush.bf16.msrb.mxu1 %v2091_v32 }
 0xf24   :  { %2143 = vmatmul.bf16.vlgmr.msra.gmra.mxu0 %v2440_v45  ;;  %2148 = vmatmul.bf16.vlgmr.msrb.gmra.mxu1 %v2441_v52 }
 0xfa1   :  { %v2144_v13 = vpop.f32.mrf.mxu0  ;;  %v2149_v62 = vpop.f32.mrf.mxu1 }
 0xfa2   :  { %v2145_v33 = vadd.f32 %v2144_v13, %v2106_v43  ;;  %v2150_v27 = vadd.f32 %v2149_v62, %v2116_v1  ;;  %v2251_v13 = vpop.permute.xlu1 %2250  ;;  %v2241_v62 = vpop.permute.xlu0 %2240 }
 0xfa3   :  { %v2246_v1 = vpop.permute.xlu2 %2245 }
 0xfa4   :  { %v2154_v0 = vadd.f32 %v2145_v33, %v3924_v44  ;;  %v2156_v48 = vadd.f32 %v2150_v27, %v3918_v19 }
 0xfa9   :  { %v2146_v14 = vpop.f32.mrf.mxu0  ;;  %v2151_v22 = vpop.f32.mrf.mxu1 }
 0xfaa   :  { %v2147_v11 = vadd.f32 %v2146_v14, %v2111_v5  ;;  %v2152_v6 = vadd.f32 %v2151_v22, %v2121_v59 }
 0xfac   :  { %v2155_v51 = vadd.f32 %v2147_v11, %v3926_v30  ;;  %v2157_v35 = vadd.f32 %v2152_v6, %v3920_v57 }
 0xfae   :  { %v2166_v12 = vadd.f32 %v2155_v51, %v2154_v0 }
 0xfb0   :  { %v2167_v34 = vadd.f32 %v2166_v12, %v2156_v48 }
 0xfb2   :  { %v2168_v23 = vadd.f32 %v2167_v34, %v2157_v35 }
 0xfb4   :  { %v2169_v7 = vrot.slane %v2168_v23, 4 }
 0xfb6   :  { %v2170_v41 = vadd.f32 %v2169_v7, %v2168_v23 }
 0xfb8   :  { %v2171_v3 = vrot.slane %v2170_v41, 2 }
 0xfba   :  { %v2172_v17 = vadd.f32 %v2171_v3, %v2170_v41 }
 0xfbc   :  { %v2173_v26 = vrot.slane %v2172_v17, 1 }
 0xfbe   :  { %v2174_v29 = vadd.f32 %v2173_v26, %v2172_v17 }
 0xfc0   :  { %v2175_v61 = vmul.f32 %v2174_v29, %v3914_v39 }
 0xfc2   :  { %v2176_v37 = vsub.f32 %v2154_v0, %v2175_v61  ;;  %v2177_v44 = vsub.f32 %v2155_v51, %v2175_v61  ;;  %v2178_v60 = vsub.f32 %v2156_v48, %v2175_v61  ;;  %v2179_v30 = vsub.f32 %v2157_v35, %v2175_v61 }
 0xfc4   :  { %v2180_v53 = vmul.f32 %v2176_v37, %v2176_v37  ;;  %v2181_v28 = vmul.f32 %v2177_v44, %v2177_v44  ;;  %v2182_v19 = vmul.f32 %v2178_v60, %v2178_v60  ;;  %v2183_v36 = vmul.f32 %v2179_v30, %v2179_v30 }
 0xfc6   :  { %v2184_v38 = vadd.f32 %v2181_v28, %v2180_v53 }
 0xfc8   :  { %v2185_v57 = vadd.f32 %v2184_v38, %v2182_v19 }
 0xfca   :  { %v2186_v46 = vadd.f32 %v2185_v57, %v2183_v36 }
 0xfcc   :  { %v2187_v31 = vrot.slane %v2186_v46, 4 }
 0xfce   :  { %v2188_v24 = vadd.f32 %v2187_v31, %v2186_v46 }
 0xfd0   :  { %v2189_v40 = vrot.slane %v2188_v24, 2 }
 0xfd2   :  { %v2190_v56 = vadd.f32 %v2189_v40, %v2188_v24 }
 0xfd4   :  { %v2191_v20 = vrot.slane %v2190_v56, 1 }
 0xfd6   :  { %v2192_v18 = vadd.f32 %v2191_v20, %v2190_v56 }
 0xfd8   :  { %v2193_v42 = vmul.f32 %v2192_v18, %v3914_v39 }
 0xfda   :  { %v2194_v8 = vadd.f32 1e-05, %v2193_v42 }
 0xfdc   :  { %2766 = vrsqrt.f32 %v2194_v8  ;;  %vm2201_vm12 = vweird.f32 %v2194_v8 }
 0xfe2   :  { %v2767_v54 = vpop.eup %2766 }
 0xfe3   :  { %v2196_v10 = vmul.f32 %v2767_v54, %v2194_v8  ;;  %vm2202_vm11 = vweird.f32 %v2767_v54 }
 0xfe4   :  { %vm2203_vm13 = vmor %vm2201_vm12, %vm2202_vm11 }
 0xfe5   :  { %v2197_v2 = vmul.f32 %v2767_v54, %v2196_v10 }
 0xfe7   :  { %v2198_v4 = vmul.f32 0.5, %v2197_v2 }
 0xfe9   :  { %v2199_v49 = vsub.f32 1.5, %v2198_v4 }
 0xfeb   :  { %v2200_v16 = vmul.f32 %v2767_v54, %v2199_v49 }
 0xfed   :  { %v2204_v21 = vsel %vm2203_vm13, %v2767_v54, %v2200_v16 }
 0xfee   :  { %v2205_v50 = vmul.f32 %v2204_v21, %v2176_v37  ;;  %v2206_v15 = vmul.f32 %v2204_v21, %v2177_v44  ;;  %v2207_v39 = vmul.f32 %v2204_v21, %v2178_v60  ;;  %v2208_v47 = vmul.f32 %v2204_v21, %v2179_v30 }
 0xff0   :  { %v2229_v32 = vmul.f32 %v2212_v25, %v2205_v50  ;;  %v2230_v45 = vmul.f32 %v2217_v9, %v2206_v15  ;;  %v2231_v52 = vmul.f32 %v2222_v55, %v2207_v39  ;;  %v2232_v43 = vmul.f32 %v2227_v63, %v2208_v47 }
 0xff2   :  { %v2256_v5 = vadd.f32 %v2251_v13, %v2232_v43  ;;  %v2253_v33 = vadd.f32 %v2236_v58, %v2229_v32  ;;  %v2254_v14 = vadd.f32 %v2241_v62, %v2230_v45  ;;  %v2255_v22 = vadd.f32 %v2246_v1, %v2231_v52 }
 0xff4   :  { %2260 = vst [vmem:[#allocation3 + $0x18] sm:$0xff] %v2256_v5 }
 0xff5   :  { %2257 = vst [vmem:[#allocation3] sm:$0xff] %v2253_v33 }
 0xff6   :  { %2258 = vst [vmem:[#allocation3 + $0x8] sm:$0xff] %v2254_v14 }
 0xff7   :  { %2259 = vst [vmem:[#allocation3 + $0x10] sm:$0xff] %v2255_v22 }
 0xff8   :  { %2273 = dma.vmem_to_hbm [thread:$0]  %s2266_s20, 512, %s2268_s2, [#allocation4], %s2843_s1, %s2843_s1, %s2844_s18  }
 0xff9   :  { %2833 = dma.done.wait [#allocation4], 512  }
 0xffa   :  { %2834 = vsyncadd [#allocation4], 4294966784 }
 0xffb   :  { %2835 = dma.done.wait [#allocation6], 512  }
 0xffc   :  { %2836 = vsyncadd [#allocation6], 4294966784 }
 0xffd   :  { %2295 = vsyncpa [#allocation4], 1 }
 0xffe   :  { %2296 = vsyncpa [#allocation6], 1 }

</bundles_post_ra>
